<compile_context>
chip_gen: v7x
topology: tpu7x:2x2x1
jax: 0.10.0
libtpu: 0.0.40
codegen_flags: <defaults>
</compile_context>

<pallas_src>
import jax
import jax.numpy as jnp
import numpy as np
from jax.experimental import pallas as pl
from jax.experimental.pallas import tpu as pltpu


# --------------------------------------------------------------------------
# Kernel body: one batch tile per grid step.  l2_ref / l1_ref may be None
# (logits-only mode: no aux HBM writeback at all).
# --------------------------------------------------------------------------
def _convnet_body(x_ref, a1_ref, b1_ref, w2g_ref, b2g_ref,
                  wfc1_ref, bfc1_ref, wfc_ref, bfc_ref,
                  logits_ref, l2_ref, l1_ref):
    H2 = x_ref.shape[1]                  # num_features + 8
    C1 = a1_ref.shape[1] // H2           # 64
    H1 = H2 - 4
    G = w2g_ref.shape[0] // C1           # h-positions per layer2 matmul (4 or 8)
    C2 = w2g_ref.shape[1] // G           # 32
    n_grp = H2 // G
    TB = x_ref.shape[0]
    F1p = wfc1_ref.shape[1]

    x = x_ref[...]                       # [TB, H2]

    # --- layer1: Conv2d(1,64,1x1,pad=(2,0)) + Tanh as ONE MXU matmul.
    # Output is H-major flat: lane index = h*C1 + c.  a1/b1 are pre-masked so
    # the h positions that layer2 zero-pads come out exactly 0 after tanh.
    z1 = jnp.dot(x, a1_ref[...], preferred_element_type=jnp.float32) + b1_ref[...]
    l1h = jnp.tanh(z1)                   # [TB, H2*C1]

    if l1_ref is not None:
        # aux layer1 output (inner H1 positions): contiguous 128-aligned lanes.
        l1_ref[...] = l1h[:, 2 * C1: 2 * C1 + H1 * C1]      # [TB, H1*C1]

    # --- layer2 (grouped block-diag MXU matmuls) fused with fc1's K-reduction.
    # Each group handles G consecutive h positions; its tanh output is stored
    # straight into the aligned l2 slice and folded into the fc1 accumulator.
    w2g = w2g_ref[...]                   # [G*C1, G*C2]
    b2g = b2g_ref[...]                   # [1, G*C2]
    h1 = jnp.zeros((TB, F1p), jnp.float32)
    for j in range(n_grp):
        lhs = l1h[:, j * G * C1:(j + 1) * G * C1]           # [TB, G*C1]
        t2 = jnp.tanh(jnp.dot(lhs, w2g, preferred_element_type=jnp.float32) + b2g)
        if l2_ref is not None:
            l2_ref[:, j * G * C2:(j + 1) * G * C2] = t2     # aligned lane slice
        h1 = h1 + jnp.dot(t2, wfc1_ref[j * G * C2:(j + 1) * G * C2, :],
                          preferred_element_type=jnp.float32)
    h1 = h1 + bfc1_ref[...]

    # --- fc: final MXU matmul (weights pre-padded to lane multiples host-side).
    logits_ref[...] = (jnp.dot(h1, wfc_ref[...], preferred_element_type=jnp.float32)
                       + bfc_ref[...])   # [TB, NC_pad]


def convnet_kernel_full(x_ref, a1_ref, b1_ref, w2g_ref, b2g_ref,
                        wfc1_ref, bfc1_ref, wfc_ref, bfc_ref,
                        logits_ref, l2_ref, l1_ref):
    _convnet_body(x_ref, a1_ref, b1_ref, w2g_ref, b2g_ref,
                  wfc1_ref, bfc1_ref, wfc_ref, bfc_ref,
                  logits_ref, l2_ref, l1_ref)


def convnet_kernel_logits(x_ref, a1_ref, b1_ref, w2g_ref, b2g_ref,
                          wfc1_ref, bfc1_ref, wfc_ref, bfc_ref,
                          logits_ref):
    _convnet_body(x_ref, a1_ref, b1_ref, w2g_ref, b2g_ref,
                  wfc1_ref, bfc1_ref, wfc_ref, bfc_ref,
                  logits_ref, None, None)


def _prefer_wide_mxu():
    """True on chips with a 256-wide MXU (v6e / v7x); False on v5e / unknown."""
    try:
        kind = jax.devices()[0].device_kind.lower()
        digits = ""
        for ch in kind:
            if ch.isdigit():
                digits += ch
            elif digits:
                break
        return bool(digits) and int(digits) >= 6
    except Exception:
        return False


# --------------------------------------------------------------------------
# Wrapper: host-side weight restructuring + pallas_call + NCHW restore.
# --------------------------------------------------------------------------
def convnet_forward(x, params, num_features, tile_b=256,
                    return_aux=True, aux_layout="nchw"):
    """x: [B, 1, num_features, 1] float32 (same NCHW layout as the torch module).

    tile_b:     batch rows per grid step (256 default; auto-halved so small
                batches still produce >=2 grid steps for v7x's 2 TensorCores).
    return_aux: if False, only logits are computed/written (the aux layer1/2
                activations are ~94% of HBM writeback — skip them if unused).
    aux_layout: "nchw" -> torch-shaped [B,C,H,1] aux outputs (XLA transpose);
                "slab" -> kernel-native lane-dense H-major [B, H*C] slabs.
    """
    assert num_features % 4 == 0, (
        "num_features must be a multiple of 4 so the activation slab widths "
        "(H2*64, H1*64, H2*32) are 128-lane multiples (unmasked stores).")

    w1, b1, w2, b2, wfc1, bfc1, wfc, bfc = [jnp.asarray(p, jnp.float32) for p in params]
    B = x.shape[0]
    C1, C2 = w1.shape[0], w2.shape[0]
    H1 = num_features + 4
    H2 = num_features + 8
    F1 = wfc1.shape[1]                   # num_classes * 20
    NC = wfc.shape[1]

    # ---- batch tile: prefer tile_b, but keep >=2 grid steps when B allows
    # (v7x megacore) and never below the 8-row sublane minimum.
    TB = max(8, (int(tile_b) // 8) * 8)
    while TB > 8 and pl.cdiv(B, TB) < 2:
        TB //= 2
    B_pad = pl.cdiv(B, TB) * TB
    n_tiles = B_pad // TB

    # ---- input: fold both convs' height padding (2+2), pad batch to tile mult.
    x2 = x.reshape(B, num_features).astype(jnp.float32)
    xpad = jnp.pad(x2, ((0, 0), (4, 4)))                    # [B, H2]
    xpad = jnp.pad(xpad, ((0, B_pad - B), (0, 0)))          # [B_pad, H2]

    # ---- layer1 as a structured matmul weight (H-major flat output, mask baked in).
    w1v = w1.reshape(C1)
    b1v = b1.reshape(C1)
    b2v = b2.reshape(C2)
    harange = jnp.arange(H2)
    hmask = ((harange >= 2) & (harange < H2 - 2)).astype(jnp.float32)     # [H2]
    a1 = (jnp.eye(H2, dtype=jnp.float32)[:, :, None]
          * hmask[None, :, None]
          * w1v[None, None, :]).reshape(H2, H2 * C1)                      # [H2, H2*C1]
    b1rep = (hmask[:, None] * b1v[None, :]).reshape(1, H2 * C1)           # [1, H2*C1]

    # ---- layer2 grouped block-diagonal weight: G h-positions per matmul.
    # G=8 fills the 256-wide MXU (v6e/v7x); G=4 on v5e (128-wide already full).
    if _prefer_wide_mxu() and H2 % 8 == 0:
        G = 8
    elif H2 % 4 == 0:
        G = 4
    elif H2 % 2 == 0:
        G = 2
    else:
        G = 1
    w2T = w2.T                                                            # [C1, C2]
    w2g = (jnp.eye(G, dtype=jnp.float32)[:, None, :, None]
           * w2T[None, :, None, :]).reshape(G * C1, G * C2)               # [G*C1, G*C2]
    b2g = jnp.tile(b2v.reshape(1, C2), (1, G))                            # [1, G*C2]

    # ---- fc weights: permute fc1 rows from NCHW c-major flatten (c*H2+h) to the
    # kernel's H-major layout (h*C2+c); pad widths up to lane multiples.
    F1p = ((F1 + 127) // 128) * 128
    NCp = ((NC + 127) // 128) * 128
    wfc1_h = wfc1.reshape(C2, H2, F1).transpose(1, 0, 2).reshape(H2 * C2, F1)
    wfc1_hp = jnp.pad(wfc1_h, ((0, 0), (0, F1p - F1)))                    # [H2*C2, F1p]
    bfc1_p = jnp.pad(bfc1.reshape(1, F1), ((0, 0), (0, F1p - F1)))        # [1, F1p]
    wfc_p = jnp.pad(wfc, ((0, F1p - F1), (0, NCp - NC)))                  # [F1p, NCp]
    bfc_p = jnp.pad(bfc.reshape(1, NC), ((0, 0), (0, NCp - NC)))          # [1, NCp]

    # ---- output specs depend on whether aux activations are requested.
    if return_aux:
        kernel = convnet_kernel_full
        out_shape = (
            jax.ShapeDtypeStruct((B_pad, NCp), jnp.float32),
            jax.ShapeDtypeStruct((B_pad, H2 * C2), jnp.float32),
            jax.ShapeDtypeStruct((B_pad, H1 * C1), jnp.float32),
        )
        out_specs = (
            pl.BlockSpec((TB, NCp), lambda i: (i, 0)),
            pl.BlockSpec((TB, H2 * C2), lambda i: (i, 0)),
            pl.BlockSpec((TB, H1 * C1), lambda i: (i, 0)),
        )
    else:
        kernel = convnet_kernel_logits
        out_shape = (jax.ShapeDtypeStruct((B_pad, NCp), jnp.float32),)
        out_specs = (pl.BlockSpec((TB, NCp), lambda i: (i, 0)),)

    def _rep(arr, single_buffer):
        """Replicated (grid-invariant) BlockSpec covering the whole array."""
        nd = arr.ndim
        idx = lambda *i: (0,) * nd
        if single_buffer:
            # Invariant weights: no point double-buffering them.
            return pl.BlockSpec(arr.shape, idx,
                                pipeline_mode=pl.Buffered(buffer_count=1))
        return pl.BlockSpec(arr.shape, idx)

    def _run(single_buffer_weights):
        in_specs = [
            pl.BlockSpec((TB, H2), lambda i: (i, 0)),       # input batch tile
            _rep(a1, single_buffer_weights), _rep(b1rep, single_buffer_weights),
            _rep(w2g, single_buffer_weights), _rep(b2g, single_buffer_weights),
            _rep(wfc1_hp, single_buffer_weights), _rep(bfc1_p, single_buffer_weights),
            _rep(wfc_p, single_buffer_weights), _rep(bfc_p, single_buffer_weights),
        ]
        return pl.pallas_call(
            kernel,
            out_shape=out_shape,
            grid=(n_tiles,),
            in_specs=in_specs,
            out_specs=out_specs,
            compiler_params=pltpu.CompilerParams(
                dimension_semantics=("parallel",),
                vmem_limit_bytes=32 * 1024 * 1024,
            ),
        )(xpad, a1, b1rep, w2g, b2g, wfc1_hp, bfc1_p, wfc_p, bfc_p)

    try:
        results = _run(True)                 # single-buffered invariant weights
    except Exception:
        results = _run(False)                # fallback if Buffered(1) unsupported

    if not return_aux:
        (logits_p,) = results
        return logits_p[:B, :NC]

    logits_p, l2h, l1h = results
    out = logits_p[:B, :NC]
    if aux_layout == "slab":
        # Kernel-native lane-dense H-major slabs: [B, H2*C2], [B, H1*C1].
        return out, l2h[:B], l1h[:B]
    # Restore PyTorch NCHW shapes (XLA transposes, outside the kernel).
    layer2_out = l2h[:B].reshape(B, H2, C2).transpose(0, 2, 1)[..., None]   # [B, C2, H2, 1]
    layer1_out = l1h[:B].reshape(B, H1, C1).transpose(0, 2, 1)[..., None]   # [B, C1, H1, 1]
    return out, layer2_out, layer1_out


# --------------------------------------------------------------------------
# Pure-JAX reference mirroring the torch module exactly.
# --------------------------------------------------------------------------
def ref_forward(x, params, num_features):
    w1, b1, w2, b2, wfc1, bfc1, wfc, bfc = params
    B = x.shape[0]
    xh = x.reshape(B, num_features)
    xp1 = jnp.pad(xh, ((0, 0), (2, 2)))                               # [B, H1]
    l1 = jnp.tanh(xp1[:, None, :] * w1[None] + b1[None])              # [B, 64, H1]
    l1p = jnp.pad(l1, ((0, 0), (0, 0), (2, 2)))                       # [B, 64, H2]
    l2 = jnp.tanh(jnp.einsum('oc,bch->boh', w2, l1p) + b2[None])      # [B, 32, H2]
    flat = l2.reshape(B, -1)
    h = flat @ wfc1 + bfc1
    out = h @ wfc + bfc
    return out, l2[..., None], l1[..., None]


def init_params(key, num_features, num_classes):
    H2 = num_features + 8
    ks = jax.random.split(key, 8)
    f32 = jnp.float32
    w1 = 0.1 * jax.random.normal(ks[0], (64, 1), f32)           # Conv2d(1,64,1x1) weight
    b1 = 0.1 * jax.random.normal(ks[1], (64, 1), f32)
    w2 = 0.1 * jax.random.normal(ks[2], (32, 64), f32)          # Conv2d(64,32,1x1) weight
    b2 = 0.1 * jax.random.normal(ks[3], (32, 1), f32)
    wfc1 = 0.05 * jax.random.normal(ks[4], (32 * H2, num_classes * 20), f32)  # Linear.T
    bfc1 = 0.05 * jax.random.normal(ks[5], (1, num_classes * 20), f32)
    wfc = 0.05 * jax.random.normal(ks[6], (num_classes * 20, num_classes), f32)
    bfc = 0.05 * jax.random.normal(ks[7], (1, num_classes), f32)
    return (w1, b1, w2, b2, wfc1, bfc1, wfc, bfc)


if __name__ == "__main__":
    # Small shapes consistent with the module's forward:
    # input [B, 1, num_features, 1]; channels 1->64->32 are architectural.
    B = 2
    num_features = 24
    num_classes = 10

    key = jax.random.PRNGKey(0)
    kx, kp = jax.random.split(key)
    x = jax.random.normal(kx, (B, 1, num_features, 1), jnp.float32)
    params = init_params(kp, num_features, num_classes)

    # Full path (logits + aux activations in torch NCHW layout).
    out, layer2_out, layer1_out = convnet_forward(x, params, num_features)
    jax.block_until_ready((out, layer2_out, layer1_out))

    # Logits-only path (skips the aux HBM writeback entirely).
    out_only = convnet_forward(x, params, num_features, return_aux=False)
    jax.block_until_ready(out_only)

    r_out, r_l2, r_l1 = ref_forward(x, params, num_features)
    assert out.shape == (B, num_classes)
    assert layer2_out.shape == (B, 32, num_features + 8, 1)
    assert layer1_out.shape == (B, 64, num_features + 4, 1)
    assert np.allclose(np.asarray(out), np.asarray(r_out), atol=1e-3, rtol=1e-3)
    assert np.allclose(np.asarray(layer2_out), np.asarray(r_l2), atol=1e-3, rtol=1e-3)
    assert np.allclose(np.asarray(layer1_out), np.asarray(r_l1), atol=1e-3, rtol=1e-3)
    assert np.allclose(np.asarray(out_only), np.asarray(r_out), atol=1e-3, rtol=1e-3)

    print("KERNEL_OK")
</pallas_src>

<mosaic_0001>
module attributes {stable_mosaic.version = 11 : i64} {
  func.func @convnet_kernel_full(%arg0: i32, %arg1: memref<8x32xf32, #tpu.memory_space<vmem>>, %arg2: memref<32x2048xf32, #tpu.memory_space<vmem>>, %arg3: memref<1x2048xf32, #tpu.memory_space<vmem>>, %arg4: memref<256x128xf32, #tpu.memory_space<vmem>>, %arg5: memref<1x128xf32, #tpu.memory_space<vmem>>, %arg6: memref<1024x256xf32, #tpu.memory_space<vmem>>, %arg7: memref<1x256xf32, #tpu.memory_space<vmem>>, %arg8: memref<256x128xf32, #tpu.memory_space<vmem>>, %arg9: memref<1x128xf32, #tpu.memory_space<vmem>>, %arg10: memref<8x128xf32, #tpu.memory_space<vmem>>, %arg11: memref<8x1024xf32, #tpu.memory_space<vmem>>, %arg12: memref<8x1792xf32, #tpu.memory_space<vmem>>) attributes {dimension_semantics = [#tpu.dimension_semantics<parallel>], iteration_bounds = array<i64: 1>, scalar_prefetch = 0 : i64, scratch_operands = 0 : i64, tpu.core_type = #tpu.core_type<tc>, window_params = [{transform_indices = @transform_0, window_bounds = array<i64: 8, 32>}, {pipeline_mode = #tpu.pipeline_mode<synchronous>, transform_indices = @transform_1, window_bounds = array<i64: 32, 2048>}, {pipeline_mode = #tpu.pipeline_mode<synchronous>, transform_indices = @transform_2, window_bounds = array<i64: 1, 2048>}, {pipeline_mode = #tpu.pipeline_mode<synchronous>, transform_indices = @transform_3, window_bounds = array<i64: 256, 128>}, {pipeline_mode = #tpu.pipeline_mode<synchronous>, transform_indices = @transform_4, window_bounds = array<i64: 1, 128>}, {pipeline_mode = #tpu.pipeline_mode<synchronous>, transform_indices = @transform_5, window_bounds = array<i64: 1024, 256>}, {pipeline_mode = #tpu.pipeline_mode<synchronous>, transform_indices = @transform_6, window_bounds = array<i64: 1, 256>}, {pipeline_mode = #tpu.pipeline_mode<synchronous>, transform_indices = @transform_7, window_bounds = array<i64: 256, 128>}, {pipeline_mode = #tpu.pipeline_mode<synchronous>, transform_indices = @transform_8, window_bounds = array<i64: 1, 128>}, {transform_indices = @transform_9, window_bounds = array<i64: 8, 128>}, {transform_indices = @transform_10, window_bounds = array<i64: 8, 1024>}, {transform_indices = @transform_11, window_bounds = array<i64: 8, 1792>}]} {
    %c0 = arith.constant 0 : index
    %c0_0 = arith.constant 0 : index
    %0 = vector.load %arg1[%c0, %c0_0] : memref<8x32xf32, #tpu.memory_space<vmem>>, vector<8x32xf32>
    %c0_1 = arith.constant 0 : index
    %c0_2 = arith.constant 0 : index
    %1 = vector.load %arg2[%c0_1, %c0_2] : memref<32x2048xf32, #tpu.memory_space<vmem>>, vector<32x2048xf32>
    %cst = arith.constant dense<0.000000e+00> : vector<8x2048xf32>
    %2 = tpu.matmul %0, %1, %cst {dimension_numbers = #tpu.dot_dimension_numbers<[1], [0], [0], [1], [0, 0, 1, 1], [], []>} : vector<8x32xf32>, vector<32x2048xf32>, vector<8x2048xf32> -> vector<8x2048xf32>
    %c0_3 = arith.constant 0 : index
    %c0_4 = arith.constant 0 : index
    %3 = vector.load %arg3[%c0_3, %c0_4] : memref<1x2048xf32, #tpu.memory_space<vmem>>, vector<1x2048xf32>
    %4 = vector.broadcast %3 : vector<1x2048xf32> to vector<8x2048xf32>
    %5 = arith.addf %2, %4 : vector<8x2048xf32>
    %6 = math.tanh %5 : vector<8x2048xf32>
    %7 = vector.extract_strided_slice %6 {offsets = [0, 128], sizes = [8, 1792], strides = [1, 1]} : vector<8x2048xf32> to vector<8x1792xf32>
    %c0_5 = arith.constant 0 : index
    %c0_6 = arith.constant 0 : index
    %8 = vector.load %arg12[%c0_5, %c0_6] : memref<8x1792xf32, #tpu.memory_space<vmem>>, vector<8x1792xf32>
    tpu.vector_store %arg12[%c0_5, %c0_6], %7 {strides = array<i32>} : memref<8x1792xf32, #tpu.memory_space<vmem>>, vector<8x1792xf32>,
    %c0_7 = arith.constant 0 : index
    %c0_8 = arith.constant 0 : index
    %9 = vector.load %arg4[%c0_7, %c0_8] : memref<256x128xf32, #tpu.memory_space<vmem>>, vector<256x128xf32>
    %c0_9 = arith.constant 0 : index
    %c0_10 = arith.constant 0 : index
    %10 = vector.load %arg5[%c0_9, %c0_10] : memref<1x128xf32, #tpu.memory_space<vmem>>, vector<1x128xf32>
    %cst_11 = arith.constant 0.000000e+00 : f32
    %11 = vector.broadcast %cst_11 : f32 to vector<8x256xf32>
    %12 = vector.extract_strided_slice %6 {offsets = [0, 0], sizes = [8, 256], strides = [1, 1]} : vector<8x2048xf32> to vector<8x256xf32>
    %cst_12 = arith.constant dense<0.000000e+00> : vector<8x128xf32>
    %13 = tpu.matmul %12, %9, %cst_12 {dimension_numbers = #tpu.dot_dimension_numbers<[1], [0], [0], [1], [0, 0, 1, 1], [], []>} : vector<8x256xf32>, vector<256x128xf32>, vector<8x128xf32> -> vector<8x128xf32>
    %14 = vector.broadcast %10 : vector<1x128xf32> to vector<8x128xf32>
    %15 = arith.addf %13, %14 : vector<8x128xf32>
    %16 = math.tanh %15 : vector<8x128xf32>
    %c0_13 = arith.constant 0 : index
    %c0_14 = arith.constant 0 : index
    %17 = vector.load %arg11[%c0_13, %c0_14] : memref<8x1024xf32, #tpu.memory_space<vmem>>, vector<8x128xf32>
    tpu.vector_store %arg11[%c0_13, %c0_14], %16 {strides = array<i32>} : memref<8x1024xf32, #tpu.memory_space<vmem>>, vector<8x128xf32>,
    %c0_15 = arith.constant 0 : index
    %c0_16 = arith.constant 0 : index
    %18 = vector.load %arg6[%c0_15, %c0_16] : memref<1024x256xf32, #tpu.memory_space<vmem>>, vector<128x256xf32>
    %cst_17 = arith.constant dense<0.000000e+00> : vector<8x256xf32>
    %19 = tpu.matmul %16, %18, %cst_17 {dimension_numbers = #tpu.dot_dimension_numbers<[1], [0], [0], [1], [0, 0, 1, 1], [], []>} : vector<8x128xf32>, vector<128x256xf32>, vector<8x256xf32> -> vector<8x256xf32>
    %20 = arith.addf %11, %19 : vector<8x256xf32>
    %21 = vector.extract_strided_slice %6 {offsets = [0, 256], sizes = [8, 256], strides = [1, 1]} : vector<8x2048xf32> to vector<8x256xf32>
    %cst_18 = arith.constant dense<0.000000e+00> : vector<8x128xf32>
    %22 = tpu.matmul %21, %9, %cst_18 {dimension_numbers = #tpu.dot_dimension_numbers<[1], [0], [0], [1], [0, 0, 1, 1], [], []>} : vector<8x256xf32>, vector<256x128xf32>, vector<8x128xf32> -> vector<8x128xf32>
    %23 = vector.broadcast %10 : vector<1x128xf32> to vector<8x128xf32>
    %24 = arith.addf %22, %23 : vector<8x128xf32>
    %25 = math.tanh %24 : vector<8x128xf32>
    %c0_19 = arith.constant 0 : index
    %c128 = arith.constant 128 : index
    %26 = vector.load %arg11[%c0_19, %c128] : memref<8x1024xf32, #tpu.memory_space<vmem>>, vector<8x128xf32>
    tpu.vector_store %arg11[%c0_19, %c128], %25 {strides = array<i32>} : memref<8x1024xf32, #tpu.memory_space<vmem>>, vector<8x128xf32>,
    %c128_20 = arith.constant 128 : index
    %c0_21 = arith.constant 0 : index
    %27 = vector.load %arg6[%c128_20, %c0_21] : memref<1024x256xf32, #tpu.memory_space<vmem>>, vector<128x256xf32>
    %cst_22 = arith.constant dense<0.000000e+00> : vector<8x256xf32>
    %28 = tpu.matmul %25, %27, %cst_22 {dimension_numbers = #tpu.dot_dimension_numbers<[1], [0], [0], [1], [0, 0, 1, 1], [], []>} : vector<8x128xf32>, vector<128x256xf32>, vector<8x256xf32> -> vector<8x256xf32>
    %29 = arith.addf %20, %28 : vector<8x256xf32>
    %30 = vector.extract_strided_slice %6 {offsets = [0, 512], sizes = [8, 256], strides = [1, 1]} : vector<8x2048xf32> to vector<8x256xf32>
    %cst_23 = arith.constant dense<0.000000e+00> : vector<8x128xf32>
    %31 = tpu.matmul %30, %9, %cst_23 {dimension_numbers = #tpu.dot_dimension_numbers<[1], [0], [0], [1], [0, 0, 1, 1], [], []>} : vector<8x256xf32>, vector<256x128xf32>, vector<8x128xf32> -> vector<8x128xf32>
    %32 = vector.broadcast %10 : vector<1x128xf32> to vector<8x128xf32>
    %33 = arith.addf %31, %32 : vector<8x128xf32>
    %34 = math.tanh %33 : vector<8x128xf32>
    %c0_24 = arith.constant 0 : index
    %c256 = arith.constant 256 : index
    %35 = vector.load %arg11[%c0_24, %c256] : memref<8x1024xf32, #tpu.memory_space<vmem>>, vector<8x128xf32>
    tpu.vector_store %arg11[%c0_24, %c256], %34 {strides = array<i32>} : memref<8x1024xf32, #tpu.memory_space<vmem>>, vector<8x128xf32>,
    %c256_25 = arith.constant 256 : index
    %c0_26 = arith.constant 0 : index
    %36 = vector.load %arg6[%c256_25, %c0_26] : memref<1024x256xf32, #tpu.memory_space<vmem>>, vector<128x256xf32>
    %cst_27 = arith.constant dense<0.000000e+00> : vector<8x256xf32>
    %37 = tpu.matmul %34, %36, %cst_27 {dimension_numbers = #tpu.dot_dimension_numbers<[1], [0], [0], [1], [0, 0, 1, 1], [], []>} : vector<8x128xf32>, vector<128x256xf32>, vector<8x256xf32> -> vector<8x256xf32>
    %38 = arith.addf %29, %37 : vector<8x256xf32>
    %39 = vector.extract_strided_slice %6 {offsets = [0, 768], sizes = [8, 256], strides = [1, 1]} : vector<8x2048xf32> to vector<8x256xf32>
    %cst_28 = arith.constant dense<0.000000e+00> : vector<8x128xf32>
    %40 = tpu.matmul %39, %9, %cst_28 {dimension_numbers = #tpu.dot_dimension_numbers<[1], [0], [0], [1], [0, 0, 1, 1], [], []>} : vector<8x256xf32>, vector<256x128xf32>, vector<8x128xf32> -> vector<8x128xf32>
    %41 = vector.broadcast %10 : vector<1x128xf32> to vector<8x128xf32>
    %42 = arith.addf %40, %41 : vector<8x128xf32>
    %43 = math.tanh %42 : vector<8x128xf32>
    %c0_29 = arith.constant 0 : index
    %c384 = arith.constant 384 : index
    %44 = vector.load %arg11[%c0_29, %c384] : memref<8x1024xf32, #tpu.memory_space<vmem>>, vector<8x128xf32>
    tpu.vector_store %arg11[%c0_29, %c384], %43 {strides = array<i32>} : memref<8x1024xf32, #tpu.memory_space<vmem>>, vector<8x128xf32>,
    %c384_30 = arith.constant 384 : index
    %c0_31 = arith.constant 0 : index
    %45 = vector.load %arg6[%c384_30, %c0_31] : memref<1024x256xf32, #tpu.memory_space<vmem>>, vector<128x256xf32>
    %cst_32 = arith.constant dense<0.000000e+00> : vector<8x256xf32>
    %46 = tpu.matmul %43, %45, %cst_32 {dimension_numbers = #tpu.dot_dimension_numbers<[1], [0], [0], [1], [0, 0, 1, 1], [], []>} : vector<8x128xf32>, vector<128x256xf32>, vector<8x256xf32> -> vector<8x256xf32>
    %47 = arith.addf %38, %46 : vector<8x256xf32>
    %48 = vector.extract_strided_slice %6 {offsets = [0, 1024], sizes = [8, 256], strides = [1, 1]} : vector<8x2048xf32> to vector<8x256xf32>
    %cst_33 = arith.constant dense<0.000000e+00> : vector<8x128xf32>
    %49 = tpu.matmul %48, %9, %cst_33 {dimension_numbers = #tpu.dot_dimension_numbers<[1], [0], [0], [1], [0, 0, 1, 1], [], []>} : vector<8x256xf32>, vector<256x128xf32>, vector<8x128xf32> -> vector<8x128xf32>
    %50 = vector.broadcast %10 : vector<1x128xf32> to vector<8x128xf32>
    %51 = arith.addf %49, %50 : vector<8x128xf32>
    %52 = math.tanh %51 : vector<8x128xf32>
    %c0_34 = arith.constant 0 : index
    %c512 = arith.constant 512 : index
    %53 = vector.load %arg11[%c0_34, %c512] : memref<8x1024xf32, #tpu.memory_space<vmem>>, vector<8x128xf32>
    tpu.vector_store %arg11[%c0_34, %c512], %52 {strides = array<i32>} : memref<8x1024xf32, #tpu.memory_space<vmem>>, vector<8x128xf32>,
    %c512_35 = arith.constant 512 : index
    %c0_36 = arith.constant 0 : index
    %54 = vector.load %arg6[%c512_35, %c0_36] : memref<1024x256xf32, #tpu.memory_space<vmem>>, vector<128x256xf32>
    %cst_37 = arith.constant dense<0.000000e+00> : vector<8x256xf32>
    %55 = tpu.matmul %52, %54, %cst_37 {dimension_numbers = #tpu.dot_dimension_numbers<[1], [0], [0], [1], [0, 0, 1, 1], [], []>} : vector<8x128xf32>, vector<128x256xf32>, vector<8x256xf32> -> vector<8x256xf32>
    %56 = arith.addf %47, %55 : vector<8x256xf32>
    %57 = vector.extract_strided_slice %6 {offsets = [0, 1280], sizes = [8, 256], strides = [1, 1]} : vector<8x2048xf32> to vector<8x256xf32>
    %cst_38 = arith.constant dense<0.000000e+00> : vector<8x128xf32>
    %58 = tpu.matmul %57, %9, %cst_38 {dimension_numbers = #tpu.dot_dimension_numbers<[1], [0], [0], [1], [0, 0, 1, 1], [], []>} : vector<8x256xf32>, vector<256x128xf32>, vector<8x128xf32> -> vector<8x128xf32>
    %59 = vector.broadcast %10 : vector<1x128xf32> to vector<8x128xf32>
    %60 = arith.addf %58, %59 : vector<8x128xf32>
    %61 = math.tanh %60 : vector<8x128xf32>
    %c0_39 = arith.constant 0 : index
    %c640 = arith.constant 640 : index
    %62 = vector.load %arg11[%c0_39, %c640] : memref<8x1024xf32, #tpu.memory_space<vmem>>, vector<8x128xf32>
    tpu.vector_store %arg11[%c0_39, %c640], %61 {strides = array<i32>} : memref<8x1024xf32, #tpu.memory_space<vmem>>, vector<8x128xf32>,
    %c640_40 = arith.constant 640 : index
    %c0_41 = arith.constant 0 : index
    %63 = vector.load %arg6[%c640_40, %c0_41] : memref<1024x256xf32, #tpu.memory_space<vmem>>, vector<128x256xf32>
    %cst_42 = arith.constant dense<0.000000e+00> : vector<8x256xf32>
    %64 = tpu.matmul %61, %63, %cst_42 {dimension_numbers = #tpu.dot_dimension_numbers<[1], [0], [0], [1], [0, 0, 1, 1], [], []>} : vector<8x128xf32>, vector<128x256xf32>, vector<8x256xf32> -> vector<8x256xf32>
    %65 = arith.addf %56, %64 : vector<8x256xf32>
    %66 = vector.extract_strided_slice %6 {offsets = [0, 1536], sizes = [8, 256], strides = [1, 1]} : vector<8x2048xf32> to vector<8x256xf32>
    %cst_43 = arith.constant dense<0.000000e+00> : vector<8x128xf32>
    %67 = tpu.matmul %66, %9, %cst_43 {dimension_numbers = #tpu.dot_dimension_numbers<[1], [0], [0], [1], [0, 0, 1, 1], [], []>} : vector<8x256xf32>, vector<256x128xf32>, vector<8x128xf32> -> vector<8x128xf32>
    %68 = vector.broadcast %10 : vector<1x128xf32> to vector<8x128xf32>
    %69 = arith.addf %67, %68 : vector<8x128xf32>
    %70 = math.tanh %69 : vector<8x128xf32>
    %c0_44 = arith.constant 0 : index
    %c768 = arith.constant 768 : index
    %71 = vector.load %arg11[%c0_44, %c768] : memref<8x1024xf32, #tpu.memory_space<vmem>>, vector<8x128xf32>
    tpu.vector_store %arg11[%c0_44, %c768], %70 {strides = array<i32>} : memref<8x1024xf32, #tpu.memory_space<vmem>>, vector<8x128xf32>,
    %c768_45 = arith.constant 768 : index
    %c0_46 = arith.constant 0 : index
    %72 = vector.load %arg6[%c768_45, %c0_46] : memref<1024x256xf32, #tpu.memory_space<vmem>>, vector<128x256xf32>
    %cst_47 = arith.constant dense<0.000000e+00> : vector<8x256xf32>
    %73 = tpu.matmul %70, %72, %cst_47 {dimension_numbers = #tpu.dot_dimension_numbers<[1], [0], [0], [1], [0, 0, 1, 1], [], []>} : vector<8x128xf32>, vector<128x256xf32>, vector<8x256xf32> -> vector<8x256xf32>
    %74 = arith.addf %65, %73 : vector<8x256xf32>
    %75 = vector.extract_strided_slice %6 {offsets = [0, 1792], sizes = [8, 256], strides = [1, 1]} : vector<8x2048xf32> to vector<8x256xf32>
    %cst_48 = arith.constant dense<0.000000e+00> : vector<8x128xf32>
    %76 = tpu.matmul %75, %9, %cst_48 {dimension_numbers = #tpu.dot_dimension_numbers<[1], [0], [0], [1], [0, 0, 1, 1], [], []>} : vector<8x256xf32>, vector<256x128xf32>, vector<8x128xf32> -> vector<8x128xf32>
    %77 = vector.broadcast %10 : vector<1x128xf32> to vector<8x128xf32>
    %78 = arith.addf %76, %77 : vector<8x128xf32>
    %79 = math.tanh %78 : vector<8x128xf32>
    %c0_49 = arith.constant 0 : index
    %c896 = arith.constant 896 : index
    %80 = vector.load %arg11[%c0_49, %c896] : memref<8x1024xf32, #tpu.memory_space<vmem>>, vector<8x128xf32>
    tpu.vector_store %arg11[%c0_49, %c896], %79 {strides = array<i32>} : memref<8x1024xf32, #tpu.memory_space<vmem>>, vector<8x128xf32>,
    %c896_50 = arith.constant 896 : index
    %c0_51 = arith.constant 0 : index
    %81 = vector.load %arg6[%c896_50, %c0_51] : memref<1024x256xf32, #tpu.memory_space<vmem>>, vector<128x256xf32>
    %cst_52 = arith.constant dense<0.000000e+00> : vector<8x256xf32>
    %82 = tpu.matmul %79, %81, %cst_52 {dimension_numbers = #tpu.dot_dimension_numbers<[1], [0], [0], [1], [0, 0, 1, 1], [], []>} : vector<8x128xf32>, vector<128x256xf32>, vector<8x256xf32> -> vector<8x256xf32>
    %83 = arith.addf %74, %82 : vector<8x256xf32>
    %c0_53 = arith.constant 0 : index
    %c0_54 = arith.constant 0 : index
    %84 = vector.load %arg7[%c0_53, %c0_54] : memref<1x256xf32, #tpu.memory_space<vmem>>, vector<1x256xf32>
    %85 = vector.broadcast %84 : vector<1x256xf32> to vector<8x256xf32>
    %86 = arith.addf %83, %85 : vector<8x256xf32>
    %c0_55 = arith.constant 0 : index
    %c0_56 = arith.constant 0 : index
    %87 = vector.load %arg8[%c0_55, %c0_56] : memref<256x128xf32, #tpu.memory_space<vmem>>, vector<256x128xf32>
    %cst_57 = arith.constant dense<0.000000e+00> : vector<8x128xf32>
    %88 = tpu.matmul %86, %87, %cst_57 {dimension_numbers = #tpu.dot_dimension_numbers<[1], [0], [0], [1], [0, 0, 1, 1], [], []>} : vector<8x256xf32>, vector<256x128xf32>, vector<8x128xf32> -> vector<8x128xf32>
    %c0_58 = arith.constant 0 : index
    %c0_59 = arith.constant 0 : index
    %89 = vector.load %arg9[%c0_58, %c0_59] : memref<1x128xf32, #tpu.memory_space<vmem>>, vector<1x128xf32>
    %90 = vector.broadcast %89 : vector<1x128xf32> to vector<8x128xf32>
    %91 = arith.addf %88, %90 : vector<8x128xf32>
    %c0_60 = arith.constant 0 : index
    %c0_61 = arith.constant 0 : index
    %92 = vector.load %arg10[%c0_60, %c0_61] : memref<8x128xf32, #tpu.memory_space<vmem>>, vector<8x128xf32>
    tpu.vector_store %arg10[%c0_60, %c0_61], %91 {strides = array<i32>} : memref<8x128xf32, #tpu.memory_space<vmem>>, vector<8x128xf32>,
    return
  }
  func.func @transform_0(%arg0: i32) -> (i32, i32) {
    %c0_i32 = arith.constant 0 : i32
    %c0_i32_0 = arith.constant 0 : i32
    return %arg0, %c0_i32 : i32, i32
  }
  func.func @transform_1(%arg0: i32) -> (i32, i32) {
    %c0_i32 = arith.constant 0 : i32
    %c0_i32_0 = arith.constant 0 : i32
    %c0_i32_1 = arith.constant 0 : i32
    return %c0_i32, %c0_i32_0 : i32, i32
  }
  func.func @transform_2(%arg0: i32) -> (i32, i32) {
    %c0_i32 = arith.constant 0 : i32
    %c0_i32_0 = arith.constant 0 : i32
    %c0_i32_1 = arith.constant 0 : i32
    return %c0_i32, %c0_i32_0 : i32, i32
  }
  func.func @transform_3(%arg0: i32) -> (i32, i32) {
    %c0_i32 = arith.constant 0 : i32
    %c0_i32_0 = arith.constant 0 : i32
    %c0_i32_1 = arith.constant 0 : i32
    return %c0_i32, %c0_i32_0 : i32, i32
  }
  func.func @transform_4(%arg0: i32) -> (i32, i32) {
    %c0_i32 = arith.constant 0 : i32
    %c0_i32_0 = arith.constant 0 : i32
    %c0_i32_1 = arith.constant 0 : i32
    return %c0_i32, %c0_i32_0 : i32, i32
  }
  func.func @transform_5(%arg0: i32) -> (i32, i32) {
    %c0_i32 = arith.constant 0 : i32
    %c0_i32_0 = arith.constant 0 : i32
    %c0_i32_1 = arith.constant 0 : i32
    return %c0_i32, %c0_i32_0 : i32, i32
  }
  func.func @transform_6(%arg0: i32) -> (i32, i32) {
    %c0_i32 = arith.constant 0 : i32
    %c0_i32_0 = arith.constant 0 : i32
    %c0_i32_1 = arith.constant 0 : i32
    return %c0_i32, %c0_i32_0 : i32, i32
  }
  func.func @transform_7(%arg0: i32) -> (i32, i32) {
    %c0_i32 = arith.constant 0 : i32
    %c0_i32_0 = arith.constant 0 : i32
    %c0_i32_1 = arith.constant 0 : i32
    return %c0_i32, %c0_i32_0 : i32, i32
  }
  func.func @transform_8(%arg0: i32) -> (i32, i32) {
    %c0_i32 = arith.constant 0 : i32
    %c0_i32_0 = arith.constant 0 : i32
    %c0_i32_1 = arith.constant 0 : i32
    return %c0_i32, %c0_i32_0 : i32, i32
  }
  func.func @transform_9(%arg0: i32) -> (i32, i32) {
    %c0_i32 = arith.constant 0 : i32
    %c0_i32_0 = arith.constant 0 : i32
    return %arg0, %c0_i32 : i32, i32
  }
  func.func @transform_10(%arg0: i32) -> (i32, i32) {
    %c0_i32 = arith.constant 0 : i32
    %c0_i32_0 = arith.constant 0 : i32
    return %arg0, %c0_i32 : i32, i32
  }
  func.func @transform_11(%arg0: i32) -> (i32, i32) {
    %c0_i32 = arith.constant 0 : i32
    %c0_i32_0 = arith.constant 0 : i32
    return %arg0, %c0_i32 : i32, i32
  }
}

module attributes {stable_mosaic.version = 11 : i64} {
  func.func @convnet_kernel_full(%arg0: i32, %arg1: memref<8x32xf32, #tpu.memory_space<vmem>>, %arg2: memref<32x2048xf32, #tpu.memory_space<vmem>>, %arg3: memref<1x2048xf32, #tpu.memory_space<vmem>>, %arg4: memref<256x128xf32, #tpu.memory_space<vmem>>, %arg5: memref<1x128xf32, #tpu.memory_space<vmem>>, %arg6: memref<1024x256xf32, #tpu.memory_space<vmem>>, %arg7: memref<1x256xf32, #tpu.memory_space<vmem>>, %arg8: memref<256x128xf32, #tpu.memory_space<vmem>>, %arg9: memref<1x128xf32, #tpu.memory_space<vmem>>, %arg10: memref<8x128xf32, #tpu.memory_space<vmem>>, %arg11: memref<8x1024xf32, #tpu.memory_space<vmem>>, %arg12: memref<8x1792xf32, #tpu.memory_space<vmem>>) attributes {dimension_semantics = [#tpu.dimension_semantics<parallel>], iteration_bounds = array<i64: 1>, scalar_prefetch = 0 : i64, scratch_operands = 0 : i64, tpu.core_type = #tpu.core_type<tc>, window_params = [{transform_indices = @transform_0, window_bounds = array<i64: 8, 32>}, {pipeline_mode = #tpu.pipeline_mode<synchronous>, transform_indices = @transform_1, window_bounds = array<i64: 32, 2048>}, {pipeline_mode = #tpu.pipeline_mode<synchronous>, transform_indices = @transform_2, window_bounds = array<i64: 1, 2048>}, {pipeline_mode = #tpu.pipeline_mode<synchronous>, transform_indices = @transform_3, window_bounds = array<i64: 256, 128>}, {pipeline_mode = #tpu.pipeline_mode<synchronous>, transform_indices = @transform_4, window_bounds = array<i64: 1, 128>}, {pipeline_mode = #tpu.pipeline_mode<synchronous>, transform_indices = @transform_5, window_bounds = array<i64: 1024, 256>}, {pipeline_mode = #tpu.pipeline_mode<synchronous>, transform_indices = @transform_6, window_bounds = array<i64: 1, 256>}, {pipeline_mode = #tpu.pipeline_mode<synchronous>, transform_indices = @transform_7, window_bounds = array<i64: 256, 128>}, {pipeline_mode = #tpu.pipeline_mode<synchronous>, transform_indices = @transform_8, window_bounds = array<i64: 1, 128>}, {transform_indices = @transform_9, window_bounds = array<i64: 8, 128>}, {transform_indices = @transform_10, window_bounds = array<i64: 8, 1024>}, {transform_indices = @transform_11, window_bounds = array<i64: 8, 1792>}]} {
    %c0 = arith.constant 0 : index
    %c0_0 = arith.constant 0 : index
    %0 = vector.load %arg1[%c0, %c0_0] : memref<8x32xf32, #tpu.memory_space<vmem>>, vector<8x32xf32>
    %c0_1 = arith.constant 0 : index
    %c0_2 = arith.constant 0 : index
    %1 = vector.load %arg2[%c0_1, %c0_2] : memref<32x2048xf32, #tpu.memory_space<vmem>>, vector<32x2048xf32>
    %cst = arith.constant dense<0.000000e+00> : vector<8x2048xf32>
    %2 = tpu.matmul %0, %1, %cst {dimension_numbers = #tpu.dot_dimension_numbers<[1], [0], [0], [1], [0, 0, 1, 1], [], []>} : vector<8x32xf32>, vector<32x2048xf32>, vector<8x2048xf32> -> vector<8x2048xf32>
    %c0_3 = arith.constant 0 : index
    %c0_4 = arith.constant 0 : index
    %3 = vector.load %arg3[%c0_3, %c0_4] : memref<1x2048xf32, #tpu.memory_space<vmem>>, vector<1x2048xf32>
    %4 = vector.broadcast %3 : vector<1x2048xf32> to vector<8x2048xf32>
    %5 = arith.addf %2, %4 : vector<8x2048xf32>
    %6 = math.tanh %5 : vector<8x2048xf32>
    %7 = vector.extract_strided_slice %6 {offsets = [0, 128], sizes = [8, 1792], strides = [1, 1]} : vector<8x2048xf32> to vector<8x1792xf32>
    %c0_5 = arith.constant 0 : index
    %c0_6 = arith.constant 0 : index
    %8 = vector.load %arg12[%c0_5, %c0_6] : memref<8x1792xf32, #tpu.memory_space<vmem>>, vector<8x1792xf32>
    tpu.vector_store %arg12[%c0_5, %c0_6], %7 {strides = array<i32>} : memref<8x1792xf32, #tpu.memory_space<vmem>>, vector<8x1792xf32>,
    %c0_7 = arith.constant 0 : index
    %c0_8 = arith.constant 0 : index
    %9 = vector.load %arg4[%c0_7, %c0_8] : memref<256x128xf32, #tpu.memory_space<vmem>>, vector<256x128xf32>
    %c0_9 = arith.constant 0 : index
    %c0_10 = arith.constant 0 : index
    %10 = vector.load %arg5[%c0_9, %c0_10] : memref<1x128xf32, #tpu.memory_space<vmem>>, vector<1x128xf32>
    %cst_11 = arith.constant 0.000000e+00 : f32
    %11 = vector.broadcast %cst_11 : f32 to vector<8x256xf32>
    %12 = vector.extract_strided_slice %6 {offsets = [0, 0], sizes = [8, 256], strides = [1, 1]} : vector<8x2048xf32> to vector<8x256xf32>
    %cst_12 = arith.constant dense<0.000000e+00> : vector<8x128xf32>
    %13 = tpu.matmul %12, %9, %cst_12 {dimension_numbers = #tpu.dot_dimension_numbers<[1], [0], [0], [1], [0, 0, 1, 1], [], []>} : vector<8x256xf32>, vector<256x128xf32>, vector<8x128xf32> -> vector<8x128xf32>
    %14 = vector.broadcast %10 : vector<1x128xf32> to vector<8x128xf32>
    %15 = arith.addf %13, %14 : vector<8x128xf32>
    %16 = math.tanh %15 : vector<8x128xf32>
    %c0_13 = arith.constant 0 : index
    %c0_14 = arith.constant 0 : index
    %17 = vector.load %arg11[%c0_13, %c0_14] : memref<8x1024xf32, #tpu.memory_space<vmem>>, vector<8x128xf32>
    tpu.vector_store %arg11[%c0_13, %c0_14], %16 {strides = array<i32>} : memref<8x1024xf32, #tpu.memory_space<vmem>>, vector<8x128xf32>,
    %c0_15 = arith.constant 0 : index
    %c0_16 = arith.constant 0 : index
    %18 = vector.load %arg6[%c0_15, %c0_16] : memref<1024x256xf32, #tpu.memory_space<vmem>>, vector<128x256xf32>
    %cst_17 = arith.constant dense<0.000000e+00> : vector<8x256xf32>
    %19 = tpu.matmul %16, %18, %cst_17 {dimension_numbers = #tpu.dot_dimension_numbers<[1], [0], [0], [1], [0, 0, 1, 1], [], []>} : vector<8x128xf32>, vector<128x256xf32>, vector<8x256xf32> -> vector<8x256xf32>
    %20 = arith.addf %11, %19 : vector<8x256xf32>
    %21 = vector.extract_strided_slice %6 {offsets = [0, 256], sizes = [8, 256], strides = [1, 1]} : vector<8x2048xf32> to vector<8x256xf32>
    %cst_18 = arith.constant dense<0.000000e+00> : vector<8x128xf32>
    %22 = tpu.matmul %21, %9, %cst_18 {dimension_numbers = #tpu.dot_dimension_numbers<[1], [0], [0], [1], [0, 0, 1, 1], [], []>} : vector<8x256xf32>, vector<256x128xf32>, vector<8x128xf32> -> vector<8x128xf32>
    %23 = vector.broadcast %10 : vector<1x128xf32> to vector<8x128xf32>
    %24 = arith.addf %22, %23 : vector<8x128xf32>
    %25 = math.tanh %24 : vector<8x128xf32>
    %c0_19 = arith.constant 0 : index
    %c128 = arith.constant 128 : index
    %26 = vector.load %arg11[%c0_19, %c128] : memref<8x1024xf32, #tpu.memory_space<vmem>>, vector<8x128xf32>
    tpu.vector_store %arg11[%c0_19, %c128], %25 {strides = array<i32>} : memref<8x1024xf32, #tpu.memory_space<vmem>>, vector<8x128xf32>,
    %c128_20 = arith.constant 128 : index
    %c0_21 = arith.constant 0 : index
    %27 = vector.load %arg6[%c128_20, %c0_21] : memref<1024x256xf32, #tpu.memory_space<vmem>>, vector<128x256xf32>
    %cst_22 = arith.constant dense<0.000000e+00> : vector<8x256xf32>
    %28 = tpu.matmul %25, %27, %cst_22 {dimension_numbers = #tpu.dot_dimension_numbers<[1], [0], [0], [1], [0, 0, 1, 1], [], []>} : vector<8x128xf32>, vector<128x256xf32>, vector<8x256xf32> -> vector<8x256xf32>
    %29 = arith.addf %20, %28 : vector<8x256xf32>
    %30 = vector.extract_strided_slice %6 {offsets = [0, 512], sizes = [8, 256], strides = [1, 1]} : vector<8x2048xf32> to vector<8x256xf32>
    %cst_23 = arith.constant dense<0.000000e+00> : vector<8x128xf32>
    %31 = tpu.matmul %30, %9, %cst_23 {dimension_numbers = #tpu.dot_dimension_numbers<[1], [0], [0], [1], [0, 0, 1, 1], [], []>} : vector<8x256xf32>, vector<256x128xf32>, vector<8x128xf32> -> vector<8x128xf32>
    %32 = vector.broadcast %10 : vector<1x128xf32> to vector<8x128xf32>
    %33 = arith.addf %31, %32 : vector<8x128xf32>
    %34 = math.tanh %33 : vector<8x128xf32>
    %c0_24 = arith.constant 0 : index
    %c256 = arith.constant 256 : index
    %35 = vector.load %arg11[%c0_24, %c256] : memref<8x1024xf32, #tpu.memory_space<vmem>>, vector<8x128xf32>
    tpu.vector_store %arg11[%c0_24, %c256], %34 {strides = array<i32>} : memref<8x1024xf32, #tpu.memory_space<vmem>>, vector<8x128xf32>,
    %c256_25 = arith.constant 256 : index
    %c0_26 = arith.constant 0 : index
    %36 = vector.load %arg6[%c256_25, %c0_26] : memref<1024x256xf32, #tpu.memory_space<vmem>>, vector<128x256xf32>
    %cst_27 = arith.constant dense<0.000000e+00> : vector<8x256xf32>
    %37 = tpu.matmul %34, %36, %cst_27 {dimension_numbers = #tpu.dot_dimension_numbers<[1], [0], [0], [1], [0, 0, 1, 1], [], []>} : vector<8x128xf32>, vector<128x256xf32>, vector<8x256xf32> -> vector<8x256xf32>
    %38 = arith.addf %29, %37 : vector<8x256xf32>
    %39 = vector.extract_strided_slice %6 {offsets = [0, 768], sizes = [8, 256], strides = [1, 1]} : vector<8x2048xf32> to vector<8x256xf32>
    %cst_28 = arith.constant dense<0.000000e+00> : vector<8x128xf32>
    %40 = tpu.matmul %39, %9, %cst_28 {dimension_numbers = #tpu.dot_dimension_numbers<[1], [0], [0], [1], [0, 0, 1, 1], [], []>} : vector<8x256xf32>, vector<256x128xf32>, vector<8x128xf32> -> vector<8x128xf32>
    %41 = vector.broadcast %10 : vector<1x128xf32> to vector<8x128xf32>
    %42 = arith.addf %40, %41 : vector<8x128xf32>
    %43 = math.tanh %42 : vector<8x128xf32>
    %c0_29 = arith.constant 0 : index
    %c384 = arith.constant 384 : index
    %44 = vector.load %arg11[%c0_29, %c384] : memref<8x1024xf32, #tpu.memory_space<vmem>>, vector<8x128xf32>
    tpu.vector_store %arg11[%c0_29, %c384], %43 {strides = array<i32>} : memref<8x1024xf32, #tpu.memory_space<vmem>>, vector<8x128xf32>,
    %c384_30 = arith.constant 384 : index
    %c0_31 = arith.constant 0 : index
    %45 = vector.load %arg6[%c384_30, %c0_31] : memref<1024x256xf32, #tpu.memory_space<vmem>>, vector<128x256xf32>
    %cst_32 = arith.constant dense<0.000000e+00> : vector<8x256xf32>
    %46 = tpu.matmul %43, %45, %cst_32 {dimension_numbers = #tpu.dot_dimension_numbers<[1], [0], [0], [1], [0, 0, 1, 1], [], []>} : vector<8x128xf32>, vector<128x256xf32>, vector<8x256xf32> -> vector<8x256xf32>
    %47 = arith.addf %38, %46 : vector<8x256xf32>
    %48 = vector.extract_strided_slice %6 {offsets = [0, 1024], sizes = [8, 256], strides = [1, 1]} : vector<8x2048xf32> to vector<8x256xf32>
    %cst_33 = arith.constant dense<0.000000e+00> : vector<8x128xf32>
    %49 = tpu.matmul %48, %9, %cst_33 {dimension_numbers = #tpu.dot_dimension_numbers<[1], [0], [0], [1], [0, 0, 1, 1], [], []>} : vector<8x256xf32>, vector<256x128xf32>, vector<8x128xf32> -> vector<8x128xf32>
    %50 = vector.broadcast %10 : vector<1x128xf32> to vector<8x128xf32>
    %51 = arith.addf %49, %50 : vector<8x128xf32>
    %52 = math.tanh %51 : vector<8x128xf32>
    %c0_34 = arith.constant 0 : index
    %c512 = arith.constant 512 : index
    %53 = vector.load %arg11[%c0_34, %c512] : memref<8x1024xf32, #tpu.memory_space<vmem>>, vector<8x128xf32>
    tpu.vector_store %arg11[%c0_34, %c512], %52 {strides = array<i32>} : memref<8x1024xf32, #tpu.memory_space<vmem>>, vector<8x128xf32>,
    %c512_35 = arith.constant 512 : index
    %c0_36 = arith.constant 0 : index
    %54 = vector.load %arg6[%c512_35, %c0_36] : memref<1024x256xf32, #tpu.memory_space<vmem>>, vector<128x256xf32>
    %cst_37 = arith.constant dense<0.000000e+00> : vector<8x256xf32>
    %55 = tpu.matmul %52, %54, %cst_37 {dimension_numbers = #tpu.dot_dimension_numbers<[1], [0], [0], [1], [0, 0, 1, 1], [], []>} : vector<8x128xf32>, vector<128x256xf32>, vector<8x256xf32> -> vector<8x256xf32>
    %56 = arith.addf %47, %55 : vector<8x256xf32>
    %57 = vector.extract_strided_slice %6 {offsets = [0, 1280], sizes = [8, 256], strides = [1, 1]} : vector<8x2048xf32> to vector<8x256xf32>
    %cst_38 = arith.constant dense<0.000000e+00> : vector<8x128xf32>
    %58 = tpu.matmul %57, %9, %cst_38 {dimension_numbers = #tpu.dot_dimension_numbers<[1], [0], [0], [1], [0, 0, 1, 1], [], []>} : vector<8x256xf32>, vector<256x128xf32>, vector<8x128xf32> -> vector<8x128xf32>
    %59 = vector.broadcast %10 : vector<1x128xf32> to vector<8x128xf32>
    %60 = arith.addf %58, %59 : vector<8x128xf32>
    %61 = math.tanh %60 : vector<8x128xf32>
    %c0_39 = arith.constant 0 : index
    %c640 = arith.constant 640 : index
    %62 = vector.load %arg11[%c0_39, %c640] : memref<8x1024xf32, #tpu.memory_space<vmem>>, vector<8x128xf32>
    tpu.vector_store %arg11[%c0_39, %c640], %61 {strides = array<i32>} : memref<8x1024xf32, #tpu.memory_space<vmem>>, vector<8x128xf32>,
    %c640_40 = arith.constant 640 : index
    %c0_41 = arith.constant 0 : index
    %63 = vector.load %arg6[%c640_40, %c0_41] : memref<1024x256xf32, #tpu.memory_space<vmem>>, vector<128x256xf32>
    %cst_42 = arith.constant dense<0.000000e+00> : vector<8x256xf32>
    %64 = tpu.matmul %61, %63, %cst_42 {dimension_numbers = #tpu.dot_dimension_numbers<[1], [0], [0], [1], [0, 0, 1, 1], [], []>} : vector<8x128xf32>, vector<128x256xf32>, vector<8x256xf32> -> vector<8x256xf32>
    %65 = arith.addf %56, %64 : vector<8x256xf32>
    %66 = vector.extract_strided_slice %6 {offsets = [0, 1536], sizes = [8, 256], strides = [1, 1]} : vector<8x2048xf32> to vector<8x256xf32>
    %cst_43 = arith.constant dense<0.000000e+00> : vector<8x128xf32>
    %67 = tpu.matmul %66, %9, %cst_43 {dimension_numbers = #tpu.dot_dimension_numbers<[1], [0], [0], [1], [0, 0, 1, 1], [], []>} : vector<8x256xf32>, vector<256x128xf32>, vector<8x128xf32> -> vector<8x128xf32>
    %68 = vector.broadcast %10 : vector<1x128xf32> to vector<8x128xf32>
    %69 = arith.addf %67, %68 : vector<8x128xf32>
    %70 = math.tanh %69 : vector<8x128xf32>
    %c0_44 = arith.constant 0 : index
    %c768 = arith.constant 768 : index
    %71 = vector.load %arg11[%c0_44, %c768] : memref<8x1024xf32, #tpu.memory_space<vmem>>, vector<8x128xf32>
    tpu.vector_store %arg11[%c0_44, %c768], %70 {strides = array<i32>} : memref<8x1024xf32, #tpu.memory_space<vmem>>, vector<8x128xf32>,
    %c768_45 = arith.constant 768 : index
    %c0_46 = arith.constant 0 : index
    %72 = vector.load %arg6[%c768_45, %c0_46] : memref<1024x256xf32, #tpu.memory_space<vmem>>, vector<128x256xf32>
    %cst_47 = arith.constant dense<0.000000e+00> : vector<8x256xf32>
    %73 = tpu.matmul %70, %72, %cst_47 {dimension_numbers = #tpu.dot_dimension_numbers<[1], [0], [0], [1], [0, 0, 1, 1], [], []>} : vector<8x128xf32>, vector<128x256xf32>, vector<8x256xf32> -> vector<8x256xf32>
    %74 = arith.addf %65, %73 : vector<8x256xf32>
    %75 = vector.extract_strided_slice %6 {offsets = [0, 1792], sizes = [8, 256], strides = [1, 1]} : vector<8x2048xf32> to vector<8x256xf32>
    %cst_48 = arith.constant dense<0.000000e+00> : vector<8x128xf32>
    %76 = tpu.matmul %75, %9, %cst_48 {dimension_numbers = #tpu.dot_dimension_numbers<[1], [0], [0], [1], [0, 0, 1, 1], [], []>} : vector<8x256xf32>, vector<256x128xf32>, vector<8x128xf32> -> vector<8x128xf32>
    %77 = vector.broadcast %10 : vector<1x128xf32> to vector<8x128xf32>
    %78 = arith.addf %76, %77 : vector<8x128xf32>
    %79 = math.tanh %78 : vector<8x128xf32>
    %c0_49 = arith.constant 0 : index
    %c896 = arith.constant 896 : index
    %80 = vector.load %arg11[%c0_49, %c896] : memref<8x1024xf32, #tpu.memory_space<vmem>>, vector<8x128xf32>
    tpu.vector_store %arg11[%c0_49, %c896], %79 {strides = array<i32>} : memref<8x1024xf32, #tpu.memory_space<vmem>>, vector<8x128xf32>,
    %c896_50 = arith.constant 896 : index
    %c0_51 = arith.constant 0 : index
    %81 = vector.load %arg6[%c896_50, %c0_51] : memref<1024x256xf32, #tpu.memory_space<vmem>>, vector<128x256xf32>
    %cst_52 = arith.constant dense<0.000000e+00> : vector<8x256xf32>
    %82 = tpu.matmul %79, %81, %cst_52 {dimension_numbers = #tpu.dot_dimension_numbers<[1], [0], [0], [1], [0, 0, 1, 1], [], []>} : vector<8x128xf32>, vector<128x256xf32>, vector<8x256xf32> -> vector<8x256xf32>
    %83 = arith.addf %74, %82 : vector<8x256xf32>
    %c0_53 = arith.constant 0 : index
    %c0_54 = arith.constant 0 : index
    %84 = vector.load %arg7[%c0_53, %c0_54] : memref<1x256xf32, #tpu.memory_space<vmem>>, vector<1x256xf32>
    %85 = vector.broadcast %84 : vector<1x256xf32> to vector<8x256xf32>
    %86 = arith.addf %83, %85 : vector<8x256xf32>
    %c0_55 = arith.constant 0 : index
    %c0_56 = arith.constant 0 : index
    %87 = vector.load %arg8[%c0_55, %c0_56] : memref<256x128xf32, #tpu.memory_space<vmem>>, vector<256x128xf32>
    %cst_57 = arith.constant dense<0.000000e+00> : vector<8x128xf32>
    %88 = tpu.matmul %86, %87, %cst_57 {dimension_numbers = #tpu.dot_dimension_numbers<[1], [0], [0], [1], [0, 0, 1, 1], [], []>} : vector<8x256xf32>, vector<256x128xf32>, vector<8x128xf32> -> vector<8x128xf32>
    %c0_58 = arith.constant 0 : index
    %c0_59 = arith.constant 0 : index
    %89 = vector.load %arg9[%c0_58, %c0_59] : memref<1x128xf32, #tpu.memory_space<vmem>>, vector<1x128xf32>
    %90 = vector.broadcast %89 : vector<1x128xf32> to vector<8x128xf32>
    %91 = arith.addf %88, %90 : vector<8x128xf32>
    %c0_60 = arith.constant 0 : index
    %c0_61 = arith.constant 0 : index
    %92 = vector.load %arg10[%c0_60, %c0_61] : memref<8x128xf32, #tpu.memory_space<vmem>>, vector<8x128xf32>
    tpu.vector_store %arg10[%c0_60, %c0_61], %91 {strides = array<i32>} : memref<8x128xf32, #tpu.memory_space<vmem>>, vector<8x128xf32>,
    return
  }
  func.func @transform_0(%arg0: i32) -> (i32, i32) {
    %c0_i32 = arith.constant 0 : i32
    %c0_i32_0 = arith.constant 0 : i32
    return %arg0, %c0_i32 : i32, i32
  }
  func.func @transform_1(%arg0: i32) -> (i32, i32) {
    %c0_i32 = arith.constant 0 : i32
    %c0_i32_0 = arith.constant 0 : i32
    %c0_i32_1 = arith.constant 0 : i32
    return %c0_i32, %c0_i32_0 : i32, i32
  }
  func.func @transform_2(%arg0: i32) -> (i32, i32) {
    %c0_i32 = arith.constant 0 : i32
    %c0_i32_0 = arith.constant 0 : i32
    %c0_i32_1 = arith.constant 0 : i32
    return %c0_i32, %c0_i32_0 : i32, i32
  }
  func.func @transform_3(%arg0: i32) -> (i32, i32) {
    %c0_i32 = arith.constant 0 : i32
    %c0_i32_0 = arith.constant 0 : i32
    %c0_i32_1 = arith.constant 0 : i32
    return %c0_i32, %c0_i32_0 : i32, i32
  }
  func.func @transform_4(%arg0: i32) -> (i32, i32) {
    %c0_i32 = arith.constant 0 : i32
    %c0_i32_0 = arith.constant 0 : i32
    %c0_i32_1 = arith.constant 0 : i32
    return %c0_i32, %c0_i32_0 : i32, i32
  }
  func.func @transform_5(%arg0: i32) -> (i32, i32) {
    %c0_i32 = arith.constant 0 : i32
    %c0_i32_0 = arith.constant 0 : i32
    %c0_i32_1 = arith.constant 0 : i32
    return %c0_i32, %c0_i32_0 : i32, i32
  }
  func.func @transform_6(%arg0: i32) -> (i32, i32) {
    %c0_i32 = arith.constant 0 : i32
    %c0_i32_0 = arith.constant 0 : i32
    %c0_i32_1 = arith.constant 0 : i32
    return %c0_i32, %c0_i32_0 : i32, i32
  }
  func.func @transform_7(%arg0: i32) -> (i32, i32) {
    %c0_i32 = arith.constant 0 : i32
    %c0_i32_0 = arith.constant 0 : i32
    %c0_i32_1 = arith.constant 0 : i32
    return %c0_i32, %c0_i32_0 : i32, i32
  }
  func.func @transform_8(%arg0: i32) -> (i32, i32) {
    %c0_i32 = arith.constant 0 : i32
    %c0_i32_0 = arith.constant 0 : i32
    %c0_i32_1 = arith.constant 0 : i32
    return %c0_i32, %c0_i32_0 : i32, i32
  }
  func.func @transform_9(%arg0: i32) -> (i32, i32) {
    %c0_i32 = arith.constant 0 : i32
    %c0_i32_0 = arith.constant 0 : i32
    return %arg0, %c0_i32 : i32, i32
  }
  func.func @transform_10(%arg0: i32) -> (i32, i32) {
    %c0_i32 = arith.constant 0 : i32
    %c0_i32_0 = arith.constant 0 : i32
    return %arg0, %c0_i32 : i32, i32
  }
  func.func @transform_11(%arg0: i32) -> (i32, i32) {
    %c0_i32 = arith.constant 0 : i32
    %c0_i32_0 = arith.constant 0 : i32
    return %arg0, %c0_i32 : i32, i32
  }
}

</mosaic_0001>

<bundles_post_ra>
// kernel: tpu_custom_call.1
= control target key start
LH: loop header
LB: loop body
LE: loop exit
PB: predicated region body
PF: predicated region fallthrough
CT: control target
= control target key end

     0   :  { %17 = vsyncpa [#allocation3], 0  ;;  %s4214_s0 = inlined_call_operand.hbm [shape: f32[8,32], index: 0, kind: input, shape index: {}]   ;;  %s4215_s1 = inlined_call_operand.hbm [shape: f32[32,2048], index: 1, kind: input, shape index: {}]   ;;  %s4216_s2 = inlined_call_operand.hbm [shape: f32[1,2048], index: 2, kind: input, shape index: {}]   ;;  %s4217_s3 = inlined_call_operand.hbm [shape: f32[256,128], index: 3, kind: input, shape index: {}]   ;;  %s4218_s4 = inlined_call_operand.vmem [shape: f32[1,128], index: 4, kind: input, shape index: {}]   ;;  %s4219_s5 = inlined_call_operand.hbm [shape: f32[1024,256], index: 5, kind: input, shape index: {}]   ;;  %s4220_s6 = inlined_call_operand.vmem [shape: f32[1,256], index: 6, kind: input, shape index: {}]   ;;  %s4221_s7 = inlined_call_operand.hbm [shape: f32[256,128], index: 7, kind: input, shape index: {}]   ;;  %s4222_s8 = inlined_call_operand.vmem [shape: f32[1,128], index: 8, kind: input, shape index: {}]   ;;  %s4223_s9 = inlined_call_operand.hbm [shape: f32[8,128], index: 9, kind: output, shape index: {0}]   ;;  %s4224_s10 = inlined_call_operand.hbm [shape: f32[8,1024], index: 10, kind: output, shape index: {1}]   ;;  %s4225_s11 = inlined_call_operand.hbm [shape: f32[8,1792], index: 11, kind: output, shape index: {2}]  }
   0x1   :  { %18 = vsyncpa [#allocation6], 0 }
   0x2   :  { %19 = vsyncpa [#allocation9], 0 }
   0x3   :  { %20 = vsyncpa [#allocation12], 0 }
   0x4   :  { %21 = vsyncpa [#allocation4], 0 }
   0x5   :  { %22 = vsyncpa [#allocation15], 0  ;;  %s3706_s17 = smov [#allocation5]   ;;  %s3496_s21 = scalar_lea.hbm %s4215_s1, 8192 }
   0x6   :  { %s38_s18 = sshll.u32 %s3706_s17, 4  ;;  %p3497_p0 = scmp.ne.s32.totalorder %s4215_s1, %s3496_s21  ;;  %s39_s18 = int_to_ptr.vmem [resolvable:$true] %s38_s18 }
   0x7   :  { %p3500_p1 = scmp.lt.u32.totalorder %s3496_s21, %s4215_s1 }
   0x9   :  { %p3502_p2 = pnand %p3500_p1, %p3497_p0 }
   0xb   :  { %3505 = shalt.err (!%p3502_p2)
}
   0xc   :  { %s3506_s26 = scalar_lea.vmem %s39_s18, 8192  ;;  %p3511_p4 = scmp.lt.s32.totalorder %s39_s18, %s39_s18 }
   0xd   :  { %p3507_p3 = scmp.ne.s32.totalorder %s39_s18, %s3506_s26  ;;  %p3512_p5 = scmp.lt.s32.totalorder %s3506_s26, %s3506_s26 }
   0xf   :  { %p3513_p6 = por %p3512_p5, %p3511_p4 }
  0x11   :  { %p3514_p7 = pnand %p3513_p6, %p3507_p3 }
  0x13   :  { %3517 = shalt.err (!%p3514_p7)
}
  0x14   :  { %s3707_s27 = smov 2048   ;;  %s3708_s28 = smov 128  }
  0x15   :  { %44 = dma.hbm_to_vmem [thread:$0]  %s4215_s1, 8192, %s39_s18, [#allocation6], %s3707_s27, %s3707_s27, %s3708_s28  }
  0x16   :  { %s3709_s12 = smov [#allocation8]   ;;  %s3518_s16 = scalar_lea.hbm %s4217_s3, 4096 }
  0x17   :  { %s60_s13 = sshll.u32 %s3709_s12, 4  ;;  %p3519_p8 = scmp.ne.s32.totalorder %s4217_s3, %s3518_s16  ;;  %s61_s13 = int_to_ptr.vmem [resolvable:$true] %s60_s13 }
  0x18   :  { %p3522_p9 = scmp.lt.u32.totalorder %s3518_s16, %s4217_s3 }
  0x1a   :  { %p3524_p10 = pnand %p3522_p9, %p3519_p8 }
  0x1c   :  { %3527 = shalt.err (!%p3524_p10)
}
  0x1d   :  { %s3528_s22 = scalar_lea.vmem %s61_s13, 4096  ;;  %p3533_p12 = scmp.lt.s32.totalorder %s61_s13, %s61_s13 }
  0x1e   :  { %p3529_p11 = scmp.ne.s32.totalorder %s61_s13, %s3528_s22  ;;  %p3534_p13 = scmp.lt.s32.totalorder %s3528_s22, %s3528_s22 }
  0x20   :  { %p3535_p0 = por %p3534_p13, %p3533_p12 }
  0x22   :  { %p3536_p1 = pnand %p3535_p0, %p3529_p11 }
  0x24   :  { %3539 = shalt.err (!%p3536_p1)
}
  0x25   :  { %s3710_s1 = smov 8   ;;  %s3711_s24 = smov [#allocation2]  }
  0x26   :  { %66 = dma.hbm_to_vmem [thread:$0]  %s4217_s3, 4096, %s61_s13, [#allocation9], %s3708_s28, %s3708_s28, %s3710_s1  }
  0x27   :  { %s29_s25 = sshll.u32 %s3711_s24, 4  ;;  %s3712_s26 = smov [#allocation7]   ;;  %s30_s25 = int_to_ptr.vmem [resolvable:$true] %s29_s25 }
  0x28   :  { %s51_s27 = sshll.u32 %s3712_s26, 4  ;;  %s3540_s12 = scalar_lea.hbm %s4214_s0, 128  ;;  %s52_s27 = int_to_ptr.vmem [resolvable:$true] %s51_s27 }
  0x29   :  { %p3541_p2 = scmp.ne.s32.totalorder %s4214_s0, %s3540_s12  ;;  %p3544_p3 = scmp.lt.u32.totalorder %s3540_s12, %s4214_s0 }
  0x2b   :  { %p3546_p4 = pnand %p3544_p3, %p3541_p2 }
  0x2d   :  { %3549 = shalt.err (!%p3546_p4)
}
  0x2e   :  { %s3550_s3 = scalar_lea.vmem %s30_s25, 128  ;;  %p3555_p6 = scmp.lt.s32.totalorder %s30_s25, %s30_s25 }
  0x2f   :  { %p3551_p5 = scmp.ne.s32.totalorder %s30_s25, %s3550_s3  ;;  %p3556_p7 = scmp.lt.s32.totalorder %s3550_s3, %s3550_s3 }
  0x31   :  { %p3557_p8 = por %p3556_p7, %p3555_p6 }
  0x33   :  { %p3558_p9 = pnand %p3557_p8, %p3551_p5 }
  0x35   :  { %3561 = shalt.err (!%p3558_p9)
}
  0x36   :  { %32 = dma.hbm_to_vmem [thread:$0]  %s4214_s0, 128, %s30_s25, [#allocation3]  }
  0x37   :  { %s3562_s22 = scalar_lea.hbm %s4216_s2, 256 }
  0x38   :  { %p3563_p10 = scmp.ne.s32.totalorder %s4216_s2, %s3562_s22  ;;  %p3566_p11 = scmp.lt.u32.totalorder %s3562_s22, %s4216_s2 }
  0x3a   :  { %p3568_p12 = pnand %p3566_p11, %p3563_p10 }
  0x3c   :  { %3571 = shalt.err (!%p3568_p12)
}
  0x3d   :  { %s3572_s29 = scalar_lea.vmem %s52_s27, 256  ;;  %p3577_p0 = scmp.lt.s32.totalorder %s52_s27, %s52_s27 }
  0x3e   :  { %p3573_p13 = scmp.ne.s32.totalorder %s52_s27, %s3572_s29  ;;  %p3578_p1 = scmp.lt.s32.totalorder %s3572_s29, %s3572_s29 }
  0x40   :  { %p3579_p2 = por %p3578_p1, %p3577_p0 }
  0x42   :  { %p3580_p3 = pnand %p3579_p2, %p3573_p13 }
  0x44   :  { %3583 = shalt.err (!%p3580_p3)
}
  0x45   :  { %54 = dma.hbm_to_vmem [thread:$0]  %s4216_s2, 256, %s52_s27, [#allocation6]  }
  0x46   :  { %s3713_s30 = smov [#allocation10]   ;;  %s3584_s16 = scalar_lea.hbm %s4219_s5, 32768 }
  0x47   :  { %s74_s12 = sshll.u32 %s3713_s30, 4  ;;  %p3585_p4 = scmp.ne.s32.totalorder %s4219_s5, %s3584_s16  ;;  %s75_s12 = int_to_ptr.vmem [resolvable:$true] %s74_s12 }
  0x48   :  { %p3588_p5 = scmp.lt.u32.totalorder %s3584_s16, %s4219_s5 }
  0x4a   :  { %p3590_p6 = pnand %p3588_p5, %p3585_p4 }
  0x4c   :  { %3593 = shalt.err (!%p3590_p6)
}
  0x4d   :  { %s3594_s20 = scalar_lea.vmem %s75_s12, 32768  ;;  %p3599_p8 = scmp.lt.s32.totalorder %s75_s12, %s75_s12 }
  0x4e   :  { %p3595_p7 = scmp.ne.s32.totalorder %s75_s12, %s3594_s20  ;;  %p3600_p9 = scmp.lt.s32.totalorder %s3594_s20, %s3594_s20 }
  0x50   :  { %p3601_p10 = por %p3600_p9, %p3599_p8 }
  0x52   :  { %p3602_p11 = pnand %p3601_p10, %p3595_p7 }
  0x54   :  { %3605 = shalt.err (!%p3602_p11)
}
  0x55   :  { %s3714_s2 = smov 256   ;;  %s3715_s27 = smov 16  }
  0x56   :  { %80 = dma.hbm_to_vmem [thread:$0]  %s4219_s5, 32768, %s75_s12, [#allocation9], %s3714_s2, %s3714_s2, %s3715_s27  }
  0x57   :  { %s3716_s18 = smov [#allocation11]   ;;  %s3606_s29 = scalar_lea.hbm %s4221_s7, 4096 }
  0x58   :  { %s88_s23 = sshll.u32 %s3716_s18, 4  ;;  %p3607_p12 = scmp.ne.s32.totalorder %s4221_s7, %s3606_s29  ;;  %s89_s23 = int_to_ptr.vmem [resolvable:$true] %s88_s23 }
  0x59   :  { %p3610_p13 = scmp.lt.u32.totalorder %s3606_s29, %s4221_s7 }
  0x5b   :  { %p3612_p0 = pnand %p3610_p13, %p3607_p12 }
  0x5d   :  { %3615 = shalt.err (!%p3612_p0)
}
  0x5e   :  { %s3616_s15 = scalar_lea.vmem %s89_s23, 4096  ;;  %p3621_p2 = scmp.lt.s32.totalorder %s89_s23, %s89_s23 }
  0x5f   :  { %p3617_p1 = scmp.ne.s32.totalorder %s89_s23, %s3616_s15  ;;  %p3622_p3 = scmp.lt.s32.totalorder %s3616_s15, %s3616_s15 }
  0x61   :  { %p3623_p4 = por %p3622_p3, %p3621_p2 }
  0x63   :  { %p3624_p5 = pnand %p3623_p4, %p3617_p1 }
  0x65   :  { %3627 = shalt.err (!%p3624_p5)
}
  0x66   :  { %94 = dma.hbm_to_vmem [thread:$0]  %s4221_s7, 4096, %s89_s23, [#allocation12], %s3708_s28, %s3708_s28, %s3710_s1  }
  0x67   :  { %3694 = dma.done.wait [#allocation3], 128  }
  0x68   :  { %3695 = vsyncadd [#allocation3], 4294967168 }
  0x69   :  { %3696 = dma.done.wait [#allocation6], 8448  }
  0x6a   :  { %3697 = vsyncadd [#allocation6], 4294958848 }
  0x6b   :  { %3698 = dma.done.wait [#allocation9], 36864  }
  0x6c   :  { %3699 = vsyncadd [#allocation9], 4294930432 }
  0x6d   :  { %3700 = dma.done.wait [#allocation12], 4096  }
  0x6e   :  { %3701 = vsyncadd [#allocation12], 4294963200  ;;  %v3717_v0 = vmov 0.0   ;;  %v117_v1 = vld [vmem:[#allocation5 + $0x8] sm:$0xff]  ;;  %v116_v3 = vld [vmem:[#allocation5] sm:$0xff]  ;;  %vm264_vm0 = vcmask 261120  }
  0x6f   :  { %332 = vmatprep.mubr.f32.mxu1 %v3717_v0  ;;  %616 = vmatprep.mubr.f32.mxu0 %v3717_v0  ;;  %v133_v2 = vld [vmem:[#allocation5 + $0x88] sm:$0xff]  ;;  %v132_v5 = vld [vmem:[#allocation5 + $0x80] sm:$0xff]  ;;  %v119_v12 = vld [vmem:[#allocation5 + $0x18] sm:$0xff]  ;;  %s3718_s16 = smov [#allocation14]  }
  0x70   :  { %v2811_v4 = vpack.c.bf16 %v133_v2, %v117_v1  ;;  %v149_v6 = vld [vmem:[#allocation5 + $0x108] sm:$0xff]  ;;  %v2813_v8 = vpack.c.bf16 %v132_v5, %v116_v3  ;;  %v148_v10 = vld [vmem:[#allocation5 + $0x100] sm:$0xff]  ;;  %v135_v13 = vld [vmem:[#allocation5 + $0x98] sm:$0xff]  ;;  %s2457_s17 = sshll.u32 %s3718_s16, 4  ;;  %s2458_s17 = int_to_ptr.vmem [resolvable:$true] %s2457_s17 }
  0x71   :  { %v165_v7 = vld [vmem:[#allocation5 + $0x188] sm:$0xff]  ;;  %v164_v11 = vld [vmem:[#allocation5 + $0x180] sm:$0xff]  ;;  %v2819_v15 = vpack.c.bf16 %v135_v13, %v119_v12  ;;  %v118_v16 = vld [vmem:[#allocation5 + $0x10] sm:$0xff]  ;;  %s3628_s3 = scalar_lea.vmem %s2458_s17, 1024  ;;  %p3633_p7 = scmp.lt.s32.totalorder %s2458_s17, %s2458_s17 }
  0x72   :  { %v2815_v9 = vpack.c.bf16 %v165_v7, %v149_v6  ;;  %2812 = vmatprep.subr.bf16.mxu1 %v2811_v4  ;;  %v2817_v14 = vpack.c.bf16 %v164_v11, %v148_v10  ;;  %v134_v17 = vld [vmem:[#allocation5 + $0x90] sm:$0xff]  ;;  %v151_v18 = vld [vmem:[#allocation5 + $0x118] sm:$0xff]  ;;  %v121_v25 = vld [vmem:[#allocation5 + $0x28] sm:$0xff]  ;;  %p3629_p6 = scmp.ne.s32.totalorder %s2458_s17, %s3628_s3  ;;  %p3634_p8 = scmp.lt.s32.totalorder %s3628_s3, %s3628_s3 }
  0x73   :  { %2814 = vmatpush1.bf16.msra.mxu1 %v2813_v8  ;;  %v167_v19 = vld [vmem:[#allocation5 + $0x198] sm:$0xff]  ;;  %v2821_v21 = vpack.c.bf16 %v134_v17, %v118_v16  ;;  %v150_v23 = vld [vmem:[#allocation5 + $0x110] sm:$0xff]  ;;  %v137_v26 = vld [vmem:[#allocation5 + $0xa8] sm:$0xff] }
  0x74   :  { %2816 = vmatprep.subr.bf16.mxu1 %v2815_v9  ;;  %v3862_v20 = vld [vmem:[#allocation2] sm:$0xff]  ;;  %v2823_v22 = vpack.c.bf16 %v167_v19, %v151_v18  ;;  %v166_v24 = vld [vmem:[#allocation5 + $0x190] sm:$0xff]  ;;  %v120_v27 = vld [vmem:[#allocation5 + $0x20] sm:$0xff]  ;;  %v2827_v36 = vpack.c.bf16 %v137_v26, %v121_v25  ;;  %p3635_p9 = por %p3634_p8, %p3633_p7 }
  0x75   :  { %v125_v28 = vld [vmem:[#allocation5 + $0x48] sm:$0xff]  ;;  %v124_v30 = vld [vmem:[#allocation5 + $0x40] sm:$0xff]  ;;  %v2825_v31 = vpack.c.bf16 %v166_v24, %v150_v23  ;;  %v123_v55 = vld [vmem:[#allocation5 + $0x38] sm:$0xff] }
  0x76   :  { %v141_v29 = vld [vmem:[#allocation5 + $0xc8] sm:$0xff]  ;;  %v140_v33 = vld [vmem:[#allocation5 + $0xc0] sm:$0xff]  ;;  %v139_v56 = vld [vmem:[#allocation5 + $0xb8] sm:$0xff]  ;;  %p3636_p10 = pnand %p3635_p9, %p3629_p6 }
  0x77   :  { %2818 = vmatpush1.bf16.msra.mxu1 %v2817_v14  ;;  %v2843_v32 = vpack.c.bf16 %v141_v29, %v125_v28  ;;  %v157_v34 = vld [vmem:[#allocation5 + $0x148] sm:$0xff]  ;;  %v136_v37 = vld [vmem:[#allocation5 + $0xa0] sm:$0xff]  ;;  %v2845_v38 = vpack.c.bf16 %v140_v33, %v124_v30  ;;  %v2835_v63 = vpack.c.bf16 %v139_v56, %v123_v55  ;;  %v122_v1 = vld [vmem:[#allocation5 + $0x30] sm:$0xff] }
  0x78   :  { %2820 = vmatprep.subr.bf16.mxu1 %v2819_v15  ;;  %v173_v35 = vld [vmem:[#allocation5 + $0x1c8] sm:$0xff]  ;;  %v156_v40 = vld [vmem:[#allocation5 + $0x140] sm:$0xff]  ;;  %v2829_v46 = vpack.c.bf16 %v136_v37, %v120_v27  ;;  %v138_v2 = vld [vmem:[#allocation5 + $0xb0] sm:$0xff] }
  0x79   :  { %v2847_v39 = vpack.c.bf16 %v173_v35, %v157_v34  ;;  %v172_v41 = vld [vmem:[#allocation5 + $0x1c0] sm:$0xff]  ;;  %v153_v42 = vld [vmem:[#allocation5 + $0x128] sm:$0xff]  ;;  %2844 = vmatprep.subr.bf16.mxu0 %v2843_v32  ;;  %v155_v3 = vld [vmem:[#allocation5 + $0x138] sm:$0xff]  ;;  %v2837_v8 = vpack.c.bf16 %v138_v2, %v122_v1 }
  0x7a   :  { %2486 = vmatmul.mubr.msk.f32.vlgmr.msra.gmra.mrb[0].mxu1 %vm264_vm0, %v3862_v20  ;;  %v169_v43 = vld [vmem:[#allocation5 + $0x1a8] sm:$0xff]  ;;  %v152_v44 = vld [vmem:[#allocation5 + $0x120] sm:$0xff]  ;;  %2846 = vmatpush1.bf16.msra.mxu0 %v2845_v38  ;;  %v2849_v45 = vpack.c.bf16 %v172_v41, %v156_v40  ;;  %v171_v4 = vld [vmem:[#allocation5 + $0x1b8] sm:$0xff] }
  0x7b   :  { %2822 = vmatpush1.bf16.msra.mxu1 %v2821_v21  ;;  %403 = vmatprep.mubr.f32.mxu1 %v3717_v0  ;;  %v168_v47 = vld [vmem:[#allocation5 + $0x1a0] sm:$0xff]  ;;  %v129_v48 = vld [vmem:[#allocation5 + $0x68] sm:$0xff]  ;;  %v2831_v50 = vpack.c.bf16 %v169_v43, %v153_v42  ;;  %v882_v5 = vld [vmem:[#allocation8 + $0x80] sm:$0xff]  ;;  %v2839_v12 = vpack.c.bf16 %v171_v4, %v155_v3 }
  0x7c   :  { %2824 = vmatprep.subr.bf16.mxu1 %v2823_v22  ;;  %2848 = vmatprep.subr.bf16.mxu0 %v2847_v39  ;;  %v145_v49 = vld [vmem:[#allocation5 + $0xe8] sm:$0xff]  ;;  %v128_v52 = vld [vmem:[#allocation5 + $0x60] sm:$0xff]  ;;  %v2833_v59 = vpack.c.bf16 %v168_v47, %v152_v44  ;;  %v883_v6 = vld [vmem:[#allocation8 + $0x88] sm:$0xff] }
  0x7d   :  { %v2859_v51 = vpack.c.bf16 %v145_v49, %v129_v48  ;;  %v144_v53 = vld [vmem:[#allocation5 + $0xe0] sm:$0xff]  ;;  %v161_v54 = vld [vmem:[#allocation5 + $0x168] sm:$0xff]  ;;  %v154_v9 = vld [vmem:[#allocation5 + $0x130] sm:$0xff]  ;;  %v3873_v14 = vpack.c.bf16 %v883_v6, %v882_v5 }
  0x7e   :  { %v177_v57 = vld [vmem:[#allocation5 + $0x1e8] sm:$0xff]  ;;  %2850 = vmatpush1.bf16.msra.mxu0 %v2849_v45  ;;  %v2861_v58 = vpack.c.bf16 %v144_v53, %v128_v52  ;;  %v160_v61 = vld [vmem:[#allocation5 + $0x160] sm:$0xff]  ;;  %v866_v10 = vld [vmem:[#allocation8] sm:$0xff] }
  0x7f   :  { %2826 = vmatpush1.bf16.msra.mxu1 %v2825_v31  ;;  %v2863_v60 = vpack.c.bf16 %v177_v57, %v161_v54  ;;  %v176_v62 = vld [vmem:[#allocation5 + $0x1e0] sm:$0xff]  ;;  %2860 = vmatprep.subr.bf16.mxu0 %v2859_v51  ;;  %v867_v11 = vld [vmem:[#allocation8 + $0x8] sm:$0xff]  ;;  %v170_v13 = vld [vmem:[#allocation5 + $0x1b0] sm:$0xff] }
  0x80   :  { %2828 = vmatprep.subr.bf16.mxu1 %v2827_v36  ;;  %v2865_v7 = vpack.c.bf16 %v176_v62, %v160_v61  ;;  %v884_v15 = vld [vmem:[#allocation8 + $0x90] sm:$0xff]  ;;  %v885_v16 = vld [vmem:[#allocation8 + $0x98] sm:$0xff]  ;;  %v127_v17 = vld [vmem:[#allocation5 + $0x58] sm:$0xff]  ;;  %v3877_v19 = vpack.c.bf16 %v867_v11, %v866_v10  ;;  %v2841_v21 = vpack.c.bf16 %v170_v13, %v154_v9 }
  0x81   :  { %2490 = vmatmul.mubr.msk.f32.vlgmr.msra.gmra.mrb[0].mxu0 %vm264_vm0, %v3862_v20  ;;  %v143_v18 = vld [vmem:[#allocation5 + $0xd8] sm:$0xff]  ;;  %v3880_v22 = vpack.c.bf16 %v885_v16, %v884_v15  ;;  %v868_v23 = vld [vmem:[#allocation8 + $0x10] sm:$0xff]  ;;  %v869_v24 = vld [vmem:[#allocation8 + $0x18] sm:$0xff] }
  0x82   :  { %2487 = vmatmul.mubr.msk.f32.vlgmr.msra.gmra.mrb[2].mxu1 %vm264_vm0, %v3862_v20  ;;  %2862 = vmatpush1.bf16.msra.mxu0 %v2861_v58  ;;  %v2851_v25 = vpack.c.bf16 %v143_v18, %v127_v17  ;;  %v126_v26 = vld [vmem:[#allocation5 + $0x50] sm:$0xff]  ;;  %v159_v28 = vld [vmem:[#allocation5 + $0x158] sm:$0xff]  ;;  %v3886_v32 = vpack.c.bf16 %v869_v24, %v868_v23  ;;  %v888_v40 = vld [vmem:[#allocation8 + $0xb0] sm:$0xff]  ;;  %v184_v24 = vlaneseq }
  0x83   :  { %2830 = vmatpush1.bf16.msra.mxu1 %v2829_v46  ;;  %474 = vmatprep.mubr.f32.mxu1 %v3717_v0  ;;  %v142_v27 = vld [vmem:[#allocation5 + $0xd0] sm:$0xff]  ;;  %v175_v29 = vld [vmem:[#allocation5 + $0x1d8] sm:$0xff]  ;;  %v889_v41 = vld [vmem:[#allocation8 + $0xb8] sm:$0xff] }
  0x84   :  { %2832 = vmatprep.subr.bf16.mxu1 %v2831_v50  ;;  %758 = vmatprep.mubr.f32.mxu0 %v3717_v0  ;;  %v886_v30 = vld [vmem:[#allocation8 + $0xa0] sm:$0xff]  ;;  %v887_v31 = vld [vmem:[#allocation8 + $0xa8] sm:$0xff]  ;;  %v2853_v33 = vpack.c.bf16 %v142_v27, %v126_v26  ;;  %v2855_v37 = vpack.c.bf16 %v175_v29, %v159_v28  ;;  %v3897_v46 = vpack.c.bf16 %v889_v41, %v888_v40  ;;  %v872_v47 = vld [vmem:[#allocation8 + $0x30] sm:$0xff] }
  0x85   :  { %2864 = vmatprep.subr.bf16.mxu0 %v2863_v60  ;;  %v158_v34 = vld [vmem:[#allocation5 + $0x150] sm:$0xff]  ;;  %v871_v36 = vld [vmem:[#allocation8 + $0x28] sm:$0xff]  ;;  %v3889_v39 = vpack.c.bf16 %v887_v31, %v886_v30  ;;  %v873_v48 = vld [vmem:[#allocation8 + $0x38] sm:$0xff] }
  0x86   :  { %2866 = vmatpush1.bf16.msra.mxu0 %v2865_v7  ;;  %v870_v35 = vld [vmem:[#allocation8 + $0x20] sm:$0xff]  ;;  %v131_v42 = vld [vmem:[#allocation5 + $0x78] sm:$0xff]  ;;  %v3901_v54 = vpack.c.bf16 %v873_v48, %v872_v47  ;;  %v892_v2 = vld [vmem:[#allocation8 + $0xd0] sm:$0xff] }
  0x87   :  { %2834 = vmatpush1.bf16.msra.mxu1 %v2833_v59  ;;  %2876 = vmatprep.subr.bf16.mxu0 %v3873_v14  ;;  %v174_v38 = vld [vmem:[#allocation5 + $0x1d0] sm:$0xff]  ;;  %v147_v43 = vld [vmem:[#allocation5 + $0xf8] sm:$0xff]  ;;  %v3894_v44 = vpack.c.bf16 %v871_v36, %v870_v35  ;;  %v893_v3 = vld [vmem:[#allocation8 + $0xd8] sm:$0xff] }
  0x88   :  { %2836 = vmatprep.subr.bf16.mxu1 %v2835_v63  ;;  %v2857_v45 = vpack.c.bf16 %v174_v38, %v158_v34  ;;  %v2867_v49 = vpack.c.bf16 %v147_v43, %v131_v42  ;;  %v130_v50 = vld [vmem:[#allocation5 + $0x70] sm:$0xff]  ;;  %v163_v52 = vld [vmem:[#allocation5 + $0x178] sm:$0xff]  ;;  %v3926_v4 = vpack.c.bf16 %v893_v3, %v892_v2  ;;  %v876_v5 = vld [vmem:[#allocation8 + $0x50] sm:$0xff] }
  0x89   :  { %2492 = vmatmul.mubr.msk.f32.vlgmr.msra.gmra.mrb[2].mxu0 %vm264_vm0, %v3862_v20  ;;  %v146_v51 = vld [vmem:[#allocation5 + $0xf0] sm:$0xff]  ;;  %v179_v53 = vld [vmem:[#allocation5 + $0x1f8] sm:$0xff]  ;;  %v877_v6 = vld [vmem:[#allocation8 + $0x58] sm:$0xff] }
  0x8a   :  { %2488 = vmatmul.mubr.msk.f32.vlgmr.msra.gmra.mrb[4].mxu1 %vm264_vm0, %v3862_v20  ;;  %2878 = vmatpush3.bf16.msra.mxu0 %v3877_v19  ;;  %v2869_v55 = vpack.c.bf16 %v146_v51, %v130_v50  ;;  %v2871_v56 = vpack.c.bf16 %v179_v53, %v163_v52  ;;  %v162_v57 = vld [vmem:[#allocation5 + $0x170] sm:$0xff]  ;;  %v891_v61 = vld [vmem:[#allocation8 + $0xc8] sm:$0xff]  ;;  %v3928_v7 = vpack.c.bf16 %v877_v6, %v876_v5  ;;  %v896_v15 = vld [vmem:[#allocation8 + $0xf0] sm:$0xff] }
  0x8b   :  { %2838 = vmatpush1.bf16.msra.mxu1 %v2837_v8  ;;  %545 = vmatprep.mubr.f32.mxu1 %v3717_v0  ;;  %v178_v58 = vld [vmem:[#allocation5 + $0x1f0] sm:$0xff]  ;;  %v895_v9 = vld [vmem:[#allocation8 + $0xe8] sm:$0xff]  ;;  %v897_v16 = vld [vmem:[#allocation8 + $0xf8] sm:$0xff] }
  0x8c   :  { %2840 = vmatprep.subr.bf16.mxu1 %v2839_v12  ;;  %2880 = vmatprep.subr.bf16.mxu0 %v3880_v22  ;;  %v2873_v59 = vpack.c.bf16 %v178_v58, %v162_v57  ;;  %v890_v60 = vld [vmem:[#allocation8 + $0xc0] sm:$0xff]  ;;  %v879_v12 = vld [vmem:[#allocation8 + $0x68] sm:$0xff]  ;;  %v3942_v17 = vpack.c.bf16 %v897_v16, %v896_v15  ;;  %v880_v18 = vld [vmem:[#allocation8 + $0x70] sm:$0xff] }
  0x8d   :  { %v3918_v62 = vpack.c.bf16 %v891_v61, %v890_v60  ;;  %v874_v63 = vld [vmem:[#allocation8 + $0x40] sm:$0xff]  ;;  %v180_v27 = vld [vmem:[#allocation7] sm:$0xff]  ;;  %v3963_v40 = vld [vmem:[#allocation7 + $0x8] sm:$0xff] }
  0x8e   :  { %2882 = vmatpush3.bf16.msra.mxu0 %v3886_v32  ;;  %v894_v8 = vld [vmem:[#allocation8 + $0xe0] sm:$0xff] }
  0x8f   :  { %2842 = vmatpush1.bf16.msra.mxu1 %v2841_v21  ;;  %2884 = vmatprep.subr.bf16.mxu0 %v3889_v39  ;;  %v3934_v10 = vpack.c.bf16 %v895_v9, %v894_v8  ;;  %v878_v11 = vld [vmem:[#allocation8 + $0x60] sm:$0xff]  ;;  %v881_v21 = vld [vmem:[#allocation8 + $0x78] sm:$0xff] }
  0x90   :  { %2852 = vmatprep.subr.bf16.mxu1 %v2851_v25  ;;  %v3936_v13 = vpack.c.bf16 %v879_v12, %v878_v11  ;;  %v3944_v23 = vpack.c.bf16 %v881_v21, %v880_v18  ;;  %v3951_v25 = vshrl.u32 %v184_v24, 7 }
  0x92   :  { %2489 = vmatmul.mubr.msk.f32.vlgmr.msra.gmra.mrb[6].mxu1 %vm264_vm0, %v3862_v20  ;;  %2886 = vmatpush3.bf16.msra.mxu0 %v3894_v44  ;;  %v3954_v26 = vsub.s32 0, %v3951_v25  ;;  %v3957_v28 = vsub.s32 1, %v3951_v25  ;;  %v194_v35 = vsub.s32 2, %v3951_v25  ;;  %v202_v48 = vsub.s32 4, %v3951_v25 }
  0x93   :  { %2854 = vmatpush1.bf16.msra.mxu1 %v2853_v33  ;;  %687 = vmatprep.mubr.f32.mxu1 %v3717_v0  ;;  %v206_v51 = vsub.s32 5, %v3951_v25  ;;  %v210_v2 = vsub.s32 6, %v3951_v25  ;;  %v214_v5 = vsub.s32 7, %v3951_v25 }
  0x94   :  { %2856 = vmatprep.subr.bf16.mxu1 %v2855_v37  ;;  %2888 = vmatprep.subr.bf16.mxu0 %v3897_v46  ;;  %v187_v29 = vrot.slane %v180_v27, %v3954_v26  ;;  %v191_v30 = vrot.slane %v180_v27, %v3957_v28  ;;  %v198_v37 = vsub.s32 3, %v3951_v25  ;;  %v195_v38 = vrot.slane %v180_v27, %v194_v35 }
  0x95   :  { %v219_v43 = vrot.slane %v3963_v40, %v3954_v26  ;;  %v203_v57 = vrot.slane %v180_v27, %v202_v48  ;;  %v207_v60 = vrot.slane %v180_v27, %v206_v51  ;;  %v211_v8 = vrot.slane %v180_v27, %v210_v2 }
  0x96   :  { %2890 = vmatpush3.bf16.msra.mxu0 %v3901_v54  ;;  %v199_v41 = vrot.slane %v180_v27, %v198_v37  ;;  %v215_v11 = vrot.slane %v180_v27, %v214_v5 }
  0x97   :  { %2858 = vmatpush1.bf16.msra.mxu1 %v2857_v45  ;;  %2892 = vmatprep.subr.bf16.mxu0 %v3918_v62 }
  0x98   :  { %2868 = vmatprep.subr.bf16.mxu1 %v2867_v49  ;;  %v223_v49 = vrot.slane %v3963_v40, %v3957_v28 }
  0x9a   :  { %2491 = vmatmul.mubr.msk.f32.vlgmr.msra.gmra.mrb[8].mxu1 %vm264_vm0, %v3862_v20 }
  0x9b   :  { %2870 = vmatpush1.bf16.msra.mxu1 %v2869_v55  ;;  %829 = vmatprep.mubr.f32.mxu1 %v3717_v0 }
  0x9c   :  { %2872 = vmatprep.subr.bf16.mxu1 %v2871_v56 }
  0x9f   :  { %2874 = vmatpush1.bf16.msra.mxu1 %v2873_v59 }
  0xa0   :  { %2908 = vmatprep.subr.bf16.mxu1 %v3873_v14 }
  0xa2   :  { %2493 = vmatmul.mubr.msk.f32.vlgmr.msra.gmra.mrb[10].mxu1 %vm264_vm0, %v3862_v20  ;;  %v875_v20 = vld [vmem:[#allocation8 + $0x48] sm:$0xff] }
  0xa3   :  { %2910 = vmatpush3.bf16.msra.mxu1 %v3877_v19  ;;  %v3920_v1 = vpack.c.bf16 %v875_v20, %v874_v63 }
  0xa4   :  { %2912 = vmatprep.subr.bf16.mxu1 %v3880_v22 }
  0xa5   :  { %2894 = vmatpush3.bf16.msra.mxu0 %v3920_v1 }
  0xa6   :  { %2896 = vmatprep.subr.bf16.mxu0 %v3926_v4 }
  0xa7   :  { %2914 = vmatpush3.bf16.msra.mxu1 %v3886_v32 }
  0xa8   :  { %2916 = vmatprep.subr.bf16.mxu1 %v3889_v39 }
  0xa9   :  { %2898 = vmatpush3.bf16.msra.mxu0 %v3928_v7 }
  0xaa   :  { %2900 = vmatprep.subr.bf16.mxu0 %v3934_v10 }
  0xab   :  { %2918 = vmatpush3.bf16.msra.mxu1 %v3894_v44 }
  0xac   :  { %2920 = vmatprep.subr.bf16.mxu1 %v3897_v46 }
  0xad   :  { %2902 = vmatpush3.bf16.msra.mxu0 %v3936_v13 }
  0xae   :  { %2904 = vmatprep.subr.bf16.mxu0 %v3942_v17 }
  0xaf   :  { %2922 = vmatpush3.bf16.msra.mxu1 %v3901_v54 }
  0xb0   :  { %2924 = vmatprep.subr.bf16.mxu1 %v3918_v62 }
  0xb1   :  { %2906 = vmatpush3.bf16.msra.mxu0 %v3944_v23 }
  0xb3   :  { %2926 = vmatpush3.bf16.msra.mxu1 %v3920_v1 }
  0xb4   :  { %2928 = vmatprep.subr.bf16.mxu1 %v3926_v4 }
  0xb7   :  { %2930 = vmatpush3.bf16.msra.mxu1 %v3928_v7 }
  0xb8   :  { %2932 = vmatprep.subr.bf16.mxu1 %v3934_v10 }
  0xbb   :  { %2934 = vmatpush3.bf16.msra.mxu1 %v3936_v13 }
  0xbc   :  { %2936 = vmatprep.subr.bf16.mxu1 %v3942_v17 }
  0xbf   :  { %2938 = vmatpush3.bf16.msra.mxu1 %v3944_v23 }
  0xc0   :  { %3004 = vmatprep.subr.bf16.mxu1 %v3873_v14 }
 0x14d   :  { %v334_v31 = vpop.f32.mrb[0].mxu1 }
 0x14e   :  { %v335_v33 = vadd.f32 %v334_v31, %v187_v29  ;;  %v336_v34 = vpop.f32.mrb[1].mxu1  ;;  %v227_v29 = vrot.slane %v3963_v40, %v194_v35  ;;  %v231_v31 = vrot.slane %v3963_v40, %v198_v37  ;;  %v235_v37 = vrot.slane %v3963_v40, %v202_v48 }
 0x14f   :  { %v337_v36 = vadd.f32 %v336_v34, %v191_v30 }
 0x150   :  { %3448 = vtanh.f32 %v335_v33 }
 0x151   :  { %3450 = vtanh.f32 %v337_v36 }
 0x154   :  { %v618_v52 = vpop.f32.mrb[0].mxu0 }
 0x155   :  { %v405_v42 = vpop.f32.mrb[2].mxu1  ;;  %v619_v53 = vadd.f32 %v618_v52, %v219_v43  ;;  %v620_v55 = vpop.f32.mrb[1].mxu0 }
 0x156   :  { %v406_v45 = vadd.f32 %v405_v42, %v195_v38  ;;  %v407_v47 = vpop.f32.mrb[3].mxu1  ;;  %v621_v58 = vadd.f32 %v620_v55, %v223_v49 }
 0x157   :  { %v408_v50 = vadd.f32 %v407_v47, %v199_v41 }
 0x158   :  { %3452 = vtanh.f32 %v406_v45  ;;  %v239_v45 = vrot.slane %v3963_v40, %v206_v51 }
 0x159   :  { %3454 = vtanh.f32 %v408_v50 }
 0x15a   :  { %v3449_v56 = vpop.eup %3448  ;;  %3456 = vtanh.f32 %v619_v53  ;;  %v243_v53 = vrot.slane %v3963_v40, %v210_v2  ;;  %v1086_v2 = vld [vmem:[#allocation10 + $0x128] sm:$0xff] }
 0x15b   :  { %v3451_v59 = vpop.eup %3450  ;;  %3458 = vtanh.f32 %v621_v58 }
 0x15c   :  { %852 = vst [vmem:[#allocation16] sm:$0xff] %v3451_v59  ;;  %969 = vmatprep.mubr.f32.mxu0 %v3451_v59  ;;  %v760_v42 = vpop.f32.mrb[2].mxu0  ;;  %v1082_v59 = vld [vmem:[#allocation10 + $0x108] sm:$0xff] }
 0x15d   :  { %970 = vmatmul.mubr.f32.vlgmr.msra.gmra.mrb[4].mxu0 %v3449_v56  ;;  %v476_v61 = vpop.f32.mrb[4].mxu1  ;;  %v761_v43 = vadd.f32 %v760_v42, %v235_v37  ;;  %v762_v47 = vpop.f32.mrb[3].mxu0  ;;  %v1097_v42 = vld [vmem:[#allocation10 + $0x180] sm:$0xff] }
 0x15e   :  { %v477_v63 = vadd.f32 %v476_v61, %v203_v57  ;;  %v478_v20 = vpop.f32.mrb[5].mxu1  ;;  %1177 = vmatprep.mubr.f32.mxu0 %v3717_v0  ;;  %v763_v49 = vadd.f32 %v762_v47, %v239_v45  ;;  %v1081_v61 = vld [vmem:[#allocation10 + $0x100] sm:$0xff]  ;;  %v1102_v47 = vld [vmem:[#allocation10 + $0x1a8] sm:$0xff] }
 0x15f   :  { %v479_v3 = vadd.f32 %v478_v20, %v207_v60  ;;  %v1084_v60 = vld [vmem:[#allocation10 + $0x118] sm:$0xff]  ;;  %v1083_v20 = vld [vmem:[#allocation10 + $0x110] sm:$0xff] }
 0x160   :  { %3460 = vtanh.f32 %v477_v63  ;;  %v2939_v63 = vpack.c.bf16 %v1084_v60, %v1082_v59  ;;  %v1106_v60 = vld [vmem:[#allocation10 + $0x1c8] sm:$0xff] }
 0x161   :  { %3462 = vtanh.f32 %v479_v3  ;;  %v1088_v3 = vld [vmem:[#allocation10 + $0x138] sm:$0xff] }
 0x162   :  { %v3453_v6 = vpop.eup %3452  ;;  %2940 = vmatprep.subr.bf16.mxu0 %v2939_v63 }
 0x163   :  { %v3455_v9 = vpop.eup %3454  ;;  %853 = vst [vmem:[#allocation16 + $0x8] sm:$0xff] %v3453_v6 }
 0x164   :  { %854 = vst [vmem:[#allocation16 + $0x10] sm:$0xff] %v3455_v9  ;;  %1073 = vmatprep.mubr.f32.mxu1 %v3455_v9  ;;  %v3984_v12 = vpop.eup %3456  ;;  %v1085_v9 = vld [vmem:[#allocation10 + $0x120] sm:$0xff] }
 0x165   :  { %1074 = vmatmul.mubr.f32.vlgmr.msra.gmra.mrb[12].mxu1 %v3453_v6  ;;  %v547_v15 = vpop.f32.mrb[6].mxu1  ;;  %v3986_v16 = vpop.eup %3458  ;;  %859 = vst [vmem:[#allocation16 + $0x38] sm:$0xff] %v3984_v12  ;;  %v2941_v6 = vpack.c.bf16 %v1083_v20, %v1081_v61  ;;  %v1108_v61 = vld [vmem:[#allocation10 + $0x1d8] sm:$0xff]  ;;  %v1105_v20 = vld [vmem:[#allocation10 + $0x1c0] sm:$0xff] }
 0x166   :  { %3006 = vmatpush3.bf16.msra.mxu1 %v3877_v19  ;;  %v548_v18 = vadd.f32 %v547_v15, %v211_v8  ;;  %v549_v21 = vpop.f32.mrb[7].mxu1  ;;  %860 = vst [vmem:[#allocation16 + $0x40] sm:$0xff] %v3986_v16  ;;  %v2943_v8 = vpack.c.bf16 %v1088_v3, %v1086_v2  ;;  %v2963_v63 = vpack.c.bf16 %v1108_v61, %v1106_v60  ;;  %v1107_v2 = vld [vmem:[#allocation10 + $0x1d0] sm:$0xff]  ;;  %v1002_v60 = vld [vmem:[#allocation10 + $0xc8] sm:$0xff]  ;;  %v1004_v61 = vld [vmem:[#allocation10 + $0xd8] sm:$0xff] }
 0x167   :  { %3008 = vmatprep.subr.bf16.mxu1 %v3880_v22  ;;  %v550_v24 = vadd.f32 %v549_v21, %v215_v11  ;;  %v1087_v11 = vld [vmem:[#allocation10 + $0x130] sm:$0xff]  ;;  %2942 = vmatpush1.bf16.msra.mxu0 %v2941_v6  ;;  %v2965_v3 = vpack.c.bf16 %v1107_v2, %v1105_v20  ;;  %v1110_v6 = vld [vmem:[#allocation10 + $0x1e8] sm:$0xff] }
 0x168   :  { %3464 = vtanh.f32 %v548_v18  ;;  %v2945_v15 = vpack.c.bf16 %v1087_v11, %v1085_v9  ;;  %2944 = vmatprep.subr.bf16.mxu0 %v2943_v8  ;;  %v1092_v18 = vld [vmem:[#allocation10 + $0x158] sm:$0xff]  ;;  %v1109_v11 = vld [vmem:[#allocation10 + $0x1e0] sm:$0xff] }
 0x169   :  { %3466 = vtanh.f32 %v550_v24  ;;  %v1089_v24 = vld [vmem:[#allocation10 + $0x140] sm:$0xff]  ;;  %v1112_v8 = vld [vmem:[#allocation10 + $0x1f8] sm:$0xff] }
 0x16a   :  { %v3461_v27 = vpop.eup %3460  ;;  %3010 = vmatpush3.bf16.msra.mxu1 %v3886_v32  ;;  %v2967_v9 = vpack.c.bf16 %v1112_v8, %v1110_v6  ;;  %v2995_v6 = vpack.c.bf16 %v1004_v61, %v1002_v60  ;;  %v1001_v8 = vld [vmem:[#allocation10 + $0xc0] sm:$0xff]  ;;  %v1353_v61 = vld [vmem:[#allocation10 + $0x2d0] sm:$0xff] }
 0x16b   :  { %v3463_v30 = vpop.eup %3462  ;;  %3012 = vmatprep.subr.bf16.mxu1 %v3889_v39  ;;  %855 = vst [vmem:[#allocation16 + $0x18] sm:$0xff] %v3461_v27  ;;  %2946 = vmatpush1.bf16.msra.mxu0 %v2945_v15  ;;  %v1111_v15 = vld [vmem:[#allocation10 + $0x1f0] sm:$0xff]  ;;  %v1351_v60 = vld [vmem:[#allocation10 + $0x2c0] sm:$0xff] }
 0x16c   :  { %856 = vst [vmem:[#allocation16 + $0x20] sm:$0xff] %v3463_v30  ;;  %1319 = vmatprep.mubr.f32.mxu1 %v3463_v30  ;;  %v1094_v30 = vld [vmem:[#allocation10 + $0x168] sm:$0xff] }
 0x16d   :  { %v689_v33 = vpop.f32.mrb[8].mxu1 }
 0x16e   :  { %3014 = vmatpush3.bf16.msra.mxu1 %v3894_v44  ;;  %v690_v34 = vadd.f32 %v689_v33, %v227_v29  ;;  %v691_v36 = vpop.f32.mrb[9].mxu1 }
 0x16f   :  { %3016 = vmatprep.subr.bf16.mxu1 %v3897_v46  ;;  %v692_v38 = vadd.f32 %v691_v36, %v231_v31  ;;  %v1096_v31 = vld [vmem:[#allocation10 + $0x178] sm:$0xff]  ;;  %v1095_v36 = vld [vmem:[#allocation10 + $0x170] sm:$0xff] }
 0x170   :  { %3468 = vtanh.f32 %v690_v34  ;;  %v2951_v33 = vpack.c.bf16 %v1096_v31, %v1094_v30  ;;  %v1093_v34 = vld [vmem:[#allocation10 + $0x160] sm:$0xff]  ;;  %v990_v30 = vld [vmem:[#allocation10 + $0x68] sm:$0xff]  ;;  %v992_v31 = vld [vmem:[#allocation10 + $0x78] sm:$0xff] }
 0x171   :  { %3470 = vtanh.f32 %v692_v38  ;;  %v2953_v38 = vpack.c.bf16 %v1095_v36, %v1093_v34  ;;  %v2983_v34 = vpack.c.bf16 %v992_v31, %v990_v30  ;;  %v989_v36 = vld [vmem:[#allocation10 + $0x60] sm:$0xff]  ;;  %v1344_v30 = vld [vmem:[#allocation10 + $0x288] sm:$0xff] }
 0x172   :  { %v3465_v35 = vpop.eup %3464  ;;  %3018 = vmatpush3.bf16.msra.mxu1 %v3901_v54  ;;  %3472 = vtanh.f32 %v761_v43  ;;  %v1099_v43 = vld [vmem:[#allocation10 + $0x190] sm:$0xff] }
 0x173   :  { %v3467_v41 = vpop.eup %3466  ;;  %3020 = vmatprep.subr.bf16.mxu1 %v3918_v62  ;;  %857 = vst [vmem:[#allocation16 + $0x28] sm:$0xff] %v3465_v35  ;;  %3474 = vtanh.f32 %v763_v49  ;;  %v2957_v45 = vpack.c.bf16 %v1099_v43, %v1097_v42  ;;  %v1104_v49 = vld [vmem:[#allocation10 + $0x1b8] sm:$0xff]  ;;  %v993_v43 = vld [vmem:[#allocation10 + $0x80] sm:$0xff] }
 0x174   :  { %858 = vst [vmem:[#allocation16 + $0x30] sm:$0xff] %v3467_v41 }
 0x175   :  { %v831_v55 = vpop.f32.mrb[10].mxu1 }
 0x176   :  { %3022 = vmatpush3.bf16.msra.mxu1 %v3920_v1  ;;  %v4039_v56 = vpop.f32.mrb[11].mxu1  ;;  %v832_v57 = vadd.f32 %v831_v55, %v243_v53  ;;  %v2959_v53 = vpack.c.bf16 %v1104_v49, %v1102_v47  ;;  %v1101_v55 = vld [vmem:[#allocation10 + $0x1a0] sm:$0xff]  ;;  %v998_v47 = vld [vmem:[#allocation10 + $0xa8] sm:$0xff]  ;;  %v1000_v49 = vld [vmem:[#allocation10 + $0xb8] sm:$0xff] }
 0x177   :  { %3024 = vmatprep.subr.bf16.mxu1 %v3926_v4 }
 0x178   :  { %3476 = vtanh.f32 %v832_v57  ;;  %v1103_v57 = vld [vmem:[#allocation10 + $0x1b0] sm:$0xff] }
 0x179   :  { %v2961_v59 = vpack.c.bf16 %v1103_v57, %v1101_v55  ;;  %v2991_v55 = vpack.c.bf16 %v1000_v49, %v998_v47  ;;  %v997_v57 = vld [vmem:[#allocation10 + $0xa0] sm:$0xff]  ;;  %v1354_v47 = vld [vmem:[#allocation10 + $0x2d8] sm:$0xff] }
 0x17a   :  { %v4010_v50 = vpop.eup %3468  ;;  %3026 = vmatpush3.bf16.msra.mxu1 %v3928_v7 }
 0x17b   :  { %v4013_v48 = vpop.eup %3470  ;;  %3028 = vmatprep.subr.bf16.mxu1 %v3934_v10  ;;  %861 = vst [vmem:[#allocation16 + $0x48] sm:$0xff] %v4010_v50 }
 0x17c   :  { %862 = vst [vmem:[#allocation16 + $0x50] sm:$0xff] %v4013_v48  ;;  %v4020_v51 = vpop.eup %3472 }
 0x17d   :  { %863 = vst [vmem:[#allocation16 + $0x58] sm:$0xff] %v4020_v51  ;;  %v4025_v52 = vpop.eup %3474 }
 0x17e   :  { %3030 = vmatpush3.bf16.msra.mxu1 %v3936_v13  ;;  %864 = vst [vmem:[#allocation16 + $0x60] sm:$0xff] %v4025_v52 }
 0x17f   :  { %3032 = vmatprep.subr.bf16.mxu1 %v3942_v17 }
 0x182   :  { %3034 = vmatpush3.bf16.msra.mxu1 %v3944_v23  ;;  %v4047_v58 = vpop.eup %3476 }
 0x183   :  { %3068 = vmatprep.subr.bf16.mxu1 %v3873_v14  ;;  %865 = vst [vmem:[#allocation16 + $0x68] sm:$0xff] %v4047_v58 }
 0x185   :  { %1320 = vmatmul.mubr.f32.vlgmr.msra.gmra.mrb[14].mxu1 %v3461_v27  ;;  %v1091_v27 = vld [vmem:[#allocation10 + $0x150] sm:$0xff] }
 0x186   :  { %3070 = vmatpush3.bf16.msra.mxu1 %v3877_v19  ;;  %1496 = vmatprep.mubr.f32.mxu1 %v3467_v41  ;;  %v2949_v29 = vpack.c.bf16 %v1091_v27, %v1089_v24  ;;  %v1100_v41 = vld [vmem:[#allocation10 + $0x198] sm:$0xff]  ;;  %v985_v27 = vld [vmem:[#allocation10 + $0x40] sm:$0xff] }
 0x187   :  { %3072 = vmatprep.subr.bf16.mxu1 %v3880_v22 }
 0x18a   :  { %3074 = vmatpush3.bf16.msra.mxu1 %v3886_v32 }
 0x18b   :  { %3076 = vmatprep.subr.bf16.mxu1 %v3889_v39 }
 0x18e   :  { %3078 = vmatpush3.bf16.msra.mxu1 %v3894_v44 }
 0x18f   :  { %3080 = vmatprep.subr.bf16.mxu1 %v3897_v46 }
 0x192   :  { %3082 = vmatpush3.bf16.msra.mxu1 %v3901_v54 }
 0x193   :  { %3084 = vmatprep.subr.bf16.mxu1 %v3918_v62 }
 0x196   :  { %3086 = vmatpush3.bf16.msra.mxu1 %v3920_v1 }
 0x197   :  { %3088 = vmatprep.subr.bf16.mxu1 %v3926_v4 }
 0x19a   :  { %3090 = vmatpush3.bf16.msra.mxu1 %v3928_v7 }
 0x19b   :  { %3092 = vmatprep.subr.bf16.mxu1 %v3934_v10 }
 0x19e   :  { %3094 = vmatpush3.bf16.msra.mxu1 %v3936_v13 }
 0x19f   :  { %3096 = vmatprep.subr.bf16.mxu1 %v3942_v17 }
 0x1a2   :  { %3098 = vmatpush3.bf16.msra.mxu1 %v3944_v23 }
 0x1a3   :  { %3132 = vmatprep.subr.bf16.mxu1 %v3873_v14 }
 0x1a5   :  { %1497 = vmatmul.mubr.f32.vlgmr.msra.gmra.mrb[16].mxu1 %v3465_v35  ;;  %v1098_v35 = vld [vmem:[#allocation10 + $0x188] sm:$0xff] }
 0x1a6   :  { %3134 = vmatpush3.bf16.msra.mxu1 %v3877_v19  ;;  %1673 = vmatprep.mubr.f32.mxu1 %v3986_v16  ;;  %v1090_v16 = vld [vmem:[#allocation10 + $0x148] sm:$0xff]  ;;  %v2955_v37 = vpack.c.bf16 %v1100_v41, %v1098_v35  ;;  %v996_v41 = vld [vmem:[#allocation10 + $0x98] sm:$0xff] }
 0x1a7   :  { %3136 = vmatprep.subr.bf16.mxu1 %v3880_v22  ;;  %v2947_v21 = vpack.c.bf16 %v1092_v18, %v1090_v16  ;;  %v2969_v16 = vpack.c.bf16 %v1111_v15, %v1109_v11  ;;  %v978_v18 = vld [vmem:[#allocation10 + $0x8] sm:$0xff]  ;;  %v1008_v15 = vld [vmem:[#allocation10 + $0xf8] sm:$0xff] }
 0x1a8   :  { %v994_v35 = vld [vmem:[#allocation10 + $0x88] sm:$0xff] }
 0x1a9   :  { %2948 = vmatprep.subr.bf16.mxu0 %v2947_v21  ;;  %v980_v21 = vld [vmem:[#allocation10 + $0x18] sm:$0xff]  ;;  %v2987_v42 = vpack.c.bf16 %v996_v41, %v994_v35  ;;  %v1006_v11 = vld [vmem:[#allocation10 + $0xe8] sm:$0xff] }
 0x1aa   :  { %3138 = vmatpush3.bf16.msra.mxu1 %v3886_v32  ;;  %2950 = vmatpush1.bf16.msra.mxu0 %v2949_v29  ;;  %v2971_v24 = vpack.c.bf16 %v980_v21, %v978_v18  ;;  %v987_v29 = vld [vmem:[#allocation10 + $0x50] sm:$0xff]  ;;  %v2999_v21 = vpack.c.bf16 %v1008_v15, %v1006_v11  ;;  %v1350_v35 = vld [vmem:[#allocation10 + $0x2b8] sm:$0xff]  ;;  %v1505_v11 = vld [vmem:[#allocation10 + $0x308] sm:$0xff] }
 0x1ab   :  { %3140 = vmatprep.subr.bf16.mxu1 %v3889_v39  ;;  %2952 = vmatprep.subr.bf16.mxu0 %v2951_v33  ;;  %v2981_v33 = vpack.c.bf16 %v987_v29, %v985_v27  ;;  %v1339_v27 = vld [vmem:[#allocation10 + $0x260] sm:$0xff]  ;;  %v1341_v29 = vld [vmem:[#allocation10 + $0x270] sm:$0xff]  ;;  %v1507_v15 = vld [vmem:[#allocation10 + $0x318] sm:$0xff] }
 0x1ac   :  { %v3049_v31 = vpack.c.bf16 %v1341_v29, %v1339_v27  ;;  %v1522_v27 = vld [vmem:[#allocation10 + $0x390] sm:$0xff]  ;;  %v1525_v29 = vld [vmem:[#allocation10 + $0x3a8] sm:$0xff] }
 0x1ae   :  { %3142 = vmatpush3.bf16.msra.mxu1 %v3894_v44  ;;  %2954 = vmatpush1.bf16.msra.mxu0 %v2953_v38  ;;  %v991_v38 = vld [vmem:[#allocation10 + $0x70] sm:$0xff] }
 0x1af   :  { %3144 = vmatprep.subr.bf16.mxu1 %v3897_v46  ;;  %2956 = vmatprep.subr.bf16.mxu0 %v2955_v37  ;;  %v2985_v37 = vpack.c.bf16 %v991_v38, %v989_v36  ;;  %v1345_v36 = vld [vmem:[#allocation10 + $0x290] sm:$0xff]  ;;  %v1348_v38 = vld [vmem:[#allocation10 + $0x2a8] sm:$0xff] }
 0x1b2   :  { %3146 = vmatpush3.bf16.msra.mxu1 %v3901_v54  ;;  %2958 = vmatpush1.bf16.msra.mxu0 %v2957_v45  ;;  %v995_v45 = vld [vmem:[#allocation10 + $0x90] sm:$0xff] }
 0x1b3   :  { %3148 = vmatprep.subr.bf16.mxu1 %v3918_v62  ;;  %2960 = vmatprep.subr.bf16.mxu0 %v2959_v53  ;;  %v2989_v53 = vpack.c.bf16 %v995_v45, %v993_v43  ;;  %v1349_v43 = vld [vmem:[#allocation10 + $0x2b0] sm:$0xff]  ;;  %v1352_v45 = vld [vmem:[#allocation10 + $0x2c8] sm:$0xff] }
 0x1b6   :  { %3150 = vmatpush3.bf16.msra.mxu1 %v3920_v1  ;;  %2962 = vmatpush1.bf16.msra.mxu0 %v2961_v59  ;;  %v999_v59 = vld [vmem:[#allocation10 + $0xb0] sm:$0xff] }
 0x1b7   :  { %3152 = vmatprep.subr.bf16.mxu1 %v3926_v4  ;;  %2964 = vmatprep.subr.bf16.mxu0 %v2963_v63  ;;  %v2993_v2 = vpack.c.bf16 %v999_v59, %v997_v57  ;;  %v3059_v59 = vpack.c.bf16 %v1354_v47, %v1352_v45  ;;  %v1528_v45 = vld [vmem:[#allocation10 + $0x3c0] sm:$0xff]  ;;  %v1530_v47 = vld [vmem:[#allocation10 + $0x3d0] sm:$0xff] }
 0x1ba   :  { %3154 = vmatpush3.bf16.msra.mxu1 %v3928_v7  ;;  %2966 = vmatpush1.bf16.msra.mxu0 %v2965_v3 }
 0x1bb   :  { %3156 = vmatprep.subr.bf16.mxu1 %v3934_v10  ;;  %2968 = vmatprep.subr.bf16.mxu0 %v2967_v9  ;;  %v1003_v9 = vld [vmem:[#allocation10 + $0xd0] sm:$0xff] }
 0x1bc   :  { %v2997_v18 = vpack.c.bf16 %v1003_v9, %v1001_v8  ;;  %v1355_v8 = vld [vmem:[#allocation10 + $0x2e0] sm:$0xff]  ;;  %v1357_v9 = vld [vmem:[#allocation10 + $0x2f0] sm:$0xff] }
 0x1be   :  { %3158 = vmatpush3.bf16.msra.mxu1 %v3936_v13  ;;  %2970 = vmatpush1.bf16.msra.mxu0 %v2969_v16 }
 0x1bf   :  { %3160 = vmatprep.subr.bf16.mxu1 %v3942_v17  ;;  %2972 = vmatprep.subr.bf16.mxu0 %v2971_v24  ;;  %v1005_v24 = vld [vmem:[#allocation10 + $0xe0] sm:$0xff] }
 0x1c2   :  { %3162 = vmatpush3.bf16.msra.mxu1 %v3944_v23 }
 0x1c3   :  { %3196 = vmatprep.subr.bf16.mxu1 %v3873_v14 }
 0x1c5   :  { %1674 = vmatmul.mubr.f32.vlgmr.msra.gmra.mrb[18].mxu1 %v3984_v12  ;;  %v247_v12 = vrot.slane %v3963_v40, %v214_v5  ;;  %v981_v40 = vld [vmem:[#allocation10 + $0x20] sm:$0xff]  ;;  %v983_v5 = vld [vmem:[#allocation10 + $0x30] sm:$0xff] }
 0x1c6   :  { %3198 = vmatpush3.bf16.msra.mxu1 %v3877_v19  ;;  %1850 = vmatprep.mubr.f32.mxu1 %v4013_v48 }
 0x1c7   :  { %3200 = vmatprep.subr.bf16.mxu1 %v3880_v22 }
 0x1ca   :  { %3202 = vmatpush3.bf16.msra.mxu1 %v3886_v32 }
 0x1cb   :  { %3204 = vmatprep.subr.bf16.mxu1 %v3889_v39 }
 0x1ce   :  { %3206 = vmatpush3.bf16.msra.mxu1 %v3894_v44 }
 0x1cf   :  { %3208 = vmatprep.subr.bf16.mxu1 %v3897_v46 }
 0x1d2   :  { %3210 = vmatpush3.bf16.msra.mxu1 %v3901_v54 }
 0x1d3   :  { %3212 = vmatprep.subr.bf16.mxu1 %v3918_v62 }
 0x1d6   :  { %3214 = vmatpush3.bf16.msra.mxu1 %v3920_v1 }
 0x1d7   :  { %3216 = vmatprep.subr.bf16.mxu1 %v3926_v4 }
 0x1da   :  { %3218 = vmatpush3.bf16.msra.mxu1 %v3928_v7 }
 0x1db   :  { %3220 = vmatprep.subr.bf16.mxu1 %v3934_v10 }
 0x1de   :  { %3222 = vmatpush3.bf16.msra.mxu1 %v3936_v13 }
 0x1df   :  { %3224 = vmatprep.subr.bf16.mxu1 %v3942_v17 }
 0x1e2   :  { %3226 = vmatpush3.bf16.msra.mxu1 %v3944_v23 }
 0x1e3   :  { %3260 = vmatprep.subr.bf16.mxu1 %v3873_v14 }
 0x1e5   :  { %1851 = vmatmul.mubr.f32.vlgmr.msra.gmra.mrb[20].mxu1 %v4010_v50  ;;  %v834_v50 = vadd.f32 %v4039_v56, %v247_v12  ;;  %v2977_v56 = vpack.c.bf16 %v983_v5, %v981_v40  ;;  %v1007_v12 = vld [vmem:[#allocation10 + $0xf0] sm:$0xff]  ;;  %v1335_v5 = vld [vmem:[#allocation10 + $0x240] sm:$0xff] }
 0x1e6   :  { %3262 = vmatpush3.bf16.msra.mxu1 %v3877_v19  ;;  %2027 = vmatprep.mubr.f32.mxu1 %v4025_v52  ;;  %v988_v52 = vld [vmem:[#allocation10 + $0x58] sm:$0xff] }
 0x1e7   :  { %3264 = vmatprep.subr.bf16.mxu1 %v3880_v22  ;;  %3478 = vtanh.f32 %v834_v50  ;;  %v1328_v50 = vld [vmem:[#allocation10 + $0x208] sm:$0xff] }
 0x1ea   :  { %3266 = vmatpush3.bf16.msra.mxu1 %v3886_v32 }
 0x1eb   :  { %3268 = vmatprep.subr.bf16.mxu1 %v3889_v39 }
 0x1ee   :  { %3270 = vmatpush3.bf16.msra.mxu1 %v3894_v44 }
 0x1ef   :  { %3272 = vmatprep.subr.bf16.mxu1 %v3897_v46 }
 0x1f1   :  { %v3479_v25 = vpop.eup %3478 }
 0x1f2   :  { %3274 = vmatpush3.bf16.msra.mxu1 %v3901_v54 }
 0x1f3   :  { %3276 = vmatprep.subr.bf16.mxu1 %v3918_v62 }
 0x1f6   :  { %3278 = vmatpush3.bf16.msra.mxu1 %v3920_v1 }
 0x1f7   :  { %3280 = vmatprep.subr.bf16.mxu1 %v3926_v4 }
 0x1fa   :  { %3282 = vmatpush3.bf16.msra.mxu1 %v3928_v7 }
 0x1fb   :  { %3284 = vmatprep.subr.bf16.mxu1 %v3934_v10 }
 0x1fe   :  { %3286 = vmatpush3.bf16.msra.mxu1 %v3936_v13 }
 0x1ff   :  { %3288 = vmatprep.subr.bf16.mxu1 %v3942_v17 }
 0x202   :  { %3290 = vmatpush3.bf16.msra.mxu1 %v3944_v23 }
 0x203   :  { %3324 = vmatprep.subr.bf16.mxu1 %v3873_v14 }
 0x205   :  { %2028 = vmatmul.mubr.f32.vlgmr.msra.gmra.mrb[22].mxu1 %v4020_v51  ;;  %v986_v51 = vld [vmem:[#allocation10 + $0x48] sm:$0xff] }
 0x206   :  { %3326 = vmatpush3.bf16.msra.mxu1 %v3877_v19  ;;  %2204 = vmatprep.mubr.f32.mxu1 %v3479_v25  ;;  %v4129_v19 = vld [vmem:[%s4218_s4] ss:$0 sm:$0xff]  ;;  %v1330_v25 = vld [vmem:[#allocation10 + $0x218] sm:$0xff] }
 0x207   :  { %3328 = vmatprep.subr.bf16.mxu1 %v3880_v22 }
 0x20a   :  { %3330 = vmatpush3.bf16.msra.mxu1 %v3886_v32 }
 0x20b   :  { %3332 = vmatprep.subr.bf16.mxu1 %v3889_v39 }
 0x20e   :  { %3334 = vmatpush3.bf16.msra.mxu1 %v3894_v44 }
 0x20f   :  { %3336 = vmatprep.subr.bf16.mxu1 %v3897_v46 }
 0x212   :  { %3338 = vmatpush3.bf16.msra.mxu1 %v3901_v54 }
 0x213   :  { %3340 = vmatprep.subr.bf16.mxu1 %v3918_v62 }
 0x216   :  { %3342 = vmatpush3.bf16.msra.mxu1 %v3920_v1 }
 0x217   :  { %3344 = vmatprep.subr.bf16.mxu1 %v3926_v4  ;;  %v977_v4 = vld [vmem:[#allocation10] sm:$0xff] }
 0x21a   :  { %3346 = vmatpush3.bf16.msra.mxu1 %v3928_v7  ;;  %v979_v7 = vld [vmem:[#allocation10 + $0x10] sm:$0xff] }
 0x21b   :  { %3348 = vmatprep.subr.bf16.mxu1 %v3934_v10  ;;  %v982_v10 = vld [vmem:[#allocation10 + $0x28] sm:$0xff] }
 0x21e   :  { %3350 = vmatpush3.bf16.msra.mxu1 %v3936_v13  ;;  %v984_v13 = vld [vmem:[#allocation10 + $0x38] sm:$0xff] }
 0x21f   :  { %3352 = vmatprep.subr.bf16.mxu1 %v3942_v17  ;;  %v2973_v17 = vpack.c.bf16 %v979_v7, %v977_v4  ;;  %v1331_v4 = vld [vmem:[#allocation10 + $0x220] sm:$0xff]  ;;  %v1333_v7 = vld [vmem:[#allocation10 + $0x230] sm:$0xff] }
 0x222   :  { %3354 = vmatpush3.bf16.msra.mxu1 %v3944_v23  ;;  %v2975_v23 = vpack.c.bf16 %v984_v13, %v982_v10  ;;  %v1336_v13 = vld [vmem:[#allocation10 + $0x248] sm:$0xff] }
 0x225   :  { %2205 = vmatmul.mubr.f32.vlgmr.msra.gmra.mrb[24].mxu1 %v4047_v58  ;;  %v2979_v58 = vpack.c.bf16 %v988_v52, %v986_v51  ;;  %v1340_v51 = vld [vmem:[#allocation10 + $0x268] sm:$0xff]  ;;  %v1342_v52 = vld [vmem:[#allocation10 + $0x278] sm:$0xff] }
 0x230   :  { %v2528_v14 = vpop.f32.mrb[4].mxu0 }
 0x231   :  { %v2529_v22 = vpop.f32.mrb[5].mxu0 }
 0x232   :  { %v2530_v32 = vadd.f32 %v2529_v22, %v2528_v14  ;;  %v3001_v14 = vpack.c.bf16 %v1007_v12, %v1005_v24  ;;  %v3035_v22 = vpack.c.bf16 %v1330_v25, %v1328_v50  ;;  %v1506_v24 = vld [vmem:[#allocation10 + $0x310] sm:$0xff]  ;;  %v1509_v12 = vld [vmem:[#allocation10 + $0x328] sm:$0xff]  ;;  %v1511_v50 = vld [vmem:[#allocation10 + $0x338] sm:$0xff] }
 0x234   :  { %v972_v39 = vadd.f32 %v2530_v32, %v4129_v19  ;;  %v1327_v32 = vld [vmem:[#allocation10 + $0x200] sm:$0xff] }
 0x236   :  { %3480 = vtanh.f32 %v972_v39  ;;  %v1329_v39 = vld [vmem:[#allocation10 + $0x210] sm:$0xff] }
 0x238   :  { %v2563_v44 = vpop.f32.mrb[12].mxu1 }
 0x239   :  { %v2564_v46 = vpop.f32.mrb[13].mxu1 }
 0x23a   :  { %v2565_v54 = vadd.f32 %v2564_v46, %v2563_v44  ;;  %v1332_v44 = vld [vmem:[#allocation10 + $0x228] sm:$0xff]  ;;  %v1334_v46 = vld [vmem:[#allocation10 + $0x238] sm:$0xff] }
 0x23c   :  { %v1076_v62 = vadd.f32 %v2565_v54, %v4129_v19  ;;  %v3037_v54 = vpack.c.bf16 %v1329_v39, %v1327_v32  ;;  %v1510_v32 = vld [vmem:[#allocation10 + $0x330] sm:$0xff] }
 0x23e   :  { %3482 = vtanh.f32 %v1076_v62  ;;  %v3039_v62 = vpack.c.bf16 %v1334_v46, %v1332_v44  ;;  %v1513_v44 = vld [vmem:[#allocation10 + $0x348] sm:$0xff]  ;;  %v1515_v46 = vld [vmem:[#allocation10 + $0x358] sm:$0xff] }
 0x240   :  { %v4133_v1 = vpop.eup %3480 }
 0x241   :  { %976 = vst [vmem:[#allocation14] sm:$0xff] %v4133_v1 }
 0x248   :  { %v3483_v48 = vpop.eup %3482 }
 0x249   :  { %1080 = vst [vmem:[#allocation14 + $0x8] sm:$0xff] %v3483_v48  ;;  %1178 = vmatmul.mubr.f32.vlgmr.msra.gmra.mrb[6].mxu0 %v3483_v48  ;;  %v1337_v48 = vld [vmem:[#allocation10 + $0x250] sm:$0xff] }
 0x24a   :  { %2974 = vmatpush1.bf16.msra.mxu0 %v2973_v17  ;;  %1248 = vmatprep.mubr.f32.mxu0 %v3717_v0  ;;  %v1338_v17 = vld [vmem:[#allocation10 + $0x258] sm:$0xff] }
 0x24b   :  { %2976 = vmatprep.subr.bf16.mxu0 %v2975_v23  ;;  %v3041_v23 = vpack.c.bf16 %v1333_v7, %v1331_v4  ;;  %v3043_v40 = vpack.c.bf16 %v1338_v17, %v1336_v13  ;;  %v1512_v4 = vld [vmem:[#allocation10 + $0x340] sm:$0xff]  ;;  %v1514_v7 = vld [vmem:[#allocation10 + $0x350] sm:$0xff]  ;;  %v1517_v13 = vld [vmem:[#allocation10 + $0x368] sm:$0xff] }
 0x24c   :  { %v1519_v17 = vld [vmem:[#allocation10 + $0x378] sm:$0xff] }
 0x24e   :  { %2978 = vmatpush1.bf16.msra.mxu0 %v2977_v56  ;;  %v3045_v56 = vpack.c.bf16 %v1337_v48, %v1335_v5  ;;  %v1516_v5 = vld [vmem:[#allocation10 + $0x360] sm:$0xff]  ;;  %v1518_v48 = vld [vmem:[#allocation10 + $0x370] sm:$0xff] }
 0x24f   :  { %2980 = vmatprep.subr.bf16.mxu0 %v2979_v58  ;;  %v3047_v58 = vpack.c.bf16 %v1342_v52, %v1340_v51  ;;  %v1521_v51 = vld [vmem:[#allocation10 + $0x388] sm:$0xff]  ;;  %v3113_v52 = vpack.c.bf16 %v1518_v48, %v1516_v5  ;;  %v2351_v5 = vld [vmem:[#allocation11 + $0xa0] sm:$0xff] }
 0x250   :  { %v1694_v48 = vld [vmem:[#allocation10 + $0x468] sm:$0xff] }
 0x252   :  { %2982 = vmatpush1.bf16.msra.mxu0 %v2981_v33 }
 0x253   :  { %2984 = vmatprep.subr.bf16.mxu0 %v2983_v34  ;;  %v1343_v34 = vld [vmem:[#allocation10 + $0x280] sm:$0xff] }
 0x254   :  { %v3053_v41 = vpack.c.bf16 %v1345_v36, %v1343_v34  ;;  %v1526_v34 = vld [vmem:[#allocation10 + $0x3b0] sm:$0xff]  ;;  %v1529_v36 = vld [vmem:[#allocation10 + $0x3c8] sm:$0xff] }
 0x256   :  { %2986 = vmatpush1.bf16.msra.mxu0 %v2985_v37  ;;  %v3055_v37 = vpack.c.bf16 %v1350_v35, %v1348_v38  ;;  %v1531_v38 = vld [vmem:[#allocation10 + $0x3d8] sm:$0xff] }
 0x257   :  { %2988 = vmatprep.subr.bf16.mxu0 %v2987_v42  ;;  %v1347_v42 = vld [vmem:[#allocation10 + $0x2a0] sm:$0xff] }
 0x258   :  { %v2598_v63 = vpop.f32.mrb[14].mxu1 }
 0x259   :  { %v2599_v20 = vpop.f32.mrb[15].mxu1 }
 0x25a   :  { %2990 = vmatpush1.bf16.msra.mxu0 %v2989_v53  ;;  %v2600_v3 = vadd.f32 %v2599_v20, %v2598_v63  ;;  %v1356_v63 = vld [vmem:[#allocation10 + $0x2e8] sm:$0xff]  ;;  %v1358_v20 = vld [vmem:[#allocation10 + $0x2f8] sm:$0xff] }
 0x25b   :  { %2992 = vmatprep.subr.bf16.mxu0 %v2991_v55  ;;  %v3057_v55 = vpack.c.bf16 %v1349_v43, %v1347_v42  ;;  %v3123_v43 = vpack.c.bf16 %v1531_v38, %v1529_v36  ;;  %v1698_v36 = vld [vmem:[#allocation10 + $0x488] sm:$0xff]  ;;  %v1700_v38 = vld [vmem:[#allocation10 + $0x498] sm:$0xff] }
 0x25c   :  { %v1322_v16 = vadd.f32 %v2600_v3, %v4129_v19  ;;  %v3061_v3 = vpack.c.bf16 %v1353_v61, %v1351_v60  ;;  %v1532_v60 = vld [vmem:[#allocation10 + $0x3e0] sm:$0xff]  ;;  %v1534_v61 = vld [vmem:[#allocation10 + $0x3f0] sm:$0xff] }
 0x25e   :  { %2994 = vmatpush1.bf16.msra.mxu0 %v2993_v2  ;;  %3484 = vtanh.f32 %v1322_v16  ;;  %v3065_v16 = vpack.c.bf16 %v1357_v9, %v1355_v8  ;;  %v1683_v8 = vld [vmem:[#allocation10 + $0x410] sm:$0xff]  ;;  %v1686_v9 = vld [vmem:[#allocation10 + $0x428] sm:$0xff] }
 0x25f   :  { %2996 = vmatprep.subr.bf16.mxu0 %v2995_v6  ;;  %v3063_v6 = vpack.c.bf16 %v1358_v20, %v1356_v63  ;;  %v1682_v63 = vld [vmem:[#allocation10 + $0x408] sm:$0xff]  ;;  %v1684_v20 = vld [vmem:[#allocation10 + $0x418] sm:$0xff] }
 0x262   :  { %2998 = vmatpush1.bf16.msra.mxu0 %v2997_v18  ;;  %v3099_v18 = vpack.c.bf16 %v1507_v15, %v1505_v11  ;;  %v1688_v11 = vld [vmem:[#allocation10 + $0x438] sm:$0xff] }
 0x263   :  { %3000 = vmatprep.subr.bf16.mxu0 %v2999_v21  ;;  %v1504_v21 = vld [vmem:[#allocation10 + $0x300] sm:$0xff] }
 0x264   :  { %v3101_v25 = vpack.c.bf16 %v1506_v24, %v1504_v21  ;;  %v1687_v21 = vld [vmem:[#allocation10 + $0x430] sm:$0xff] }
 0x266   :  { %3002 = vmatpush1.bf16.msra.mxu0 %v3001_v14  ;;  %v3103_v14 = vpack.c.bf16 %v1511_v50, %v1509_v12  ;;  %v1690_v12 = vld [vmem:[#allocation10 + $0x448] sm:$0xff]  ;;  %v1692_v50 = vld [vmem:[#allocation10 + $0x458] sm:$0xff] }
 0x267   :  { %3036 = vmatprep.subr.bf16.mxu0 %v3035_v22  ;;  %v1508_v22 = vld [vmem:[#allocation10 + $0x320] sm:$0xff] }
 0x268   :  { %v4138_v10 = vpop.eup %3484 }
 0x269   :  { %1249 = vmatmul.mubr.f32.vlgmr.msra.gmra.mrb[6].mxu0 %v4133_v1  ;;  %1326 = vst [vmem:[#allocation14 + $0x10] sm:$0xff] %v4138_v10  ;;  %v1346_v1 = vld [vmem:[#allocation10 + $0x298] sm:$0xff] }
 0x26a   :  { %3038 = vmatpush1.bf16.msra.mxu0 %v3037_v54  ;;  %1423 = vmatprep.mubr.f32.mxu0 %v3717_v0  ;;  %v3051_v33 = vpack.c.bf16 %v1346_v1, %v1344_v30  ;;  %v3105_v54 = vpack.c.bf16 %v1510_v32, %v1508_v22  ;;  %v1527_v30 = vld [vmem:[#allocation10 + $0x3b8] sm:$0xff]  ;;  %v2347_v22 = vld [vmem:[#allocation11 + $0x80] sm:$0xff]  ;;  %v2348_v32 = vld [vmem:[#allocation11 + $0x88] sm:$0xff] }
 0x26b   :  { %3040 = vmatprep.subr.bf16.mxu0 %v3039_v62  ;;  %v3107_v62 = vpack.c.bf16 %v1515_v46, %v1513_v44  ;;  %v2331_v44 = vld [vmem:[#allocation11] sm:$0xff] }
 0x26e   :  { %3042 = vmatpush1.bf16.msra.mxu0 %v3041_v23  ;;  %v3109_v23 = vpack.c.bf16 %v1514_v7, %v1512_v4  ;;  %v2349_v4 = vld [vmem:[#allocation11 + $0x90] sm:$0xff]  ;;  %v2350_v7 = vld [vmem:[#allocation11 + $0x98] sm:$0xff] }
 0x26f   :  { %3044 = vmatprep.subr.bf16.mxu0 %v3043_v40  ;;  %v3111_v40 = vpack.c.bf16 %v1519_v17, %v1517_v13  ;;  %v3171_v13 = vpack.c.bf16 %v1692_v50, %v1690_v12 }
 0x272   :  { %3046 = vmatpush1.bf16.msra.mxu0 %v3045_v56 }
 0x273   :  { %3048 = vmatprep.subr.bf16.mxu0 %v3047_v58  ;;  %v1520_v58 = vld [vmem:[#allocation10 + $0x380] sm:$0xff] }
 0x274   :  { %v3117_v1 = vpack.c.bf16 %v1522_v27, %v1520_v58  ;;  %v1693_v58 = vld [vmem:[#allocation10 + $0x460] sm:$0xff] }
 0x276   :  { %3050 = vmatpush1.bf16.msra.mxu0 %v3049_v31  ;;  %v3119_v31 = vpack.c.bf16 %v1527_v30, %v1525_v29  ;;  %v2335_v29 = vld [vmem:[#allocation11 + $0x20] sm:$0xff]  ;;  %v2336_v30 = vld [vmem:[#allocation11 + $0x28] sm:$0xff] }
 0x277   :  { %3052 = vmatprep.subr.bf16.mxu0 %v3051_v33  ;;  %v1524_v33 = vld [vmem:[#allocation10 + $0x3a0] sm:$0xff] }
 0x278   :  { %v2633_v49 = vpop.f32.mrb[16].mxu1 }
 0x279   :  { %v2634_v53 = vpop.f32.mrb[17].mxu1 }
 0x27a   :  { %3054 = vmatpush1.bf16.msra.mxu0 %v3053_v41  ;;  %v2635_v57 = vadd.f32 %v2634_v53, %v2633_v49  ;;  %v1533_v49 = vld [vmem:[#allocation10 + $0x3e8] sm:$0xff]  ;;  %v1535_v53 = vld [vmem:[#allocation10 + $0x3f8] sm:$0xff] }
 0x27b   :  { %3056 = vmatprep.subr.bf16.mxu0 %v3055_v37  ;;  %v3121_v37 = vpack.c.bf16 %v1526_v34, %v1524_v33  ;;  %v2353_v33 = vld [vmem:[#allocation11 + $0xb0] sm:$0xff]  ;;  %v2354_v34 = vld [vmem:[#allocation11 + $0xb8] sm:$0xff] }
 0x27c   :  { %v1499_v2 = vadd.f32 %v2635_v57, %v4129_v19  ;;  %v3125_v57 = vpack.c.bf16 %v1530_v47, %v1528_v45  ;;  %v2338_v45 = vld [vmem:[#allocation11 + $0x38] sm:$0xff]  ;;  %v3179_v47 = vpack.c.bf16 %v1700_v38, %v1698_v36 }
 0x27e   :  { %3058 = vmatpush1.bf16.msra.mxu0 %v3057_v55  ;;  %3486 = vtanh.f32 %v1499_v2  ;;  %v3129_v2 = vpack.c.bf16 %v1534_v61, %v1532_v60 }
 0x27f   :  { %3060 = vmatprep.subr.bf16.mxu0 %v3059_v59  ;;  %v3127_v59 = vpack.c.bf16 %v1535_v53, %v1533_v49  ;;  %v1699_v49 = vld [vmem:[#allocation10 + $0x490] sm:$0xff]  ;;  %v2355_v53 = vld [vmem:[#allocation11 + $0xc0] sm:$0xff] }
 0x282   :  { %3062 = vmatpush1.bf16.msra.mxu0 %v3061_v3  ;;  %v3163_v3 = vpack.c.bf16 %v1684_v20, %v1682_v63  ;;  %v1701_v63 = vld [vmem:[#allocation10 + $0x4a0] sm:$0xff] }
 0x283   :  { %3064 = vmatprep.subr.bf16.mxu0 %v3063_v6  ;;  %v1681_v6 = vld [vmem:[#allocation10 + $0x400] sm:$0xff] }
 0x284   :  { %v3165_v15 = vpack.c.bf16 %v1683_v8, %v1681_v6  ;;  %v1703_v8 = vld [vmem:[#allocation10 + $0x4b0] sm:$0xff] }
 0x285   :  { %v3185_v50 = vpack.c.bf16 %v1703_v8, %v1701_v63  ;;  %v1872_v63 = vld [vmem:[#allocation10 + $0x570] sm:$0xff] }
 0x286   :  { %3066 = vmatpush1.bf16.msra.mxu0 %v3065_v16  ;;  %v3167_v16 = vpack.c.bf16 %v1688_v11, %v1686_v9  ;;  %v2357_v9 = vld [vmem:[#allocation11 + $0xd0] sm:$0xff]  ;;  %v2358_v11 = vld [vmem:[#allocation11 + $0xd8] sm:$0xff] }
 0x287   :  { %3100 = vmatprep.subr.bf16.mxu0 %v3099_v18  ;;  %v1685_v18 = vld [vmem:[#allocation10 + $0x420] sm:$0xff]  ;;  %v1876_v8 = vld [vmem:[#allocation10 + $0x590] sm:$0xff] }
 0x288   :  { %v4144_v39 = vpop.eup %3486  ;;  %v3169_v46 = vpack.c.bf16 %v1687_v21, %v1685_v18 }
 0x289   :  { %1424 = vmatmul.mubr.f32.vlgmr.msra.gmra.mrb[6].mxu0 %v4138_v10  ;;  %1503 = vst [vmem:[#allocation14 + $0x18] sm:$0xff] %v4144_v39  ;;  %v1523_v10 = vld [vmem:[#allocation10 + $0x398] sm:$0xff] }
 0x28a   :  { %3102 = vmatpush1.bf16.msra.mxu0 %v3101_v25  ;;  %1600 = vmatprep.mubr.f32.mxu0 %v3717_v0  ;;  %v3115_v56 = vpack.c.bf16 %v1523_v10, %v1521_v51  ;;  %v1689_v25 = vld [vmem:[#allocation10 + $0x440] sm:$0xff]  ;;  %v1696_v51 = vld [vmem:[#allocation10 + $0x478] sm:$0xff]  ;;  %v2352_v10 = vld [vmem:[#allocation11 + $0xa8] sm:$0xff] }
 0x28b   :  { %3104 = vmatprep.subr.bf16.mxu0 %v3103_v14  ;;  %v1691_v14 = vld [vmem:[#allocation10 + $0x450] sm:$0xff]  ;;  %v3395_v27 = vpack.c.bf16 %v2352_v10, %v2351_v5  ;;  %v2343_v5 = vld [vmem:[#allocation11 + $0x60] sm:$0xff] }
 0x28c   :  { %v1709_v10 = vld [vmem:[#allocation10 + $0x4e0] sm:$0xff] }
 0x28e   :  { %3106 = vmatpush1.bf16.msra.mxu0 %v3105_v54  ;;  %v3387_v54 = vpack.c.bf16 %v2348_v32, %v2347_v22  ;;  %v3407_v22 = vpack.c.bf16 %v2358_v11, %v2357_v9  ;;  %v2341_v32 = vld [vmem:[#allocation11 + $0x50] sm:$0xff]  ;;  %v1879_v9 = vld [vmem:[#allocation10 + $0x5a8] sm:$0xff]  ;;  %v1881_v11 = vld [vmem:[#allocation10 + $0x5b8] sm:$0xff] }
 0x28f   :  { %3108 = vmatprep.subr.bf16.mxu0 %v3107_v62  ;;  %v2332_v62 = vld [vmem:[#allocation11 + $0x8] sm:$0xff] }
 0x290   :  { %v3389_v17 = vpack.c.bf16 %v2332_v62, %v2331_v44  ;;  %3388 = vmatprep.subr.bf16.mxu1 %v3387_v54  ;;  %v2342_v44 = vld [vmem:[#allocation11 + $0x58] sm:$0xff]  ;;  %v1707_v54 = vld [vmem:[#allocation10 + $0x4d0] sm:$0xff]  ;;  %v2359_v62 = vld [vmem:[#allocation11 + $0xe0] sm:$0xff] }
 0x292   :  { %3110 = vmatpush1.bf16.msra.mxu0 %v3109_v23  ;;  %v3391_v23 = vpack.c.bf16 %v2350_v7, %v2349_v4  ;;  %3390 = vmatpush3.bf16.msra.mxu1 %v3389_v17  ;;  %v2360_v4 = vld [vmem:[#allocation11 + $0xe8] sm:$0xff] }
 0x293   :  { %3112 = vmatprep.subr.bf16.mxu0 %v3111_v40  ;;  %v2334_v40 = vld [vmem:[#allocation11 + $0x18] sm:$0xff]  ;;  %v1710_v7 = vld [vmem:[#allocation10 + $0x4e8] sm:$0xff] }
 0x294   :  { %3392 = vmatprep.subr.bf16.mxu1 %v3391_v23  ;;  %v3409_v23 = vpack.c.bf16 %v2342_v44, %v2341_v32 }
 0x296   :  { %3114 = vmatpush1.bf16.msra.mxu0 %v3113_v52 }
 0x297   :  { %3116 = vmatprep.subr.bf16.mxu0 %v3115_v56  ;;  %v3173_v56 = vpack.c.bf16 %v1691_v14, %v1689_v25  ;;  %v1705_v25 = vld [vmem:[#allocation10 + $0x4c0] sm:$0xff] }
 0x298   :  { %v2668_v35 = vpop.f32.mrb[18].mxu1 }
 0x299   :  { %v2669_v41 = vpop.f32.mrb[19].mxu1 }
 0x29a   :  { %3118 = vmatpush1.bf16.msra.mxu0 %v3117_v1  ;;  %v2670_v42 = vadd.f32 %v2669_v41, %v2668_v35  ;;  %v3175_v1 = vpack.c.bf16 %v1696_v51, %v1694_v48  ;;  %v3397_v35 = vpack.c.bf16 %v2336_v30, %v2335_v29  ;;  %v2344_v48 = vld [vmem:[#allocation11 + $0x68] sm:$0xff] }
 0x29b   :  { %3120 = vmatprep.subr.bf16.mxu0 %v3119_v31  ;;  %v1695_v31 = vld [vmem:[#allocation10 + $0x470] sm:$0xff] }
 0x29c   :  { %v1676_v55 = vadd.f32 %v2670_v42, %v4129_v19  ;;  %v3177_v41 = vpack.c.bf16 %v1695_v31, %v1693_v58  ;;  %v3399_v42 = vpack.c.bf16 %v2354_v34, %v2353_v33  ;;  %v1861_v58 = vld [vmem:[#allocation10 + $0x518] sm:$0xff]  ;;  %v1860_v31 = vld [vmem:[#allocation10 + $0x510] sm:$0xff]  ;;  %v1863_v33 = vld [vmem:[#allocation10 + $0x528] sm:$0xff] }
 0x29d   :  { %v1865_v34 = vld [vmem:[#allocation10 + $0x538] sm:$0xff] }
 0x29e   :  { %3122 = vmatpush1.bf16.msra.mxu0 %v3121_v37  ;;  %3488 = vtanh.f32 %v1676_v55  ;;  %v1697_v37 = vld [vmem:[#allocation10 + $0x480] sm:$0xff]  ;;  %v2356_v55 = vld [vmem:[#allocation11 + $0xc8] sm:$0xff]  ;;  %v3231_v38 = vpack.c.bf16 %v1865_v34, %v1863_v33  ;;  %v2046_v34 = vld [vmem:[#allocation10 + $0x658] sm:$0xff] }
 0x29f   :  { %3124 = vmatprep.subr.bf16.mxu0 %v3123_v43  ;;  %v2337_v43 = vld [vmem:[#allocation11 + $0x30] sm:$0xff]  ;;  %v3181_v61 = vpack.c.bf16 %v1699_v49, %v1697_v37  ;;  %v3403_v20 = vpack.c.bf16 %v2356_v55, %v2355_v53  ;;  %v1866_v49 = vld [vmem:[#allocation10 + $0x540] sm:$0xff]  ;;  %v1871_v55 = vld [vmem:[#allocation10 + $0x568] sm:$0xff] }
 0x2a0   :  { %v3401_v60 = vpack.c.bf16 %v2338_v45, %v2337_v43  ;;  %v1869_v43 = vld [vmem:[#allocation10 + $0x558] sm:$0xff]  ;;  %v1868_v53 = vld [vmem:[#allocation10 + $0x550] sm:$0xff]  ;;  %v2044_v33 = vld [vmem:[#allocation10 + $0x648] sm:$0xff] }
 0x2a2   :  { %3126 = vmatpush1.bf16.msra.mxu0 %v3125_v57  ;;  %v1702_v57 = vld [vmem:[#allocation10 + $0x4a8] sm:$0xff] }
 0x2a3   :  { %3128 = vmatprep.subr.bf16.mxu0 %v3127_v59  ;;  %v1704_v59 = vld [vmem:[#allocation10 + $0x4b8] sm:$0xff] }
 0x2a4   :  { %v3183_v6 = vpack.c.bf16 %v1704_v59, %v1702_v57  ;;  %v1873_v57 = vld [vmem:[#allocation10 + $0x578] sm:$0xff]  ;;  %v3237_v59 = vpack.c.bf16 %v1868_v53, %v1866_v49  ;;  %v2047_v49 = vld [vmem:[#allocation10 + $0x660] sm:$0xff]  ;;  %v2049_v53 = vld [vmem:[#allocation10 + $0x670] sm:$0xff] }
 0x2a6   :  { %3130 = vmatpush1.bf16.msra.mxu0 %v3129_v2  ;;  %v2339_v2 = vld [vmem:[#allocation11 + $0x40] sm:$0xff] }
 0x2a7   :  { %3164 = vmatprep.subr.bf16.mxu0 %v3163_v3  ;;  %v2340_v3 = vld [vmem:[#allocation11 + $0x48] sm:$0xff] }
 0x2a8   :  { %v4150_v24 = vpop.eup %3488  ;;  %v3405_v12 = vpack.c.bf16 %v2340_v3, %v2339_v2 }
 0x2a9   :  { %1601 = vmatmul.mubr.f32.vlgmr.msra.gmra.mrb[6].mxu0 %v4144_v39  ;;  %1680 = vst [vmem:[#allocation14 + $0x20] sm:$0xff] %v4150_v24  ;;  %v2333_v39 = vld [vmem:[#allocation11 + $0x10] sm:$0xff] }
 0x2aa   :  { %3166 = vmatpush1.bf16.msra.mxu0 %v3165_v15  ;;  %1777 = vmatprep.mubr.f32.mxu0 %v3717_v0  ;;  %v3393_v52 = vpack.c.bf16 %v2334_v40, %v2333_v39  ;;  %v1706_v15 = vld [vmem:[#allocation10 + $0x4c8] sm:$0xff]  ;;  %v3189_v39 = vpack.c.bf16 %v1707_v54, %v1705_v25  ;;  %v3411_v40 = vpack.c.bf16 %v2360_v4, %v2359_v62  ;;  %v1884_v54 = vld [vmem:[#allocation10 + $0x5d0] sm:$0xff]  ;;  %v1889_v4 = vld [vmem:[#allocation10 + $0x5f8] sm:$0xff] }
 0x2ab   :  { %3168 = vmatprep.subr.bf16.mxu0 %v3167_v16  ;;  %v1708_v16 = vld [vmem:[#allocation10 + $0x4d8] sm:$0xff]  ;;  %v1887_v62 = vld [vmem:[#allocation10 + $0x5e8] sm:$0xff] }
 0x2ac   :  { %3394 = vmatpush3.bf16.msra.mxu1 %v3393_v52  ;;  %v1711_v52 = vld [vmem:[#allocation10 + $0x4f0] sm:$0xff] }
 0x2ad   :  { %3396 = vmatprep.subr.bf16.mxu1 %v3395_v27  ;;  %v3413_v27 = vpack.c.bf16 %v2344_v48, %v2343_v5  ;;  %v3193_v29 = vpack.c.bf16 %v1711_v52, %v1709_v10  ;;  %v2038_v5 = vld [vmem:[#allocation10 + $0x618] sm:$0xff]  ;;  %v2035_v10 = vld [vmem:[#allocation10 + $0x600] sm:$0xff]  ;;  %v2037_v52 = vld [vmem:[#allocation10 + $0x610] sm:$0xff] }
 0x2ae   :  { %3170 = vmatpush1.bf16.msra.mxu0 %v3169_v46  ;;  %v3187_v46 = vpack.c.bf16 %v1708_v16, %v1706_v15  ;;  %v3247_v16 = vpack.c.bf16 %v1881_v11, %v1879_v9  ;;  %v2060_v9 = vld [vmem:[#allocation10 + $0x6c8] sm:$0xff]  ;;  %v2062_v11 = vld [vmem:[#allocation10 + $0x6d8] sm:$0xff] }
 0x2af   :  { %3172 = vmatprep.subr.bf16.mxu0 %v3171_v13  ;;  %v1712_v13 = vld [vmem:[#allocation10 + $0x4f8] sm:$0xff] }
 0x2b0   :  { %3398 = vmatpush3.bf16.msra.mxu1 %v3397_v35  ;;  %v3191_v51 = vpack.c.bf16 %v1712_v13, %v1710_v7  ;;  %v1862_v35 = vld [vmem:[#allocation10 + $0x520] sm:$0xff] }
 0x2b1   :  { %3400 = vmatprep.subr.bf16.mxu1 %v3399_v42  ;;  %v1867_v42 = vld [vmem:[#allocation10 + $0x548] sm:$0xff] }
 0x2b2   :  { %3174 = vmatpush1.bf16.msra.mxu0 %v3173_v56  ;;  %v1859_v56 = vld [vmem:[#allocation10 + $0x508] sm:$0xff] }
 0x2b3   :  { %3176 = vmatprep.subr.bf16.mxu0 %v3175_v1  ;;  %v3227_v30 = vpack.c.bf16 %v1861_v58, %v1859_v56  ;;  %v1858_v1 = vld [vmem:[#allocation10 + $0x500] sm:$0xff]  ;;  %v2040_v56 = vld [vmem:[#allocation10 + $0x628] sm:$0xff]  ;;  %v2042_v58 = vld [vmem:[#allocation10 + $0x638] sm:$0xff] }
 0x2b4   :  { %3402 = vmatpush3.bf16.msra.mxu1 %v3401_v60  ;;  %v3229_v36 = vpack.c.bf16 %v1860_v31, %v1858_v1  ;;  %v3239_v60 = vpack.c.bf16 %v1873_v57, %v1871_v55  ;;  %v2041_v1 = vld [vmem:[#allocation10 + $0x630] sm:$0xff]  ;;  %v2052_v55 = vld [vmem:[#allocation10 + $0x688] sm:$0xff]  ;;  %v3305_v57 = vpack.c.bf16 %v2049_v53, %v2047_v49  ;;  %v2235_v49 = vld [vmem:[#allocation10 + $0x7b8] sm:$0xff] }
 0x2b5   :  { %3404 = vmatprep.subr.bf16.mxu1 %v3403_v20  ;;  %v1875_v20 = vld [vmem:[#allocation10 + $0x588] sm:$0xff] }
 0x2b6   :  { %3178 = vmatpush1.bf16.msra.mxu0 %v3177_v41  ;;  %v1864_v41 = vld [vmem:[#allocation10 + $0x530] sm:$0xff] }
 0x2b7   :  { %3180 = vmatprep.subr.bf16.mxu0 %v3179_v47  ;;  %v3233_v45 = vpack.c.bf16 %v1864_v41, %v1862_v35  ;;  %v3235_v47 = vpack.c.bf16 %v1869_v43, %v1867_v42  ;;  %v2043_v35 = vld [vmem:[#allocation10 + $0x640] sm:$0xff]  ;;  %v2045_v41 = vld [vmem:[#allocation10 + $0x650] sm:$0xff]  ;;  %v2048_v42 = vld [vmem:[#allocation10 + $0x668] sm:$0xff] }
 0x2b8   :  { %v2703_v18 = vpop.f32.mrb[20].mxu1  ;;  %3406 = vmatpush3.bf16.msra.mxu1 %v3405_v12  ;;  %v1883_v12 = vld [vmem:[#allocation10 + $0x5c8] sm:$0xff]  ;;  %v2050_v43 = vld [vmem:[#allocation10 + $0x678] sm:$0xff] }
 0x2b9   :  { %v2704_v21 = vpop.f32.mrb[21].mxu1  ;;  %3408 = vmatprep.subr.bf16.mxu1 %v3407_v22 }
 0x2ba   :  { %3182 = vmatpush1.bf16.msra.mxu0 %v3181_v61  ;;  %v2705_v14 = vadd.f32 %v2704_v21, %v2703_v18  ;;  %v1870_v61 = vld [vmem:[#allocation10 + $0x560] sm:$0xff]  ;;  %v1880_v21 = vld [vmem:[#allocation10 + $0x5b0] sm:$0xff] }
 0x2bb   :  { %3184 = vmatprep.subr.bf16.mxu0 %v3183_v6  ;;  %v3241_v2 = vpack.c.bf16 %v1872_v63, %v1870_v61  ;;  %v1874_v6 = vld [vmem:[#allocation10 + $0x580] sm:$0xff]  ;;  %v2053_v61 = vld [vmem:[#allocation10 + $0x690] sm:$0xff]  ;;  %v2056_v63 = vld [vmem:[#allocation10 + $0x6a8] sm:$0xff] }
 0x2bc   :  { %v1853_v17 = vadd.f32 %v2705_v14, %v4129_v19  ;;  %3410 = vmatpush3.bf16.msra.mxu1 %v3409_v23  ;;  %v3245_v15 = vpack.c.bf16 %v1876_v8, %v1874_v6  ;;  %v1878_v18 = vld [vmem:[#allocation10 + $0x5a0] sm:$0xff]  ;;  %v2057_v6 = vld [vmem:[#allocation10 + $0x6b0] sm:$0xff] }
 0x2bd   :  { %3412 = vmatprep.subr.bf16.mxu1 %v3411_v40  ;;  %v3249_v22 = vpack.c.bf16 %v1880_v21, %v1878_v18  ;;  %v1886_v23 = vld [vmem:[#allocation10 + $0x5e0] sm:$0xff]  ;;  %v2036_v40 = vld [vmem:[#allocation10 + $0x608] sm:$0xff]  ;;  %v3315_v21 = vpack.c.bf16 %v2062_v11, %v2060_v9  ;;  %v2242_v11 = vld [vmem:[#allocation10 + $0x7f0] sm:$0xff] }
 0x2be   :  { %3186 = vmatpush1.bf16.msra.mxu0 %v3185_v50  ;;  %3490 = vtanh.f32 %v1853_v17  ;;  %v1885_v50 = vld [vmem:[#allocation10 + $0x5d8] sm:$0xff]  ;;  %v3255_v17 = vpack.c.bf16 %v1889_v4, %v1887_v62  ;;  %v2213_v62 = vld [vmem:[#allocation10 + $0x708] sm:$0xff]  ;;  %v2240_v9 = vld [vmem:[#allocation10 + $0x7e0] sm:$0xff] }
 0x2bf   :  { %3188 = vmatprep.subr.bf16.mxu0 %v3187_v46  ;;  %v3251_v44 = vpack.c.bf16 %v1885_v50, %v1883_v12  ;;  %v1882_v46 = vld [vmem:[#allocation10 + $0x5c0] sm:$0xff]  ;;  %v2061_v50 = vld [vmem:[#allocation10 + $0x6d0] sm:$0xff]  ;;  %v2215_v4 = vld [vmem:[#allocation10 + $0x718] sm:$0xff] }
 0x2c0   :  { %3414 = vmatpush3.bf16.msra.mxu1 %v3413_v27  ;;  %v3253_v13 = vpack.c.bf16 %v1884_v54, %v1882_v46  ;;  %v3293_v27 = vpack.c.bf16 %v2037_v52, %v2035_v10  ;;  %v2059_v12 = vld [vmem:[#allocation10 + $0x6c0] sm:$0xff]  ;;  %v2065_v54 = vld [vmem:[#allocation10 + $0x6f0] sm:$0xff]  ;;  %v2221_v52 = vld [vmem:[#allocation10 + $0x748] sm:$0xff] }
 0x2c1   :  { %v2063_v46 = vld [vmem:[#allocation10 + $0x6e0] sm:$0xff] }
 0x2c2   :  { %3190 = vmatpush1.bf16.msra.mxu0 %v3189_v39  ;;  %v1888_v39 = vld [vmem:[#allocation10 + $0x5f0] sm:$0xff] }
 0x2c3   :  { %3192 = vmatprep.subr.bf16.mxu0 %v3191_v51  ;;  %v3257_v48 = vpack.c.bf16 %v1888_v39, %v1886_v23  ;;  %v3291_v51 = vpack.c.bf16 %v2038_v5, %v2036_v40  ;;  %v2214_v23 = vld [vmem:[#allocation10 + $0x710] sm:$0xff]  ;;  %v2217_v39 = vld [vmem:[#allocation10 + $0x728] sm:$0xff]  ;;  %v2219_v40 = vld [vmem:[#allocation10 + $0x738] sm:$0xff] }
 0x2c4   :  { %v3359_v5 = vpack.c.bf16 %v2219_v40, %v2217_v39 }
 0x2c6   :  { %3194 = vmatpush1.bf16.msra.mxu0 %v3193_v29  ;;  %v3295_v29 = vpack.c.bf16 %v2042_v58, %v2040_v56  ;;  %v2223_v56 = vld [vmem:[#allocation10 + $0x758] sm:$0xff] }
 0x2c7   :  { %3228 = vmatprep.subr.bf16.mxu0 %v3227_v30  ;;  %v2039_v30 = vld [vmem:[#allocation10 + $0x620] sm:$0xff] }
 0x2c8   :  { %v4156_v37 = vpop.eup %3490 }
 0x2c9   :  { %1778 = vmatmul.mubr.f32.vlgmr.msra.gmra.mrb[6].mxu0 %v4150_v24  ;;  %1857 = vst [vmem:[#allocation14 + $0x28] sm:$0xff] %v4156_v37  ;;  %v1877_v24 = vld [vmem:[#allocation10 + $0x598] sm:$0xff] }
 0x2ca   :  { %3230 = vmatpush1.bf16.msra.mxu0 %v3229_v36  ;;  %1954 = vmatprep.mubr.f32.mxu0 %v3717_v0  ;;  %v3243_v3 = vpack.c.bf16 %v1877_v24, %v1875_v20  ;;  %v3297_v36 = vpack.c.bf16 %v2041_v1, %v2039_v30  ;;  %v2058_v20 = vld [vmem:[#allocation10 + $0x6b8] sm:$0xff]  ;;  %v2222_v30 = vld [vmem:[#allocation10 + $0x750] sm:$0xff]  ;;  %v2225_v1 = vld [vmem:[#allocation10 + $0x768] sm:$0xff] }
 0x2cb   :  { %3232 = vmatprep.subr.bf16.mxu0 %v3231_v38  ;;  %v3299_v38 = vpack.c.bf16 %v2046_v34, %v2044_v33  ;;  %v2227_v33 = vld [vmem:[#allocation10 + $0x778] sm:$0xff] }
 0x2ce   :  { %3234 = vmatpush1.bf16.msra.mxu0 %v3233_v45  ;;  %v3301_v45 = vpack.c.bf16 %v2045_v41, %v2043_v35  ;;  %v2226_v35 = vld [vmem:[#allocation10 + $0x770] sm:$0xff]  ;;  %v2229_v41 = vld [vmem:[#allocation10 + $0x788] sm:$0xff] }
 0x2cf   :  { %3236 = vmatprep.subr.bf16.mxu0 %v3235_v47  ;;  %v3303_v47 = vpack.c.bf16 %v2050_v43, %v2048_v42  ;;  %v2231_v42 = vld [vmem:[#allocation10 + $0x798] sm:$0xff] }
 0x2d0   :  { %v3371_v43 = vpack.c.bf16 %v2231_v42, %v2229_v41 }
 0x2d2   :  { %3238 = vmatpush1.bf16.msra.mxu0 %v3237_v59 }
 0x2d3   :  { %3240 = vmatprep.subr.bf16.mxu0 %v3239_v60  ;;  %v2051_v60 = vld [vmem:[#allocation10 + $0x680] sm:$0xff] }
 0x2d4   :  { %v3309_v24 = vpack.c.bf16 %v2053_v61, %v2051_v60  ;;  %v2239_v60 = vld [vmem:[#allocation10 + $0x7d8] sm:$0xff] }
 0x2d6   :  { %3242 = vmatpush1.bf16.msra.mxu0 %v3241_v2  ;;  %v3311_v2 = vpack.c.bf16 %v2058_v20, %v2056_v63  ;;  %v2236_v20 = vld [vmem:[#allocation10 + $0x7c0] sm:$0xff] }
 0x2d7   :  { %3244 = vmatprep.subr.bf16.mxu0 %v3243_v3  ;;  %v2055_v3 = vld [vmem:[#allocation10 + $0x6a0] sm:$0xff] }
 0x2d8   :  { %v2738_v25 = vpop.f32.mrb[22].mxu1  ;;  %v3313_v18 = vpack.c.bf16 %v2057_v6, %v2055_v3  ;;  %v2243_v3 = vld [vmem:[#allocation10 + $0x7f8] sm:$0xff] }
 0x2d9   :  { %v2739_v14 = vpop.f32.mrb[23].mxu1 }
 0x2da   :  { %3246 = vmatpush1.bf16.msra.mxu0 %v3245_v15  ;;  %v2740_v32 = vadd.f32 %v2739_v14, %v2738_v25  ;;  %v2064_v14 = vld [vmem:[#allocation10 + $0x6e8] sm:$0xff] }
 0x2db   :  { %3248 = vmatprep.subr.bf16.mxu0 %v3247_v16 }
 0x2dc   :  { %v2030_v7 = vadd.f32 %v2740_v32, %v4129_v19  ;;  %v3317_v32 = vpack.c.bf16 %v2061_v50, %v2059_v12  ;;  %v2345_v12 = vld [vmem:[#allocation11 + $0x70] sm:$0xff]  ;;  %v2346_v50 = vld [vmem:[#allocation11 + $0x78] sm:$0xff] }
 0x2de   :  { %3250 = vmatpush1.bf16.msra.mxu0 %v3249_v22  ;;  %3492 = vtanh.f32 %v2030_v7  ;;  %v2066_v22 = vld [vmem:[#allocation10 + $0x6f8] sm:$0xff]  ;;  %v3321_v7 = vpack.c.bf16 %v2065_v54, %v2063_v46 }
 0x2df   :  { %3252 = vmatprep.subr.bf16.mxu0 %v3251_v44  ;;  %v3319_v44 = vpack.c.bf16 %v2066_v22, %v2064_v14  ;;  %v2317_v14 = vld [vmem:[%s4220_s6] sm:$0x3] }
 0x2e0   :  { %v2326_v22 = vrot.slane %v2317_v14, %v3957_v28 }
 0x2e2   :  { %3254 = vmatpush1.bf16.msra.mxu0 %v3253_v13  ;;  %v3355_v13 = vpack.c.bf16 %v2215_v4, %v2213_v62 }
 0x2e3   :  { %3256 = vmatprep.subr.bf16.mxu0 %v3255_v17  ;;  %v2212_v17 = vld [vmem:[#allocation10 + $0x700] sm:$0xff] }
 0x2e6   :  { %3258 = vmatpush1.bf16.msra.mxu0 %v3257_v48  ;;  %v2216_v48 = vld [vmem:[#allocation10 + $0x720] sm:$0xff] }
 0x2e7   :  { %3292 = vmatprep.subr.bf16.mxu0 %v3291_v51  ;;  %v2218_v51 = vld [vmem:[#allocation10 + $0x730] sm:$0xff] }
 0x2e8   :  { %v4162_v31 = vpop.eup %3492  ;;  %v3361_v58 = vpack.c.bf16 %v2218_v51, %v2216_v48 }
 0x2e9   :  { %1955 = vmatmul.mubr.f32.vlgmr.msra.gmra.mrb[6].mxu0 %v4156_v37  ;;  %2034 = vst [vmem:[#allocation14 + $0x30] sm:$0xff] %v4162_v31  ;;  %v2054_v37 = vld [vmem:[#allocation10 + $0x698] sm:$0xff] }
 0x2ea   :  { %3294 = vmatpush1.bf16.msra.mxu0 %v3293_v27  ;;  %2131 = vmatprep.mubr.f32.mxu0 %v3717_v0  ;;  %v3307_v59 = vpack.c.bf16 %v2054_v37, %v2052_v55  ;;  %v3363_v27 = vpack.c.bf16 %v2223_v56, %v2221_v52  ;;  %v2232_v37 = vld [vmem:[#allocation10 + $0x7a0] sm:$0xff] }
 0x2eb   :  { %3296 = vmatprep.subr.bf16.mxu0 %v3295_v29  ;;  %v2220_v29 = vld [vmem:[#allocation10 + $0x740] sm:$0xff] }
 0x2ec   :  { %v3365_v34 = vpack.c.bf16 %v2222_v30, %v2220_v29 }
 0x2ee   :  { %3298 = vmatpush1.bf16.msra.mxu0 %v3297_v36  ;;  %v3367_v36 = vpack.c.bf16 %v2227_v33, %v2225_v1 }
 0x2ef   :  { %3300 = vmatprep.subr.bf16.mxu0 %v3299_v38  ;;  %v2224_v38 = vld [vmem:[#allocation10 + $0x760] sm:$0xff] }
 0x2f2   :  { %3302 = vmatpush1.bf16.msra.mxu0 %v3301_v45  ;;  %v2228_v45 = vld [vmem:[#allocation10 + $0x780] sm:$0xff] }
 0x2f3   :  { %3304 = vmatprep.subr.bf16.mxu0 %v3303_v47  ;;  %v2233_v47 = vld [vmem:[#allocation10 + $0x7a8] sm:$0xff] }
 0x2f4   :  { %v3375_v55 = vpack.c.bf16 %v2235_v49, %v2233_v47 }
 0x2f6   :  { %3306 = vmatpush1.bf16.msra.mxu0 %v3305_v57  ;;  %v2234_v57 = vld [vmem:[#allocation10 + $0x7b0] sm:$0xff] }
 0x2f7   :  { %3308 = vmatprep.subr.bf16.mxu0 %v3307_v59  ;;  %v2237_v59 = vld [vmem:[#allocation10 + $0x7c8] sm:$0xff]  ;;  %v3377_v61 = vpack.c.bf16 %v2234_v57, %v2232_v37 }
 0x2f8   :  { %v2773_v8 = vpop.f32.mrb[24].mxu1  ;;  %v3379_v63 = vpack.c.bf16 %v2239_v60, %v2237_v59 }
 0x2f9   :  { %v2774_v15 = vpop.f32.mrb[25].mxu1 }
 0x2fa   :  { %3310 = vmatpush1.bf16.msra.mxu0 %v3309_v24  ;;  %v2775_v16 = vadd.f32 %v2774_v15, %v2773_v8  ;;  %v2238_v24 = vld [vmem:[#allocation10 + $0x7d0] sm:$0xff]  ;;  %v3385_v15 = vpack.c.bf16 %v2242_v11, %v2240_v9 }
 0x2fb   :  { %3312 = vmatprep.subr.bf16.mxu0 %v3311_v2  ;;  %v2241_v2 = vld [vmem:[#allocation10 + $0x7e8] sm:$0xff]  ;;  %v3381_v6 = vpack.c.bf16 %v2238_v24, %v2236_v20 }
 0x2fc   :  { %v2207_v25 = vadd.f32 %v2775_v16, %v4129_v19  ;;  %v3357_v19 = vpack.c.bf16 %v2214_v23, %v2212_v17  ;;  %v3383_v8 = vpack.c.bf16 %v2243_v3, %v2241_v2  ;;  %v2361_v16 = vld [vmem:[#allocation11 + $0xf0] sm:$0xff] }
 0x2fe   :  { %3494 = vtanh.f32 %v2207_v25  ;;  %3314 = vmatpush1.bf16.msra.mxu0 %v3313_v18  ;;  %v2362_v18 = vld [vmem:[#allocation11 + $0xf8] sm:$0xff]  ;;  %v3417_v25 = vpack.c.bf16 %v2346_v50, %v2345_v12 }
 0x2ff   :  { %3316 = vmatprep.subr.bf16.mxu0 %v3315_v21  ;;  %v3415_v21 = vpack.c.bf16 %v2362_v18, %v2361_v16 }
 0x301   :  { %3416 = vmatprep.subr.bf16.mxu1 %v3415_v21 }
 0x302   :  { %3318 = vmatpush1.bf16.msra.mxu0 %v3317_v32  ;;  %3418 = vmatpush3.bf16.msra.mxu1 %v3417_v25  ;;  %v2322_v32 = vrot.slane %v2317_v14, %v3954_v26 }
 0x303   :  { %3320 = vmatprep.subr.bf16.mxu0 %v3319_v44 }
 0x306   :  { %3322 = vmatpush1.bf16.msra.mxu0 %v3321_v7 }
 0x307   :  { %3356 = vmatprep.subr.bf16.mxu0 %v3355_v13 }
 0x308   :  { %v3495_v10 = vpop.eup %3494 }
 0x309   :  { %2211 = vst [vmem:[#allocation14 + $0x38] sm:$0xff] %v3495_v10  ;;  %2132 = vmatmul.mubr.f32.vlgmr.msra.gmra.mrb[6].mxu0 %v4162_v31  ;;  %v3369_v31 = vpack.c.bf16 %v2226_v35, %v2224_v38 }
 0x30a   :  { %3358 = vmatpush1.bf16.msra.mxu0 %v3357_v19  ;;  %2308 = vmatprep.mubr.f32.mxu0 %v3717_v0  ;;  %v2230_v0 = vld [vmem:[#allocation10 + $0x790] sm:$0xff] }
 0x30b   :  { %3360 = vmatprep.subr.bf16.mxu0 %v3359_v5  ;;  %v3373_v53 = vpack.c.bf16 %v2230_v0, %v2228_v45 }
 0x30e   :  { %3362 = vmatpush1.bf16.msra.mxu0 %v3361_v58 }
 0x30f   :  { %3364 = vmatprep.subr.bf16.mxu0 %v3363_v27 }
 0x312   :  { %3366 = vmatpush1.bf16.msra.mxu0 %v3365_v34 }
 0x313   :  { %3368 = vmatprep.subr.bf16.mxu0 %v3367_v36 }
 0x316   :  { %3370 = vmatpush1.bf16.msra.mxu0 %v3369_v31 }
 0x317   :  { %3372 = vmatprep.subr.bf16.mxu0 %v3371_v43 }
 0x31a   :  { %3374 = vmatpush1.bf16.msra.mxu0 %v3373_v53 }
 0x31b   :  { %3376 = vmatprep.subr.bf16.mxu0 %v3375_v55 }
 0x31e   :  { %3378 = vmatpush1.bf16.msra.mxu0 %v3377_v61 }
 0x31f   :  { %3380 = vmatprep.subr.bf16.mxu0 %v3379_v63 }
 0x322   :  { %3382 = vmatpush1.bf16.msra.mxu0 %v3381_v6 }
 0x323   :  { %3384 = vmatprep.subr.bf16.mxu0 %v3383_v8 }
 0x326   :  { %3386 = vmatpush1.bf16.msra.mxu0 %v3385_v15 }
 0x329   :  { %2309 = vmatmul.mubr.f32.vlgmr.msra.gmra.mrb[6].mxu0 %v3495_v10 }
 0x3fc   :  { %v2310_v44 = vpop.f32.mrb[6].mxu0 }
 0x3fd   :  { %v2312_v46 = vpop.f32.mrb[7].mxu0  ;;  %v2329_v62 = vadd.f32 %v2322_v32, %v2310_v44 }
 0x3fe   :  { %v2330_v54 = vadd.f32 %v2326_v22, %v2312_v46 }
 0x400   :  { %2434 = vmatprep.mubr.f32.mxu1 %v2330_v54 }
 0x401   :  { %2435 = vmatmul.mubr.f32.vlgmr.msra.gmra.mrb[26].mxu1 %v2329_v62 }
 0x402   :  { %3639 = shalt.err (!%p3636_p10)
}
 0x403   :  { %s3640_s19 = scalar_lea.hbm %s4224_s10, 1024 }
 0x404   :  { %p3641_p11 = scmp.ne.s32.totalorder %s4224_s10, %s3640_s19  ;;  %p3644_p12 = scmp.lt.u32.totalorder %s3640_s19, %s4224_s10 }
 0x406   :  { %p3646_p13 = pnand %p3644_p12, %p3641_p11 }
 0x408   :  { %3649 = shalt.err (!%p3646_p13)
}
 0x409   :  { %2460 = dma.vmem_to_hbm [thread:$0]  %s2458_s17, 1024, %s4224_s10, [#allocation15]  }
 0x40a   :  { %s3719_s23 = smov [#allocation16]  }
 0x40b   :  { %s2467_s24 = sshll.u32 %s3719_s23, 4  ;;  %s2468_s24 = int_to_ptr.vmem [resolvable:$true] %s2467_s24 }
 0x40c   :  { %s3650_s26 = scalar_lea.vmem %s2468_s24, 1792  ;;  %p3655_p1 = scmp.lt.s32.totalorder %s2468_s24, %s2468_s24 }
 0x40d   :  { %p3651_p0 = scmp.ne.s32.totalorder %s2468_s24, %s3650_s26  ;;  %p3656_p2 = scmp.lt.s32.totalorder %s3650_s26, %s3650_s26 }
 0x40f   :  { %p3657_p3 = por %p3656_p2, %p3655_p1 }
 0x411   :  { %p3658_p4 = pnand %p3657_p3, %p3651_p0 }
 0x413   :  { %3661 = shalt.err (!%p3658_p4)
}
 0x414   :  { %s3662_s25 = scalar_lea.hbm %s4225_s11, 1792 }
 0x415   :  { %p3663_p5 = scmp.ne.s32.totalorder %s4225_s11, %s3662_s25  ;;  %p3666_p6 = scmp.lt.u32.totalorder %s3662_s25, %s4225_s11 }
 0x417   :  { %p3668_p7 = pnand %p3666_p6, %p3663_p5 }
 0x419   :  { %3671 = shalt.err (!%p3668_p7)
}
 0x41a   :  { %2470 = dma.vmem_to_hbm [thread:$0]  %s2468_s24, 1792, %s4225_s11, [#allocation15]   ;;  %v2495_v28 = vld [vmem:[%s4222_s8] ss:$0 sm:$0xff] }
 0x41b   :  { %s3720_s4 = smov [#allocation13]  }
 0x41c   :  { %s2447_s1 = sshll.u32 %s3720_s4, 4  ;;  %s2448_s1 = int_to_ptr.vmem [resolvable:$true] %s2447_s1 }
 0x41d   :  { %s3672_s16 = scalar_lea.vmem %s2448_s1, 128  ;;  %p3677_p9 = scmp.lt.s32.totalorder %s2448_s1, %s2448_s1 }
 0x41e   :  { %p3673_p8 = scmp.ne.s32.totalorder %s2448_s1, %s3672_s16  ;;  %p3678_p10 = scmp.lt.s32.totalorder %s3672_s16, %s3672_s16 }
 0x420   :  { %p3679_p11 = por %p3678_p10, %p3677_p9 }
 0x422   :  { %p3680_p12 = pnand %p3679_p11, %p3673_p8 }
 0x4d4   :  { %v2808_v26 = vpop.f32.mrb[26].mxu1 }
 0x4d5   :  { %v2809_v4 = vpop.f32.mrb[27].mxu1 }
 0x4d6   :  { %v2810_v7 = vadd.f32 %v2809_v4, %v2808_v26 }
 0x4d8   :  { %v2437_v13 = vadd.f32 %v2810_v7, %v2495_v28 }
 0x4da   :  { %2440 = vst [vmem:[#allocation13] sm:$0xff] %v2437_v13 }
 0x4db   :  { %3683 = shalt.err (!%p3680_p12)
}
 0x4dc   :  { %s3684_s3 = scalar_lea.hbm %s4223_s9, 128 }
 0x4dd   :  { %p3685_p13 = scmp.ne.s32.totalorder %s4223_s9, %s3684_s3  ;;  %p3688_p0 = scmp.lt.u32.totalorder %s3684_s3, %s4223_s9 }
 0x4df   :  { %p3690_p1 = pnand %p3688_p0, %p3685_p13 }
 0x4e1   :  { %3693 = shalt.err (!%p3690_p1)
}
 0x4e2   :  { %2450 = dma.vmem_to_hbm [thread:$0]  %s2448_s1, 128, %s4223_s9, [#allocation4]  }
 0x4e3   :  { %3702 = dma.done.wait [#allocation4], 128  }
 0x4e4   :  { %3703 = vsyncadd [#allocation4], 4294967168 }
 0x4e5   :  { %3704 = dma.done.wait [#allocation15], 2816  }
 0x4e6   :  { %3705 = vsyncadd [#allocation15], 4294964480 }
 0x4e7   :  { %2480 = vsyncpa [#allocation3], 1 }
 0x4e8   :  { %2481 = vsyncpa [#allocation6], 1 }
 0x4e9   :  { %2482 = vsyncpa [#allocation9], 1 }
 0x4ea   :  { %2483 = vsyncpa [#allocation12], 1 }
 0x4eb   :  { %2484 = vsyncpa [#allocation4], 1 }
 0x4ec   :  { %2485 = vsyncpa [#allocation15], 1 }

// kernel: tpu_custom_call.1
= control target key start
LH: loop header
LB: loop body
LE: loop exit
PB: predicated region body
PF: predicated region fallthrough
CT: control target
= control target key end

     0   :  { %17 = vsyncpa [#allocation3], 0  ;;  %s4214_s0 = inlined_call_operand.hbm [shape: f32[8,32], index: 0, kind: input, shape index: {}]   ;;  %s4215_s1 = inlined_call_operand.hbm [shape: f32[32,2048], index: 1, kind: input, shape index: {}]   ;;  %s4216_s2 = inlined_call_operand.hbm [shape: f32[1,2048], index: 2, kind: input, shape index: {}]   ;;  %s4217_s3 = inlined_call_operand.hbm [shape: f32[256,128], index: 3, kind: input, shape index: {}]   ;;  %s4218_s4 = inlined_call_operand.vmem [shape: f32[1,128], index: 4, kind: input, shape index: {}]   ;;  %s4219_s5 = inlined_call_operand.hbm [shape: f32[1024,256], index: 5, kind: input, shape index: {}]   ;;  %s4220_s6 = inlined_call_operand.vmem [shape: f32[1,256], index: 6, kind: input, shape index: {}]   ;;  %s4221_s7 = inlined_call_operand.hbm [shape: f32[256,128], index: 7, kind: input, shape index: {}]   ;;  %s4222_s8 = inlined_call_operand.vmem [shape: f32[1,128], index: 8, kind: input, shape index: {}]   ;;  %s4223_s9 = inlined_call_operand.hbm [shape: f32[8,128], index: 9, kind: output, shape index: {0}]   ;;  %s4224_s10 = inlined_call_operand.hbm [shape: f32[8,1024], index: 10, kind: output, shape index: {1}]   ;;  %s4225_s11 = inlined_call_operand.hbm [shape: f32[8,1792], index: 11, kind: output, shape index: {2}]  }
   0x1   :  { %18 = vsyncpa [#allocation6], 0 }
   0x2   :  { %19 = vsyncpa [#allocation9], 0 }
   0x3   :  { %20 = vsyncpa [#allocation12], 0 }
   0x4   :  { %21 = vsyncpa [#allocation4], 0 }
   0x5   :  { %22 = vsyncpa [#allocation15], 0  ;;  %s3706_s17 = smov [#allocation5]   ;;  %s3496_s21 = scalar_lea.hbm %s4215_s1, 8192 }
   0x6   :  { %s38_s18 = sshll.u32 %s3706_s17, 4  ;;  %p3497_p0 = scmp.ne.s32.totalorder %s4215_s1, %s3496_s21  ;;  %s39_s18 = int_to_ptr.vmem [resolvable:$true] %s38_s18 }
   0x7   :  { %p3500_p1 = scmp.lt.u32.totalorder %s3496_s21, %s4215_s1 }
   0x9   :  { %p3502_p2 = pnand %p3500_p1, %p3497_p0 }
   0xb   :  { %3505 = shalt.err (!%p3502_p2)
}
   0xc   :  { %s3506_s26 = scalar_lea.vmem %s39_s18, 8192  ;;  %p3511_p4 = scmp.lt.s32.totalorder %s39_s18, %s39_s18 }
   0xd   :  { %p3507_p3 = scmp.ne.s32.totalorder %s39_s18, %s3506_s26  ;;  %p3512_p5 = scmp.lt.s32.totalorder %s3506_s26, %s3506_s26 }
   0xf   :  { %p3513_p6 = por %p3512_p5, %p3511_p4 }
  0x11   :  { %p3514_p7 = pnand %p3513_p6, %p3507_p3 }
  0x13   :  { %3517 = shalt.err (!%p3514_p7)
}
  0x14   :  { %s3707_s27 = smov 2048   ;;  %s3708_s28 = smov 128  }
  0x15   :  { %44 = dma.hbm_to_vmem [thread:$0]  %s4215_s1, 8192, %s39_s18, [#allocation6], %s3707_s27, %s3707_s27, %s3708_s28  }
  0x16   :  { %s3709_s12 = smov [#allocation8]   ;;  %s3518_s16 = scalar_lea.hbm %s4217_s3, 4096 }
  0x17   :  { %s60_s13 = sshll.u32 %s3709_s12, 4  ;;  %p3519_p8 = scmp.ne.s32.totalorder %s4217_s3, %s3518_s16  ;;  %s61_s13 = int_to_ptr.vmem [resolvable:$true] %s60_s13 }
  0x18   :  { %p3522_p9 = scmp.lt.u32.totalorder %s3518_s16, %s4217_s3 }
  0x1a   :  { %p3524_p10 = pnand %p3522_p9, %p3519_p8 }
  0x1c   :  { %3527 = shalt.err (!%p3524_p10)
}
  0x1d   :  { %s3528_s22 = scalar_lea.vmem %s61_s13, 4096  ;;  %p3533_p12 = scmp.lt.s32.totalorder %s61_s13, %s61_s13 }
  0x1e   :  { %p3529_p11 = scmp.ne.s32.totalorder %s61_s13, %s3528_s22  ;;  %p3534_p13 = scmp.lt.s32.totalorder %s3528_s22, %s3528_s22 }
  0x20   :  { %p3535_p0 = por %p3534_p13, %p3533_p12 }
  0x22   :  { %p3536_p1 = pnand %p3535_p0, %p3529_p11 }
  0x24   :  { %3539 = shalt.err (!%p3536_p1)
}
  0x25   :  { %s3710_s1 = smov 8   ;;  %s3711_s24 = smov [#allocation2]  }
  0x26   :  { %66 = dma.hbm_to_vmem [thread:$0]  %s4217_s3, 4096, %s61_s13, [#allocation9], %s3708_s28, %s3708_s28, %s3710_s1  }
  0x27   :  { %s29_s25 = sshll.u32 %s3711_s24, 4  ;;  %s3712_s26 = smov [#allocation7]   ;;  %s30_s25 = int_to_ptr.vmem [resolvable:$true] %s29_s25 }
  0x28   :  { %s51_s27 = sshll.u32 %s3712_s26, 4  ;;  %s3540_s12 = scalar_lea.hbm %s4214_s0, 128  ;;  %s52_s27 = int_to_ptr.vmem [resolvable:$true] %s51_s27 }
  0x29   :  { %p3541_p2 = scmp.ne.s32.totalorder %s4214_s0, %s3540_s12  ;;  %p3544_p3 = scmp.lt.u32.totalorder %s3540_s12, %s4214_s0 }
  0x2b   :  { %p3546_p4 = pnand %p3544_p3, %p3541_p2 }
  0x2d   :  { %3549 = shalt.err (!%p3546_p4)
}
  0x2e   :  { %s3550_s3 = scalar_lea.vmem %s30_s25, 128  ;;  %p3555_p6 = scmp.lt.s32.totalorder %s30_s25, %s30_s25 }
  0x2f   :  { %p3551_p5 = scmp.ne.s32.totalorder %s30_s25, %s3550_s3  ;;  %p3556_p7 = scmp.lt.s32.totalorder %s3550_s3, %s3550_s3 }
  0x31   :  { %p3557_p8 = por %p3556_p7, %p3555_p6 }
  0x33   :  { %p3558_p9 = pnand %p3557_p8, %p3551_p5 }
  0x35   :  { %3561 = shalt.err (!%p3558_p9)
}
  0x36   :  { %32 = dma.hbm_to_vmem [thread:$0]  %s4214_s0, 128, %s30_s25, [#allocation3]  }
  0x37   :  { %s3562_s22 = scalar_lea.hbm %s4216_s2, 256 }
  0x38   :  { %p3563_p10 = scmp.ne.s32.totalorder %s4216_s2, %s3562_s22  ;;  %p3566_p11 = scmp.lt.u32.totalorder %s3562_s22, %s4216_s2 }
  0x3a   :  { %p3568_p12 = pnand %p3566_p11, %p3563_p10 }
  0x3c   :  { %3571 = shalt.err (!%p3568_p12)
}
  0x3d   :  { %s3572_s29 = scalar_lea.vmem %s52_s27, 256  ;;  %p3577_p0 = scmp.lt.s32.totalorder %s52_s27, %s52_s27 }
  0x3e   :  { %p3573_p13 = scmp.ne.s32.totalorder %s52_s27, %s3572_s29  ;;  %p3578_p1 = scmp.lt.s32.totalorder %s3572_s29, %s3572_s29 }
  0x40   :  { %p3579_p2 = por %p3578_p1, %p3577_p0 }
  0x42   :  { %p3580_p3 = pnand %p3579_p2, %p3573_p13 }
  0x44   :  { %3583 = shalt.err (!%p3580_p3)
}
  0x45   :  { %54 = dma.hbm_to_vmem [thread:$0]  %s4216_s2, 256, %s52_s27, [#allocation6]  }
  0x46   :  { %s3713_s30 = smov [#allocation10]   ;;  %s3584_s16 = scalar_lea.hbm %s4219_s5, 32768 }
  0x47   :  { %s74_s12 = sshll.u32 %s3713_s30, 4  ;;  %p3585_p4 = scmp.ne.s32.totalorder %s4219_s5, %s3584_s16  ;;  %s75_s12 = int_to_ptr.vmem [resolvable:$true] %s74_s12 }
  0x48   :  { %p3588_p5 = scmp.lt.u32.totalorder %s3584_s16, %s4219_s5 }
  0x4a   :  { %p3590_p6 = pnand %p3588_p5, %p3585_p4 }
  0x4c   :  { %3593 = shalt.err (!%p3590_p6)
}
  0x4d   :  { %s3594_s20 = scalar_lea.vmem %s75_s12, 32768  ;;  %p3599_p8 = scmp.lt.s32.totalorder %s75_s12, %s75_s12 }
  0x4e   :  { %p3595_p7 = scmp.ne.s32.totalorder %s75_s12, %s3594_s20  ;;  %p3600_p9 = scmp.lt.s32.totalorder %s3594_s20, %s3594_s20 }
  0x50   :  { %p3601_p10 = por %p3600_p9, %p3599_p8 }
  0x52   :  { %p3602_p11 = pnand %p3601_p10, %p3595_p7 }
  0x54   :  { %3605 = shalt.err (!%p3602_p11)
}
  0x55   :  { %s3714_s2 = smov 256   ;;  %s3715_s27 = smov 16  }
  0x56   :  { %80 = dma.hbm_to_vmem [thread:$0]  %s4219_s5, 32768, %s75_s12, [#allocation9], %s3714_s2, %s3714_s2, %s3715_s27  }
  0x57   :  { %s3716_s18 = smov [#allocation11]   ;;  %s3606_s29 = scalar_lea.hbm %s4221_s7, 4096 }
  0x58   :  { %s88_s23 = sshll.u32 %s3716_s18, 4  ;;  %p3607_p12 = scmp.ne.s32.totalorder %s4221_s7, %s3606_s29  ;;  %s89_s23 = int_to_ptr.vmem [resolvable:$true] %s88_s23 }
  0x59   :  { %p3610_p13 = scmp.lt.u32.totalorder %s3606_s29, %s4221_s7 }
  0x5b   :  { %p3612_p0 = pnand %p3610_p13, %p3607_p12 }
  0x5d   :  { %3615 = shalt.err (!%p3612_p0)
}
  0x5e   :  { %s3616_s15 = scalar_lea.vmem %s89_s23, 4096  ;;  %p3621_p2 = scmp.lt.s32.totalorder %s89_s23, %s89_s23 }
  0x5f   :  { %p3617_p1 = scmp.ne.s32.totalorder %s89_s23, %s3616_s15  ;;  %p3622_p3 = scmp.lt.s32.totalorder %s3616_s15, %s3616_s15 }
  0x61   :  { %p3623_p4 = por %p3622_p3, %p3621_p2 }
  0x63   :  { %p3624_p5 = pnand %p3623_p4, %p3617_p1 }
  0x65   :  { %3627 = shalt.err (!%p3624_p5)
}
  0x66   :  { %94 = dma.hbm_to_vmem [thread:$0]  %s4221_s7, 4096, %s89_s23, [#allocation12], %s3708_s28, %s3708_s28, %s3710_s1  }
  0x67   :  { %3694 = dma.done.wait [#allocation3], 128  }
  0x68   :  { %3695 = vsyncadd [#allocation3], 4294967168 }
  0x69   :  { %3696 = dma.done.wait [#allocation6], 8448  }
  0x6a   :  { %3697 = vsyncadd [#allocation6], 4294958848 }
  0x6b   :  { %3698 = dma.done.wait [#allocation9], 36864  }
  0x6c   :  { %3699 = vsyncadd [#allocation9], 4294930432 }
  0x6d   :  { %3700 = dma.done.wait [#allocation12], 4096  }
  0x6e   :  { %3701 = vsyncadd [#allocation12], 4294963200  ;;  %v3717_v0 = vmov 0.0   ;;  %v117_v1 = vld [vmem:[#allocation5 + $0x8] sm:$0xff]  ;;  %v116_v3 = vld [vmem:[#allocation5] sm:$0xff]  ;;  %vm264_vm0 = vcmask 261120  }
  0x6f   :  { %332 = vmatprep.mubr.f32.mxu1 %v3717_v0  ;;  %616 = vmatprep.mubr.f32.mxu0 %v3717_v0  ;;  %v133_v2 = vld [vmem:[#allocation5 + $0x88] sm:$0xff]  ;;  %v132_v5 = vld [vmem:[#allocation5 + $0x80] sm:$0xff]  ;;  %v119_v12 = vld [vmem:[#allocation5 + $0x18] sm:$0xff]  ;;  %s3718_s16 = smov [#allocation14]  }
  0x70   :  { %v2811_v4 = vpack.c.bf16 %v133_v2, %v117_v1  ;;  %v149_v6 = vld [vmem:[#allocation5 + $0x108] sm:$0xff]  ;;  %v2813_v8 = vpack.c.bf16 %v132_v5, %v116_v3  ;;  %v148_v10 = vld [vmem:[#allocation5 + $0x100] sm:$0xff]  ;;  %v135_v13 = vld [vmem:[#allocation5 + $0x98] sm:$0xff]  ;;  %s2457_s17 = sshll.u32 %s3718_s16, 4  ;;  %s2458_s17 = int_to_ptr.vmem [resolvable:$true] %s2457_s17 }
  0x71   :  { %v165_v7 = vld [vmem:[#allocation5 + $0x188] sm:$0xff]  ;;  %v164_v11 = vld [vmem:[#allocation5 + $0x180] sm:$0xff]  ;;  %v2819_v15 = vpack.c.bf16 %v135_v13, %v119_v12  ;;  %v118_v16 = vld [vmem:[#allocation5 + $0x10] sm:$0xff]  ;;  %s3628_s3 = scalar_lea.vmem %s2458_s17, 1024  ;;  %p3633_p7 = scmp.lt.s32.totalorder %s2458_s17, %s2458_s17 }
  0x72   :  { %v2815_v9 = vpack.c.bf16 %v165_v7, %v149_v6  ;;  %2812 = vmatprep.subr.bf16.mxu1 %v2811_v4  ;;  %v2817_v14 = vpack.c.bf16 %v164_v11, %v148_v10  ;;  %v134_v17 = vld [vmem:[#allocation5 + $0x90] sm:$0xff]  ;;  %v151_v18 = vld [vmem:[#allocation5 + $0x118] sm:$0xff]  ;;  %v121_v25 = vld [vmem:[#allocation5 + $0x28] sm:$0xff]  ;;  %p3629_p6 = scmp.ne.s32.totalorder %s2458_s17, %s3628_s3  ;;  %p3634_p8 = scmp.lt.s32.totalorder %s3628_s3, %s3628_s3 }
  0x73   :  { %2814 = vmatpush1.bf16.msra.mxu1 %v2813_v8  ;;  %v167_v19 = vld [vmem:[#allocation5 + $0x198] sm:$0xff]  ;;  %v2821_v21 = vpack.c.bf16 %v134_v17, %v118_v16  ;;  %v150_v23 = vld [vmem:[#allocation5 + $0x110] sm:$0xff]  ;;  %v137_v26 = vld [vmem:[#allocation5 + $0xa8] sm:$0xff] }
  0x74   :  { %2816 = vmatprep.subr.bf16.mxu1 %v2815_v9  ;;  %v3862_v20 = vld [vmem:[#allocation2] sm:$0xff]  ;;  %v2823_v22 = vpack.c.bf16 %v167_v19, %v151_v18  ;;  %v166_v24 = vld [vmem:[#allocation5 + $0x190] sm:$0xff]  ;;  %v120_v27 = vld [vmem:[#allocation5 + $0x20] sm:$0xff]  ;;  %v2827_v36 = vpack.c.bf16 %v137_v26, %v121_v25  ;;  %p3635_p9 = por %p3634_p8, %p3633_p7 }
  0x75   :  { %v125_v28 = vld [vmem:[#allocation5 + $0x48] sm:$0xff]  ;;  %v124_v30 = vld [vmem:[#allocation5 + $0x40] sm:$0xff]  ;;  %v2825_v31 = vpack.c.bf16 %v166_v24, %v150_v23  ;;  %v123_v55 = vld [vmem:[#allocation5 + $0x38] sm:$0xff] }
  0x76   :  { %v141_v29 = vld [vmem:[#allocation5 + $0xc8] sm:$0xff]  ;;  %v140_v33 = vld [vmem:[#allocation5 + $0xc0] sm:$0xff]  ;;  %v139_v56 = vld [vmem:[#allocation5 + $0xb8] sm:$0xff]  ;;  %p3636_p10 = pnand %p3635_p9, %p3629_p6 }
  0x77   :  { %2818 = vmatpush1.bf16.msra.mxu1 %v2817_v14  ;;  %v2843_v32 = vpack.c.bf16 %v141_v29, %v125_v28  ;;  %v157_v34 = vld [vmem:[#allocation5 + $0x148] sm:$0xff]  ;;  %v136_v37 = vld [vmem:[#allocation5 + $0xa0] sm:$0xff]  ;;  %v2845_v38 = vpack.c.bf16 %v140_v33, %v124_v30  ;;  %v2835_v63 = vpack.c.bf16 %v139_v56, %v123_v55  ;;  %v122_v1 = vld [vmem:[#allocation5 + $0x30] sm:$0xff] }
  0x78   :  { %2820 = vmatprep.subr.bf16.mxu1 %v2819_v15  ;;  %v173_v35 = vld [vmem:[#allocation5 + $0x1c8] sm:$0xff]  ;;  %v156_v40 = vld [vmem:[#allocation5 + $0x140] sm:$0xff]  ;;  %v2829_v46 = vpack.c.bf16 %v136_v37, %v120_v27  ;;  %v138_v2 = vld [vmem:[#allocation5 + $0xb0] sm:$0xff] }
  0x79   :  { %v2847_v39 = vpack.c.bf16 %v173_v35, %v157_v34  ;;  %v172_v41 = vld [vmem:[#allocation5 + $0x1c0] sm:$0xff]  ;;  %v153_v42 = vld [vmem:[#allocation5 + $0x128] sm:$0xff]  ;;  %2844 = vmatprep.subr.bf16.mxu0 %v2843_v32  ;;  %v155_v3 = vld [vmem:[#allocation5 + $0x138] sm:$0xff]  ;;  %v2837_v8 = vpack.c.bf16 %v138_v2, %v122_v1 }
  0x7a   :  { %2486 = vmatmul.mubr.msk.f32.vlgmr.msra.gmra.mrb[0].mxu1 %vm264_vm0, %v3862_v20  ;;  %v169_v43 = vld [vmem:[#allocation5 + $0x1a8] sm:$0xff]  ;;  %v152_v44 = vld [vmem:[#allocation5 + $0x120] sm:$0xff]  ;;  %2846 = vmatpush1.bf16.msra.mxu0 %v2845_v38  ;;  %v2849_v45 = vpack.c.bf16 %v172_v41, %v156_v40  ;;  %v171_v4 = vld [vmem:[#allocation5 + $0x1b8] sm:$0xff] }
  0x7b   :  { %2822 = vmatpush1.bf16.msra.mxu1 %v2821_v21  ;;  %403 = vmatprep.mubr.f32.mxu1 %v3717_v0  ;;  %v168_v47 = vld [vmem:[#allocation5 + $0x1a0] sm:$0xff]  ;;  %v129_v48 = vld [vmem:[#allocation5 + $0x68] sm:$0xff]  ;;  %v2831_v50 = vpack.c.bf16 %v169_v43, %v153_v42  ;;  %v882_v5 = vld [vmem:[#allocation8 + $0x80] sm:$0xff]  ;;  %v2839_v12 = vpack.c.bf16 %v171_v4, %v155_v3 }
  0x7c   :  { %2824 = vmatprep.subr.bf16.mxu1 %v2823_v22  ;;  %2848 = vmatprep.subr.bf16.mxu0 %v2847_v39  ;;  %v145_v49 = vld [vmem:[#allocation5 + $0xe8] sm:$0xff]  ;;  %v128_v52 = vld [vmem:[#allocation5 + $0x60] sm:$0xff]  ;;  %v2833_v59 = vpack.c.bf16 %v168_v47, %v152_v44  ;;  %v883_v6 = vld [vmem:[#allocation8 + $0x88] sm:$0xff] }
  0x7d   :  { %v2859_v51 = vpack.c.bf16 %v145_v49, %v129_v48  ;;  %v144_v53 = vld [vmem:[#allocation5 + $0xe0] sm:$0xff]  ;;  %v161_v54 = vld [vmem:[#allocation5 + $0x168] sm:$0xff]  ;;  %v154_v9 = vld [vmem:[#allocation5 + $0x130] sm:$0xff]  ;;  %v3873_v14 = vpack.c.bf16 %v883_v6, %v882_v5 }
  0x7e   :  { %v177_v57 = vld [vmem:[#allocation5 + $0x1e8] sm:$0xff]  ;;  %2850 = vmatpush1.bf16.msra.mxu0 %v2849_v45  ;;  %v2861_v58 = vpack.c.bf16 %v144_v53, %v128_v52  ;;  %v160_v61 = vld [vmem:[#allocation5 + $0x160] sm:$0xff]  ;;  %v866_v10 = vld [vmem:[#allocation8] sm:$0xff] }
  0x7f   :  { %2826 = vmatpush1.bf16.msra.mxu1 %v2825_v31  ;;  %v2863_v60 = vpack.c.bf16 %v177_v57, %v161_v54  ;;  %v176_v62 = vld [vmem:[#allocation5 + $0x1e0] sm:$0xff]  ;;  %2860 = vmatprep.subr.bf16.mxu0 %v2859_v51  ;;  %v867_v11 = vld [vmem:[#allocation8 + $0x8] sm:$0xff]  ;;  %v170_v13 = vld [vmem:[#allocation5 + $0x1b0] sm:$0xff] }
  0x80   :  { %2828 = vmatprep.subr.bf16.mxu1 %v2827_v36  ;;  %v2865_v7 = vpack.c.bf16 %v176_v62, %v160_v61  ;;  %v884_v15 = vld [vmem:[#allocation8 + $0x90] sm:$0xff]  ;;  %v885_v16 = vld [vmem:[#allocation8 + $0x98] sm:$0xff]  ;;  %v127_v17 = vld [vmem:[#allocation5 + $0x58] sm:$0xff]  ;;  %v3877_v19 = vpack.c.bf16 %v867_v11, %v866_v10  ;;  %v2841_v21 = vpack.c.bf16 %v170_v13, %v154_v9 }
  0x81   :  { %2490 = vmatmul.mubr.msk.f32.vlgmr.msra.gmra.mrb[0].mxu0 %vm264_vm0, %v3862_v20  ;;  %v143_v18 = vld [vmem:[#allocation5 + $0xd8] sm:$0xff]  ;;  %v3880_v22 = vpack.c.bf16 %v885_v16, %v884_v15  ;;  %v868_v23 = vld [vmem:[#allocation8 + $0x10] sm:$0xff]  ;;  %v869_v24 = vld [vmem:[#allocation8 + $0x18] sm:$0xff] }
  0x82   :  { %2487 = vmatmul.mubr.msk.f32.vlgmr.msra.gmra.mrb[2].mxu1 %vm264_vm0, %v3862_v20  ;;  %2862 = vmatpush1.bf16.msra.mxu0 %v2861_v58  ;;  %v2851_v25 = vpack.c.bf16 %v143_v18, %v127_v17  ;;  %v126_v26 = vld [vmem:[#allocation5 + $0x50] sm:$0xff]  ;;  %v159_v28 = vld [vmem:[#allocation5 + $0x158] sm:$0xff]  ;;  %v3886_v32 = vpack.c.bf16 %v869_v24, %v868_v23  ;;  %v888_v40 = vld [vmem:[#allocation8 + $0xb0] sm:$0xff]  ;;  %v184_v24 = vlaneseq }
  0x83   :  { %2830 = vmatpush1.bf16.msra.mxu1 %v2829_v46  ;;  %474 = vmatprep.mubr.f32.mxu1 %v3717_v0  ;;  %v142_v27 = vld [vmem:[#allocation5 + $0xd0] sm:$0xff]  ;;  %v175_v29 = vld [vmem:[#allocation5 + $0x1d8] sm:$0xff]  ;;  %v889_v41 = vld [vmem:[#allocation8 + $0xb8] sm:$0xff] }
  0x84   :  { %2832 = vmatprep.subr.bf16.mxu1 %v2831_v50  ;;  %758 = vmatprep.mubr.f32.mxu0 %v3717_v0  ;;  %v886_v30 = vld [vmem:[#allocation8 + $0xa0] sm:$0xff]  ;;  %v887_v31 = vld [vmem:[#allocation8 + $0xa8] sm:$0xff]  ;;  %v2853_v33 = vpack.c.bf16 %v142_v27, %v126_v26  ;;  %v2855_v37 = vpack.c.bf16 %v175_v29, %v159_v28  ;;  %v3897_v46 = vpack.c.bf16 %v889_v41, %v888_v40  ;;  %v872_v47 = vld [vmem:[#allocation8 + $0x30] sm:$0xff] }
  0x85   :  { %2864 = vmatprep.subr.bf16.mxu0 %v2863_v60  ;;  %v158_v34 = vld [vmem:[#allocation5 + $0x150] sm:$0xff]  ;;  %v871_v36 = vld [vmem:[#allocation8 + $0x28] sm:$0xff]  ;;  %v3889_v39 = vpack.c.bf16 %v887_v31, %v886_v30  ;;  %v873_v48 = vld [vmem:[#allocation8 + $0x38] sm:$0xff] }
  0x86   :  { %2866 = vmatpush1.bf16.msra.mxu0 %v2865_v7  ;;  %v870_v35 = vld [vmem:[#allocation8 + $0x20] sm:$0xff]  ;;  %v131_v42 = vld [vmem:[#allocation5 + $0x78] sm:$0xff]  ;;  %v3901_v54 = vpack.c.bf16 %v873_v48, %v872_v47  ;;  %v892_v2 = vld [vmem:[#allocation8 + $0xd0] sm:$0xff] }
  0x87   :  { %2834 = vmatpush1.bf16.msra.mxu1 %v2833_v59  ;;  %2876 = vmatprep.subr.bf16.mxu0 %v3873_v14  ;;  %v174_v38 = vld [vmem:[#allocation5 + $0x1d0] sm:$0xff]  ;;  %v147_v43 = vld [vmem:[#allocation5 + $0xf8] sm:$0xff]  ;;  %v3894_v44 = vpack.c.bf16 %v871_v36, %v870_v35  ;;  %v893_v3 = vld [vmem:[#allocation8 + $0xd8] sm:$0xff] }
  0x88   :  { %2836 = vmatprep.subr.bf16.mxu1 %v2835_v63  ;;  %v2857_v45 = vpack.c.bf16 %v174_v38, %v158_v34  ;;  %v2867_v49 = vpack.c.bf16 %v147_v43, %v131_v42  ;;  %v130_v50 = vld [vmem:[#allocation5 + $0x70] sm:$0xff]  ;;  %v163_v52 = vld [vmem:[#allocation5 + $0x178] sm:$0xff]  ;;  %v3926_v4 = vpack.c.bf16 %v893_v3, %v892_v2  ;;  %v876_v5 = vld [vmem:[#allocation8 + $0x50] sm:$0xff] }
  0x89   :  { %2492 = vmatmul.mubr.msk.f32.vlgmr.msra.gmra.mrb[2].mxu0 %vm264_vm0, %v3862_v20  ;;  %v146_v51 = vld [vmem:[#allocation5 + $0xf0] sm:$0xff]  ;;  %v179_v53 = vld [vmem:[#allocation5 + $0x1f8] sm:$0xff]  ;;  %v877_v6 = vld [vmem:[#allocation8 + $0x58] sm:$0xff] }
  0x8a   :  { %2488 = vmatmul.mubr.msk.f32.vlgmr.msra.gmra.mrb[4].mxu1 %vm264_vm0, %v3862_v20  ;;  %2878 = vmatpush3.bf16.msra.mxu0 %v3877_v19  ;;  %v2869_v55 = vpack.c.bf16 %v146_v51, %v130_v50  ;;  %v2871_v56 = vpack.c.bf16 %v179_v53, %v163_v52  ;;  %v162_v57 = vld [vmem:[#allocation5 + $0x170] sm:$0xff]  ;;  %v891_v61 = vld [vmem:[#allocation8 + $0xc8] sm:$0xff]  ;;  %v3928_v7 = vpack.c.bf16 %v877_v6, %v876_v5  ;;  %v896_v15 = vld [vmem:[#allocation8 + $0xf0] sm:$0xff] }
  0x8b   :  { %2838 = vmatpush1.bf16.msra.mxu1 %v2837_v8  ;;  %545 = vmatprep.mubr.f32.mxu1 %v3717_v0  ;;  %v178_v58 = vld [vmem:[#allocation5 + $0x1f0] sm:$0xff]  ;;  %v895_v9 = vld [vmem:[#allocation8 + $0xe8] sm:$0xff]  ;;  %v897_v16 = vld [vmem:[#allocation8 + $0xf8] sm:$0xff] }
  0x8c   :  { %2840 = vmatprep.subr.bf16.mxu1 %v2839_v12  ;;  %2880 = vmatprep.subr.bf16.mxu0 %v3880_v22  ;;  %v2873_v59 = vpack.c.bf16 %v178_v58, %v162_v57  ;;  %v890_v60 = vld [vmem:[#allocation8 + $0xc0] sm:$0xff]  ;;  %v879_v12 = vld [vmem:[#allocation8 + $0x68] sm:$0xff]  ;;  %v3942_v17 = vpack.c.bf16 %v897_v16, %v896_v15  ;;  %v880_v18 = vld [vmem:[#allocation8 + $0x70] sm:$0xff] }
  0x8d   :  { %v3918_v62 = vpack.c.bf16 %v891_v61, %v890_v60  ;;  %v874_v63 = vld [vmem:[#allocation8 + $0x40] sm:$0xff]  ;;  %v180_v27 = vld [vmem:[#allocation7] sm:$0xff]  ;;  %v3963_v40 = vld [vmem:[#allocation7 + $0x8] sm:$0xff] }
  0x8e   :  { %2882 = vmatpush3.bf16.msra.mxu0 %v3886_v32  ;;  %v894_v8 = vld [vmem:[#allocation8 + $0xe0] sm:$0xff] }
  0x8f   :  { %2842 = vmatpush1.bf16.msra.mxu1 %v2841_v21  ;;  %2884 = vmatprep.subr.bf16.mxu0 %v3889_v39  ;;  %v3934_v10 = vpack.c.bf16 %v895_v9, %v894_v8  ;;  %v878_v11 = vld [vmem:[#allocation8 + $0x60] sm:$0xff]  ;;  %v881_v21 = vld [vmem:[#allocation8 + $0x78] sm:$0xff] }
  0x90   :  { %2852 = vmatprep.subr.bf16.mxu1 %v2851_v25  ;;  %v3936_v13 = vpack.c.bf16 %v879_v12, %v878_v11  ;;  %v3944_v23 = vpack.c.bf16 %v881_v21, %v880_v18  ;;  %v3951_v25 = vshrl.u32 %v184_v24, 7 }
  0x92   :  { %2489 = vmatmul.mubr.msk.f32.vlgmr.msra.gmra.mrb[6].mxu1 %vm264_vm0, %v3862_v20  ;;  %2886 = vmatpush3.bf16.msra.mxu0 %v3894_v44  ;;  %v3954_v26 = vsub.s32 0, %v3951_v25  ;;  %v3957_v28 = vsub.s32 1, %v3951_v25  ;;  %v194_v35 = vsub.s32 2, %v3951_v25  ;;  %v202_v48 = vsub.s32 4, %v3951_v25 }
  0x93   :  { %2854 = vmatpush1.bf16.msra.mxu1 %v2853_v33  ;;  %687 = vmatprep.mubr.f32.mxu1 %v3717_v0  ;;  %v206_v51 = vsub.s32 5, %v3951_v25  ;;  %v210_v2 = vsub.s32 6, %v3951_v25  ;;  %v214_v5 = vsub.s32 7, %v3951_v25 }
  0x94   :  { %2856 = vmatprep.subr.bf16.mxu1 %v2855_v37  ;;  %2888 = vmatprep.subr.bf16.mxu0 %v3897_v46  ;;  %v187_v29 = vrot.slane %v180_v27, %v3954_v26  ;;  %v191_v30 = vrot.slane %v180_v27, %v3957_v28  ;;  %v198_v37 = vsub.s32 3, %v3951_v25  ;;  %v195_v38 = vrot.slane %v180_v27, %v194_v35 }
  0x95   :  { %v219_v43 = vrot.slane %v3963_v40, %v3954_v26  ;;  %v203_v57 = vrot.slane %v180_v27, %v202_v48  ;;  %v207_v60 = vrot.slane %v180_v27, %v206_v51  ;;  %v211_v8 = vrot.slane %v180_v27, %v210_v2 }
  0x96   :  { %2890 = vmatpush3.bf16.msra.mxu0 %v3901_v54  ;;  %v199_v41 = vrot.slane %v180_v27, %v198_v37  ;;  %v215_v11 = vrot.slane %v180_v27, %v214_v5 }
  0x97   :  { %2858 = vmatpush1.bf16.msra.mxu1 %v2857_v45  ;;  %2892 = vmatprep.subr.bf16.mxu0 %v3918_v62 }
  0x98   :  { %2868 = vmatprep.subr.bf16.mxu1 %v2867_v49  ;;  %v223_v49 = vrot.slane %v3963_v40, %v3957_v28 }
  0x9a   :  { %2491 = vmatmul.mubr.msk.f32.vlgmr.msra.gmra.mrb[8].mxu1 %vm264_vm0, %v3862_v20 }
  0x9b   :  { %2870 = vmatpush1.bf16.msra.mxu1 %v2869_v55  ;;  %829 = vmatprep.mubr.f32.mxu1 %v3717_v0 }
  0x9c   :  { %2872 = vmatprep.subr.bf16.mxu1 %v2871_v56 }
  0x9f   :  { %2874 = vmatpush1.bf16.msra.mxu1 %v2873_v59 }
  0xa0   :  { %2908 = vmatprep.subr.bf16.mxu1 %v3873_v14 }
  0xa2   :  { %2493 = vmatmul.mubr.msk.f32.vlgmr.msra.gmra.mrb[10].mxu1 %vm264_vm0, %v3862_v20  ;;  %v875_v20 = vld [vmem:[#allocation8 + $0x48] sm:$0xff] }
  0xa3   :  { %2910 = vmatpush3.bf16.msra.mxu1 %v3877_v19  ;;  %v3920_v1 = vpack.c.bf16 %v875_v20, %v874_v63 }
  0xa4   :  { %2912 = vmatprep.subr.bf16.mxu1 %v3880_v22 }
  0xa5   :  { %2894 = vmatpush3.bf16.msra.mxu0 %v3920_v1 }
  0xa6   :  { %2896 = vmatprep.subr.bf16.mxu0 %v3926_v4 }
  0xa7   :  { %2914 = vmatpush3.bf16.msra.mxu1 %v3886_v32 }
  0xa8   :  { %2916 = vmatprep.subr.bf16.mxu1 %v3889_v39 }
  0xa9   :  { %2898 = vmatpush3.bf16.msra.mxu0 %v3928_v7 }
  0xaa   :  { %2900 = vmatprep.subr.bf16.mxu0 %v3934_v10 }
  0xab   :  { %2918 = vmatpush3.bf16.msra.mxu1 %v3894_v44 }
  0xac   :  { %2920 = vmatprep.subr.bf16.mxu1 %v3897_v46 }
  0xad   :  { %2902 = vmatpush3.bf16.msra.mxu0 %v3936_v13 }
  0xae   :  { %2904 = vmatprep.subr.bf16.mxu0 %v3942_v17 }
  0xaf   :  { %2922 = vmatpush3.bf16.msra.mxu1 %v3901_v54 }
  0xb0   :  { %2924 = vmatprep.subr.bf16.mxu1 %v3918_v62 }
  0xb1   :  { %2906 = vmatpush3.bf16.msra.mxu0 %v3944_v23 }
  0xb3   :  { %2926 = vmatpush3.bf16.msra.mxu1 %v3920_v1 }
  0xb4   :  { %2928 = vmatprep.subr.bf16.mxu1 %v3926_v4 }
  0xb7   :  { %2930 = vmatpush3.bf16.msra.mxu1 %v3928_v7 }
  0xb8   :  { %2932 = vmatprep.subr.bf16.mxu1 %v3934_v10 }
  0xbb   :  { %2934 = vmatpush3.bf16.msra.mxu1 %v3936_v13 }
  0xbc   :  { %2936 = vmatprep.subr.bf16.mxu1 %v3942_v17 }
  0xbf   :  { %2938 = vmatpush3.bf16.msra.mxu1 %v3944_v23 }
  0xc0   :  { %3004 = vmatprep.subr.bf16.mxu1 %v3873_v14 }
 0x14d   :  { %v334_v31 = vpop.f32.mrb[0].mxu1 }
 0x14e   :  { %v335_v33 = vadd.f32 %v334_v31, %v187_v29  ;;  %v336_v34 = vpop.f32.mrb[1].mxu1  ;;  %v227_v29 = vrot.slane %v3963_v40, %v194_v35  ;;  %v231_v31 = vrot.slane %v3963_v40, %v198_v37  ;;  %v235_v37 = vrot.slane %v3963_v40, %v202_v48 }
 0x14f   :  { %v337_v36 = vadd.f32 %v336_v34, %v191_v30 }
 0x150   :  { %3448 = vtanh.f32 %v335_v33 }
 0x151   :  { %3450 = vtanh.f32 %v337_v36 }
 0x154   :  { %v618_v52 = vpop.f32.mrb[0].mxu0 }
 0x155   :  { %v405_v42 = vpop.f32.mrb[2].mxu1  ;;  %v619_v53 = vadd.f32 %v618_v52, %v219_v43  ;;  %v620_v55 = vpop.f32.mrb[1].mxu0 }
 0x156   :  { %v406_v45 = vadd.f32 %v405_v42, %v195_v38  ;;  %v407_v47 = vpop.f32.mrb[3].mxu1  ;;  %v621_v58 = vadd.f32 %v620_v55, %v223_v49 }
 0x157   :  { %v408_v50 = vadd.f32 %v407_v47, %v199_v41 }
 0x158   :  { %3452 = vtanh.f32 %v406_v45  ;;  %v239_v45 = vrot.slane %v3963_v40, %v206_v51 }
 0x159   :  { %3454 = vtanh.f32 %v408_v50 }
 0x15a   :  { %v3449_v56 = vpop.eup %3448  ;;  %3456 = vtanh.f32 %v619_v53  ;;  %v243_v53 = vrot.slane %v3963_v40, %v210_v2  ;;  %v1086_v2 = vld [vmem:[#allocation10 + $0x128] sm:$0xff] }
 0x15b   :  { %v3451_v59 = vpop.eup %3450  ;;  %3458 = vtanh.f32 %v621_v58 }
 0x15c   :  { %852 = vst [vmem:[#allocation16] sm:$0xff] %v3451_v59  ;;  %969 = vmatprep.mubr.f32.mxu0 %v3451_v59  ;;  %v760_v42 = vpop.f32.mrb[2].mxu0  ;;  %v1082_v59 = vld [vmem:[#allocation10 + $0x108] sm:$0xff] }
 0x15d   :  { %970 = vmatmul.mubr.f32.vlgmr.msra.gmra.mrb[4].mxu0 %v3449_v56  ;;  %v476_v61 = vpop.f32.mrb[4].mxu1  ;;  %v761_v43 = vadd.f32 %v760_v42, %v235_v37  ;;  %v762_v47 = vpop.f32.mrb[3].mxu0  ;;  %v1097_v42 = vld [vmem:[#allocation10 + $0x180] sm:$0xff] }
 0x15e   :  { %v477_v63 = vadd.f32 %v476_v61, %v203_v57  ;;  %v478_v20 = vpop.f32.mrb[5].mxu1  ;;  %1177 = vmatprep.mubr.f32.mxu0 %v3717_v0  ;;  %v763_v49 = vadd.f32 %v762_v47, %v239_v45  ;;  %v1081_v61 = vld [vmem:[#allocation10 + $0x100] sm:$0xff]  ;;  %v1102_v47 = vld [vmem:[#allocation10 + $0x1a8] sm:$0xff] }
 0x15f   :  { %v479_v3 = vadd.f32 %v478_v20, %v207_v60  ;;  %v1084_v60 = vld [vmem:[#allocation10 + $0x118] sm:$0xff]  ;;  %v1083_v20 = vld [vmem:[#allocation10 + $0x110] sm:$0xff] }
 0x160   :  { %3460 = vtanh.f32 %v477_v63  ;;  %v2939_v63 = vpack.c.bf16 %v1084_v60, %v1082_v59  ;;  %v1106_v60 = vld [vmem:[#allocation10 + $0x1c8] sm:$0xff] }
 0x161   :  { %3462 = vtanh.f32 %v479_v3  ;;  %v1088_v3 = vld [vmem:[#allocation10 + $0x138] sm:$0xff] }
 0x162   :  { %v3453_v6 = vpop.eup %3452  ;;  %2940 = vmatprep.subr.bf16.mxu0 %v2939_v63 }
 0x163   :  { %v3455_v9 = vpop.eup %3454  ;;  %853 = vst [vmem:[#allocation16 + $0x8] sm:$0xff] %v3453_v6 }
 0x164   :  { %854 = vst [vmem:[#allocation16 + $0x10] sm:$0xff] %v3455_v9  ;;  %1073 = vmatprep.mubr.f32.mxu1 %v3455_v9  ;;  %v3984_v12 = vpop.eup %3456  ;;  %v1085_v9 = vld [vmem:[#allocation10 + $0x120] sm:$0xff] }
 0x165   :  { %1074 = vmatmul.mubr.f32.vlgmr.msra.gmra.mrb[12].mxu1 %v3453_v6  ;;  %v547_v15 = vpop.f32.mrb[6].mxu1  ;;  %v3986_v16 = vpop.eup %3458  ;;  %859 = vst [vmem:[#allocation16 + $0x38] sm:$0xff] %v3984_v12  ;;  %v2941_v6 = vpack.c.bf16 %v1083_v20, %v1081_v61  ;;  %v1108_v61 = vld [vmem:[#allocation10 + $0x1d8] sm:$0xff]  ;;  %v1105_v20 = vld [vmem:[#allocation10 + $0x1c0] sm:$0xff] }
 0x166   :  { %3006 = vmatpush3.bf16.msra.mxu1 %v3877_v19  ;;  %v548_v18 = vadd.f32 %v547_v15, %v211_v8  ;;  %v549_v21 = vpop.f32.mrb[7].mxu1  ;;  %860 = vst [vmem:[#allocation16 + $0x40] sm:$0xff] %v3986_v16  ;;  %v2943_v8 = vpack.c.bf16 %v1088_v3, %v1086_v2  ;;  %v2963_v63 = vpack.c.bf16 %v1108_v61, %v1106_v60  ;;  %v1107_v2 = vld [vmem:[#allocation10 + $0x1d0] sm:$0xff]  ;;  %v1002_v60 = vld [vmem:[#allocation10 + $0xc8] sm:$0xff]  ;;  %v1004_v61 = vld [vmem:[#allocation10 + $0xd8] sm:$0xff] }
 0x167   :  { %3008 = vmatprep.subr.bf16.mxu1 %v3880_v22  ;;  %v550_v24 = vadd.f32 %v549_v21, %v215_v11  ;;  %v1087_v11 = vld [vmem:[#allocation10 + $0x130] sm:$0xff]  ;;  %2942 = vmatpush1.bf16.msra.mxu0 %v2941_v6  ;;  %v2965_v3 = vpack.c.bf16 %v1107_v2, %v1105_v20  ;;  %v1110_v6 = vld [vmem:[#allocation10 + $0x1e8] sm:$0xff] }
 0x168   :  { %3464 = vtanh.f32 %v548_v18  ;;  %v2945_v15 = vpack.c.bf16 %v1087_v11, %v1085_v9  ;;  %2944 = vmatprep.subr.bf16.mxu0 %v2943_v8  ;;  %v1092_v18 = vld [vmem:[#allocation10 + $0x158] sm:$0xff]  ;;  %v1109_v11 = vld [vmem:[#allocation10 + $0x1e0] sm:$0xff] }
 0x169   :  { %3466 = vtanh.f32 %v550_v24  ;;  %v1089_v24 = vld [vmem:[#allocation10 + $0x140] sm:$0xff]  ;;  %v1112_v8 = vld [vmem:[#allocation10 + $0x1f8] sm:$0xff] }
 0x16a   :  { %v3461_v27 = vpop.eup %3460  ;;  %3010 = vmatpush3.bf16.msra.mxu1 %v3886_v32  ;;  %v2967_v9 = vpack.c.bf16 %v1112_v8, %v1110_v6  ;;  %v2995_v6 = vpack.c.bf16 %v1004_v61, %v1002_v60  ;;  %v1001_v8 = vld [vmem:[#allocation10 + $0xc0] sm:$0xff]  ;;  %v1353_v61 = vld [vmem:[#allocation10 + $0x2d0] sm:$0xff] }
 0x16b   :  { %v3463_v30 = vpop.eup %3462  ;;  %3012 = vmatprep.subr.bf16.mxu1 %v3889_v39  ;;  %855 = vst [vmem:[#allocation16 + $0x18] sm:$0xff] %v3461_v27  ;;  %2946 = vmatpush1.bf16.msra.mxu0 %v2945_v15  ;;  %v1111_v15 = vld [vmem:[#allocation10 + $0x1f0] sm:$0xff]  ;;  %v1351_v60 = vld [vmem:[#allocation10 + $0x2c0] sm:$0xff] }
 0x16c   :  { %856 = vst [vmem:[#allocation16 + $0x20] sm:$0xff] %v3463_v30  ;;  %1319 = vmatprep.mubr.f32.mxu1 %v3463_v30  ;;  %v1094_v30 = vld [vmem:[#allocation10 + $0x168] sm:$0xff] }
 0x16d   :  { %v689_v33 = vpop.f32.mrb[8].mxu1 }
 0x16e   :  { %3014 = vmatpush3.bf16.msra.mxu1 %v3894_v44  ;;  %v690_v34 = vadd.f32 %v689_v33, %v227_v29  ;;  %v691_v36 = vpop.f32.mrb[9].mxu1 }
 0x16f   :  { %3016 = vmatprep.subr.bf16.mxu1 %v3897_v46  ;;  %v692_v38 = vadd.f32 %v691_v36, %v231_v31  ;;  %v1096_v31 = vld [vmem:[#allocation10 + $0x178] sm:$0xff]  ;;  %v1095_v36 = vld [vmem:[#allocation10 + $0x170] sm:$0xff] }
 0x170   :  { %3468 = vtanh.f32 %v690_v34  ;;  %v2951_v33 = vpack.c.bf16 %v1096_v31, %v1094_v30  ;;  %v1093_v34 = vld [vmem:[#allocation10 + $0x160] sm:$0xff]  ;;  %v990_v30 = vld [vmem:[#allocation10 + $0x68] sm:$0xff]  ;;  %v992_v31 = vld [vmem:[#allocation10 + $0x78] sm:$0xff] }
 0x171   :  { %3470 = vtanh.f32 %v692_v38  ;;  %v2953_v38 = vpack.c.bf16 %v1095_v36, %v1093_v34  ;;  %v2983_v34 = vpack.c.bf16 %v992_v31, %v990_v30  ;;  %v989_v36 = vld [vmem:[#allocation10 + $0x60] sm:$0xff]  ;;  %v1344_v30 = vld [vmem:[#allocation10 + $0x288] sm:$0xff] }
 0x172   :  { %v3465_v35 = vpop.eup %3464  ;;  %3018 = vmatpush3.bf16.msra.mxu1 %v3901_v54  ;;  %3472 = vtanh.f32 %v761_v43  ;;  %v1099_v43 = vld [vmem:[#allocation10 + $0x190] sm:$0xff] }
 0x173   :  { %v3467_v41 = vpop.eup %3466  ;;  %3020 = vmatprep.subr.bf16.mxu1 %v3918_v62  ;;  %857 = vst [vmem:[#allocation16 + $0x28] sm:$0xff] %v3465_v35  ;;  %3474 = vtanh.f32 %v763_v49  ;;  %v2957_v45 = vpack.c.bf16 %v1099_v43, %v1097_v42  ;;  %v1104_v49 = vld [vmem:[#allocation10 + $0x1b8] sm:$0xff]  ;;  %v993_v43 = vld [vmem:[#allocation10 + $0x80] sm:$0xff] }
 0x174   :  { %858 = vst [vmem:[#allocation16 + $0x30] sm:$0xff] %v3467_v41 }
 0x175   :  { %v831_v55 = vpop.f32.mrb[10].mxu1 }
 0x176   :  { %3022 = vmatpush3.bf16.msra.mxu1 %v3920_v1  ;;  %v4039_v56 = vpop.f32.mrb[11].mxu1  ;;  %v832_v57 = vadd.f32 %v831_v55, %v243_v53  ;;  %v2959_v53 = vpack.c.bf16 %v1104_v49, %v1102_v47  ;;  %v1101_v55 = vld [vmem:[#allocation10 + $0x1a0] sm:$0xff]  ;;  %v998_v47 = vld [vmem:[#allocation10 + $0xa8] sm:$0xff]  ;;  %v1000_v49 = vld [vmem:[#allocation10 + $0xb8] sm:$0xff] }
 0x177   :  { %3024 = vmatprep.subr.bf16.mxu1 %v3926_v4 }
 0x178   :  { %3476 = vtanh.f32 %v832_v57  ;;  %v1103_v57 = vld [vmem:[#allocation10 + $0x1b0] sm:$0xff] }
 0x179   :  { %v2961_v59 = vpack.c.bf16 %v1103_v57, %v1101_v55  ;;  %v2991_v55 = vpack.c.bf16 %v1000_v49, %v998_v47  ;;  %v997_v57 = vld [vmem:[#allocation10 + $0xa0] sm:$0xff]  ;;  %v1354_v47 = vld [vmem:[#allocation10 + $0x2d8] sm:$0xff] }
 0x17a   :  { %v4010_v50 = vpop.eup %3468  ;;  %3026 = vmatpush3.bf16.msra.mxu1 %v3928_v7 }
 0x17b   :  { %v4013_v48 = vpop.eup %3470  ;;  %3028 = vmatprep.subr.bf16.mxu1 %v3934_v10  ;;  %861 = vst [vmem:[#allocation16 + $0x48] sm:$0xff] %v4010_v50 }
 0x17c   :  { %862 = vst [vmem:[#allocation16 + $0x50] sm:$0xff] %v4013_v48  ;;  %v4020_v51 = vpop.eup %3472 }
 0x17d   :  { %863 = vst [vmem:[#allocation16 + $0x58] sm:$0xff] %v4020_v51  ;;  %v4025_v52 = vpop.eup %3474 }
 0x17e   :  { %3030 = vmatpush3.bf16.msra.mxu1 %v3936_v13  ;;  %864 = vst [vmem:[#allocation16 + $0x60] sm:$0xff] %v4025_v52 }
 0x17f   :  { %3032 = vmatprep.subr.bf16.mxu1 %v3942_v17 }
 0x182   :  { %3034 = vmatpush3.bf16.msra.mxu1 %v3944_v23  ;;  %v4047_v58 = vpop.eup %3476 }
 0x183   :  { %3068 = vmatprep.subr.bf16.mxu1 %v3873_v14  ;;  %865 = vst [vmem:[#allocation16 + $0x68] sm:$0xff] %v4047_v58 }
 0x185   :  { %1320 = vmatmul.mubr.f32.vlgmr.msra.gmra.mrb[14].mxu1 %v3461_v27  ;;  %v1091_v27 = vld [vmem:[#allocation10 + $0x150] sm:$0xff] }
 0x186   :  { %3070 = vmatpush3.bf16.msra.mxu1 %v3877_v19  ;;  %1496 = vmatprep.mubr.f32.mxu1 %v3467_v41  ;;  %v2949_v29 = vpack.c.bf16 %v1091_v27, %v1089_v24  ;;  %v1100_v41 = vld [vmem:[#allocation10 + $0x198] sm:$0xff]  ;;  %v985_v27 = vld [vmem:[#allocation10 + $0x40] sm:$0xff] }
 0x187   :  { %3072 = vmatprep.subr.bf16.mxu1 %v3880_v22 }
 0x18a   :  { %3074 = vmatpush3.bf16.msra.mxu1 %v3886_v32 }
 0x18b   :  { %3076 = vmatprep.subr.bf16.mxu1 %v3889_v39 }
 0x18e   :  { %3078 = vmatpush3.bf16.msra.mxu1 %v3894_v44 }
 0x18f   :  { %3080 = vmatprep.subr.bf16.mxu1 %v3897_v46 }
 0x192   :  { %3082 = vmatpush3.bf16.msra.mxu1 %v3901_v54 }
 0x193   :  { %3084 = vmatprep.subr.bf16.mxu1 %v3918_v62 }
 0x196   :  { %3086 = vmatpush3.bf16.msra.mxu1 %v3920_v1 }
 0x197   :  { %3088 = vmatprep.subr.bf16.mxu1 %v3926_v4 }
 0x19a   :  { %3090 = vmatpush3.bf16.msra.mxu1 %v3928_v7 }
 0x19b   :  { %3092 = vmatprep.subr.bf16.mxu1 %v3934_v10 }
 0x19e   :  { %3094 = vmatpush3.bf16.msra.mxu1 %v3936_v13 }
 0x19f   :  { %3096 = vmatprep.subr.bf16.mxu1 %v3942_v17 }
 0x1a2   :  { %3098 = vmatpush3.bf16.msra.mxu1 %v3944_v23 }
 0x1a3   :  { %3132 = vmatprep.subr.bf16.mxu1 %v3873_v14 }
 0x1a5   :  { %1497 = vmatmul.mubr.f32.vlgmr.msra.gmra.mrb[16].mxu1 %v3465_v35  ;;  %v1098_v35 = vld [vmem:[#allocation10 + $0x188] sm:$0xff] }
 0x1a6   :  { %3134 = vmatpush3.bf16.msra.mxu1 %v3877_v19  ;;  %1673 = vmatprep.mubr.f32.mxu1 %v3986_v16  ;;  %v1090_v16 = vld [vmem:[#allocation10 + $0x148] sm:$0xff]  ;;  %v2955_v37 = vpack.c.bf16 %v1100_v41, %v1098_v35  ;;  %v996_v41 = vld [vmem:[#allocation10 + $0x98] sm:$0xff] }
 0x1a7   :  { %3136 = vmatprep.subr.bf16.mxu1 %v3880_v22  ;;  %v2947_v21 = vpack.c.bf16 %v1092_v18, %v1090_v16  ;;  %v2969_v16 = vpack.c.bf16 %v1111_v15, %v1109_v11  ;;  %v978_v18 = vld [vmem:[#allocation10 + $0x8] sm:$0xff]  ;;  %v1008_v15 = vld [vmem:[#allocation10 + $0xf8] sm:$0xff] }
 0x1a8   :  { %v994_v35 = vld [vmem:[#allocation10 + $0x88] sm:$0xff] }
 0x1a9   :  { %2948 = vmatprep.subr.bf16.mxu0 %v2947_v21  ;;  %v980_v21 = vld [vmem:[#allocation10 + $0x18] sm:$0xff]  ;;  %v2987_v42 = vpack.c.bf16 %v996_v41, %v994_v35  ;;  %v1006_v11 = vld [vmem:[#allocation10 + $0xe8] sm:$0xff] }
 0x1aa   :  { %3138 = vmatpush3.bf16.msra.mxu1 %v3886_v32  ;;  %2950 = vmatpush1.bf16.msra.mxu0 %v2949_v29  ;;  %v2971_v24 = vpack.c.bf16 %v980_v21, %v978_v18  ;;  %v987_v29 = vld [vmem:[#allocation10 + $0x50] sm:$0xff]  ;;  %v2999_v21 = vpack.c.bf16 %v1008_v15, %v1006_v11  ;;  %v1350_v35 = vld [vmem:[#allocation10 + $0x2b8] sm:$0xff]  ;;  %v1505_v11 = vld [vmem:[#allocation10 + $0x308] sm:$0xff] }
 0x1ab   :  { %3140 = vmatprep.subr.bf16.mxu1 %v3889_v39  ;;  %2952 = vmatprep.subr.bf16.mxu0 %v2951_v33  ;;  %v2981_v33 = vpack.c.bf16 %v987_v29, %v985_v27  ;;  %v1339_v27 = vld [vmem:[#allocation10 + $0x260] sm:$0xff]  ;;  %v1341_v29 = vld [vmem:[#allocation10 + $0x270] sm:$0xff]  ;;  %v1507_v15 = vld [vmem:[#allocation10 + $0x318] sm:$0xff] }
 0x1ac   :  { %v3049_v31 = vpack.c.bf16 %v1341_v29, %v1339_v27  ;;  %v1522_v27 = vld [vmem:[#allocation10 + $0x390] sm:$0xff]  ;;  %v1525_v29 = vld [vmem:[#allocation10 + $0x3a8] sm:$0xff] }
 0x1ae   :  { %3142 = vmatpush3.bf16.msra.mxu1 %v3894_v44  ;;  %2954 = vmatpush1.bf16.msra.mxu0 %v2953_v38  ;;  %v991_v38 = vld [vmem:[#allocation10 + $0x70] sm:$0xff] }
 0x1af   :  { %3144 = vmatprep.subr.bf16.mxu1 %v3897_v46  ;;  %2956 = vmatprep.subr.bf16.mxu0 %v2955_v37  ;;  %v2985_v37 = vpack.c.bf16 %v991_v38, %v989_v36  ;;  %v1345_v36 = vld [vmem:[#allocation10 + $0x290] sm:$0xff]  ;;  %v1348_v38 = vld [vmem:[#allocation10 + $0x2a8] sm:$0xff] }
 0x1b2   :  { %3146 = vmatpush3.bf16.msra.mxu1 %v3901_v54  ;;  %2958 = vmatpush1.bf16.msra.mxu0 %v2957_v45  ;;  %v995_v45 = vld [vmem:[#allocation10 + $0x90] sm:$0xff] }
 0x1b3   :  { %3148 = vmatprep.subr.bf16.mxu1 %v3918_v62  ;;  %2960 = vmatprep.subr.bf16.mxu0 %v2959_v53  ;;  %v2989_v53 = vpack.c.bf16 %v995_v45, %v993_v43  ;;  %v1349_v43 = vld [vmem:[#allocation10 + $0x2b0] sm:$0xff]  ;;  %v1352_v45 = vld [vmem:[#allocation10 + $0x2c8] sm:$0xff] }
 0x1b6   :  { %3150 = vmatpush3.bf16.msra.mxu1 %v3920_v1  ;;  %2962 = vmatpush1.bf16.msra.mxu0 %v2961_v59  ;;  %v999_v59 = vld [vmem:[#allocation10 + $0xb0] sm:$0xff] }
 0x1b7   :  { %3152 = vmatprep.subr.bf16.mxu1 %v3926_v4  ;;  %2964 = vmatprep.subr.bf16.mxu0 %v2963_v63  ;;  %v2993_v2 = vpack.c.bf16 %v999_v59, %v997_v57  ;;  %v3059_v59 = vpack.c.bf16 %v1354_v47, %v1352_v45  ;;  %v1528_v45 = vld [vmem:[#allocation10 + $0x3c0] sm:$0xff]  ;;  %v1530_v47 = vld [vmem:[#allocation10 + $0x3d0] sm:$0xff] }
 0x1ba   :  { %3154 = vmatpush3.bf16.msra.mxu1 %v3928_v7  ;;  %2966 = vmatpush1.bf16.msra.mxu0 %v2965_v3 }
 0x1bb   :  { %3156 = vmatprep.subr.bf16.mxu1 %v3934_v10  ;;  %2968 = vmatprep.subr.bf16.mxu0 %v2967_v9  ;;  %v1003_v9 = vld [vmem:[#allocation10 + $0xd0] sm:$0xff] }
 0x1bc   :  { %v2997_v18 = vpack.c.bf16 %v1003_v9, %v1001_v8  ;;  %v1355_v8 = vld [vmem:[#allocation10 + $0x2e0] sm:$0xff]  ;;  %v1357_v9 = vld [vmem:[#allocation10 + $0x2f0] sm:$0xff] }
 0x1be   :  { %3158 = vmatpush3.bf16.msra.mxu1 %v3936_v13  ;;  %2970 = vmatpush1.bf16.msra.mxu0 %v2969_v16 }
 0x1bf   :  { %3160 = vmatprep.subr.bf16.mxu1 %v3942_v17  ;;  %2972 = vmatprep.subr.bf16.mxu0 %v2971_v24  ;;  %v1005_v24 = vld [vmem:[#allocation10 + $0xe0] sm:$0xff] }
 0x1c2   :  { %3162 = vmatpush3.bf16.msra.mxu1 %v3944_v23 }
 0x1c3   :  { %3196 = vmatprep.subr.bf16.mxu1 %v3873_v14 }
 0x1c5   :  { %1674 = vmatmul.mubr.f32.vlgmr.msra.gmra.mrb[18].mxu1 %v3984_v12  ;;  %v247_v12 = vrot.slane %v3963_v40, %v214_v5  ;;  %v981_v40 = vld [vmem:[#allocation10 + $0x20] sm:$0xff]  ;;  %v983_v5 = vld [vmem:[#allocation10 + $0x30] sm:$0xff] }
 0x1c6   :  { %3198 = vmatpush3.bf16.msra.mxu1 %v3877_v19  ;;  %1850 = vmatprep.mubr.f32.mxu1 %v4013_v48 }
 0x1c7   :  { %3200 = vmatprep.subr.bf16.mxu1 %v3880_v22 }
 0x1ca   :  { %3202 = vmatpush3.bf16.msra.mxu1 %v3886_v32 }
 0x1cb   :  { %3204 = vmatprep.subr.bf16.mxu1 %v3889_v39 }
 0x1ce   :  { %3206 = vmatpush3.bf16.msra.mxu1 %v3894_v44 }
 0x1cf   :  { %3208 = vmatprep.subr.bf16.mxu1 %v3897_v46 }
 0x1d2   :  { %3210 = vmatpush3.bf16.msra.mxu1 %v3901_v54 }
 0x1d3   :  { %3212 = vmatprep.subr.bf16.mxu1 %v3918_v62 }
 0x1d6   :  { %3214 = vmatpush3.bf16.msra.mxu1 %v3920_v1 }
 0x1d7   :  { %3216 = vmatprep.subr.bf16.mxu1 %v3926_v4 }
 0x1da   :  { %3218 = vmatpush3.bf16.msra.mxu1 %v3928_v7 }
 0x1db   :  { %3220 = vmatprep.subr.bf16.mxu1 %v3934_v10 }
 0x1de   :  { %3222 = vmatpush3.bf16.msra.mxu1 %v3936_v13 }
 0x1df   :  { %3224 = vmatprep.subr.bf16.mxu1 %v3942_v17 }
 0x1e2   :  { %3226 = vmatpush3.bf16.msra.mxu1 %v3944_v23 }
 0x1e3   :  { %3260 = vmatprep.subr.bf16.mxu1 %v3873_v14 }
 0x1e5   :  { %1851 = vmatmul.mubr.f32.vlgmr.msra.gmra.mrb[20].mxu1 %v4010_v50  ;;  %v834_v50 = vadd.f32 %v4039_v56, %v247_v12  ;;  %v2977_v56 = vpack.c.bf16 %v983_v5, %v981_v40  ;;  %v1007_v12 = vld [vmem:[#allocation10 + $0xf0] sm:$0xff]  ;;  %v1335_v5 = vld [vmem:[#allocation10 + $0x240] sm:$0xff] }
 0x1e6   :  { %3262 = vmatpush3.bf16.msra.mxu1 %v3877_v19  ;;  %2027 = vmatprep.mubr.f32.mxu1 %v4025_v52  ;;  %v988_v52 = vld [vmem:[#allocation10 + $0x58] sm:$0xff] }
 0x1e7   :  { %3264 = vmatprep.subr.bf16.mxu1 %v3880_v22  ;;  %3478 = vtanh.f32 %v834_v50  ;;  %v1328_v50 = vld [vmem:[#allocation10 + $0x208] sm:$0xff] }
 0x1ea   :  { %3266 = vmatpush3.bf16.msra.mxu1 %v3886_v32 }
 0x1eb   :  { %3268 = vmatprep.subr.bf16.mxu1 %v3889_v39 }
 0x1ee   :  { %3270 = vmatpush3.bf16.msra.mxu1 %v3894_v44 }
 0x1ef   :  { %3272 = vmatprep.subr.bf16.mxu1 %v3897_v46 }
 0x1f1   :  { %v3479_v25 = vpop.eup %3478 }
 0x1f2   :  { %3274 = vmatpush3.bf16.msra.mxu1 %v3901_v54 }
 0x1f3   :  { %3276 = vmatprep.subr.bf16.mxu1 %v3918_v62 }
 0x1f6   :  { %3278 = vmatpush3.bf16.msra.mxu1 %v3920_v1 }
 0x1f7   :  { %3280 = vmatprep.subr.bf16.mxu1 %v3926_v4 }
 0x1fa   :  { %3282 = vmatpush3.bf16.msra.mxu1 %v3928_v7 }
 0x1fb   :  { %3284 = vmatprep.subr.bf16.mxu1 %v3934_v10 }
 0x1fe   :  { %3286 = vmatpush3.bf16.msra.mxu1 %v3936_v13 }
 0x1ff   :  { %3288 = vmatprep.subr.bf16.mxu1 %v3942_v17 }
 0x202   :  { %3290 = vmatpush3.bf16.msra.mxu1 %v3944_v23 }
 0x203   :  { %3324 = vmatprep.subr.bf16.mxu1 %v3873_v14 }
 0x205   :  { %2028 = vmatmul.mubr.f32.vlgmr.msra.gmra.mrb[22].mxu1 %v4020_v51  ;;  %v986_v51 = vld [vmem:[#allocation10 + $0x48] sm:$0xff] }
 0x206   :  { %3326 = vmatpush3.bf16.msra.mxu1 %v3877_v19  ;;  %2204 = vmatprep.mubr.f32.mxu1 %v3479_v25  ;;  %v4129_v19 = vld [vmem:[%s4218_s4] ss:$0 sm:$0xff]  ;;  %v1330_v25 = vld [vmem:[#allocation10 + $0x218] sm:$0xff] }
 0x207   :  { %3328 = vmatprep.subr.bf16.mxu1 %v3880_v22 }
 0x20a   :  { %3330 = vmatpush3.bf16.msra.mxu1 %v3886_v32 }
 0x20b   :  { %3332 = vmatprep.subr.bf16.mxu1 %v3889_v39 }
 0x20e   :  { %3334 = vmatpush3.bf16.msra.mxu1 %v3894_v44 }
 0x20f   :  { %3336 = vmatprep.subr.bf16.mxu1 %v3897_v46 }
 0x212   :  { %3338 = vmatpush3.bf16.msra.mxu1 %v3901_v54 }
 0x213   :  { %3340 = vmatprep.subr.bf16.mxu1 %v3918_v62 }
 0x216   :  { %3342 = vmatpush3.bf16.msra.mxu1 %v3920_v1 }
 0x217   :  { %3344 = vmatprep.subr.bf16.mxu1 %v3926_v4  ;;  %v977_v4 = vld [vmem:[#allocation10] sm:$0xff] }
 0x21a   :  { %3346 = vmatpush3.bf16.msra.mxu1 %v3928_v7  ;;  %v979_v7 = vld [vmem:[#allocation10 + $0x10] sm:$0xff] }
 0x21b   :  { %3348 = vmatprep.subr.bf16.mxu1 %v3934_v10  ;;  %v982_v10 = vld [vmem:[#allocation10 + $0x28] sm:$0xff] }
 0x21e   :  { %3350 = vmatpush3.bf16.msra.mxu1 %v3936_v13  ;;  %v984_v13 = vld [vmem:[#allocation10 + $0x38] sm:$0xff] }
 0x21f   :  { %3352 = vmatprep.subr.bf16.mxu1 %v3942_v17  ;;  %v2973_v17 = vpack.c.bf16 %v979_v7, %v977_v4  ;;  %v1331_v4 = vld [vmem:[#allocation10 + $0x220] sm:$0xff]  ;;  %v1333_v7 = vld [vmem:[#allocation10 + $0x230] sm:$0xff] }
 0x222   :  { %3354 = vmatpush3.bf16.msra.mxu1 %v3944_v23  ;;  %v2975_v23 = vpack.c.bf16 %v984_v13, %v982_v10  ;;  %v1336_v13 = vld [vmem:[#allocation10 + $0x248] sm:$0xff] }
 0x225   :  { %2205 = vmatmul.mubr.f32.vlgmr.msra.gmra.mrb[24].mxu1 %v4047_v58  ;;  %v2979_v58 = vpack.c.bf16 %v988_v52, %v986_v51  ;;  %v1340_v51 = vld [vmem:[#allocation10 + $0x268] sm:$0xff]  ;;  %v1342_v52 = vld [vmem:[#allocation10 + $0x278] sm:$0xff] }
 0x230   :  { %v2528_v14 = vpop.f32.mrb[4].mxu0 }
 0x231   :  { %v2529_v22 = vpop.f32.mrb[5].mxu0 }
 0x232   :  { %v2530_v32 = vadd.f32 %v2529_v22, %v2528_v14  ;;  %v3001_v14 = vpack.c.bf16 %v1007_v12, %v1005_v24  ;;  %v3035_v22 = vpack.c.bf16 %v1330_v25, %v1328_v50  ;;  %v1506_v24 = vld [vmem:[#allocation10 + $0x310] sm:$0xff]  ;;  %v1509_v12 = vld [vmem:[#allocation10 + $0x328] sm:$0xff]  ;;  %v1511_v50 = vld [vmem:[#allocation10 + $0x338] sm:$0xff] }
 0x234   :  { %v972_v39 = vadd.f32 %v2530_v32, %v4129_v19  ;;  %v1327_v32 = vld [vmem:[#allocation10 + $0x200] sm:$0xff] }
 0x236   :  { %3480 = vtanh.f32 %v972_v39  ;;  %v1329_v39 = vld [vmem:[#allocation10 + $0x210] sm:$0xff] }
 0x238   :  { %v2563_v44 = vpop.f32.mrb[12].mxu1 }
 0x239   :  { %v2564_v46 = vpop.f32.mrb[13].mxu1 }
 0x23a   :  { %v2565_v54 = vadd.f32 %v2564_v46, %v2563_v44  ;;  %v1332_v44 = vld [vmem:[#allocation10 + $0x228] sm:$0xff]  ;;  %v1334_v46 = vld [vmem:[#allocation10 + $0x238] sm:$0xff] }
 0x23c   :  { %v1076_v62 = vadd.f32 %v2565_v54, %v4129_v19  ;;  %v3037_v54 = vpack.c.bf16 %v1329_v39, %v1327_v32  ;;  %v1510_v32 = vld [vmem:[#allocation10 + $0x330] sm:$0xff] }
 0x23e   :  { %3482 = vtanh.f32 %v1076_v62  ;;  %v3039_v62 = vpack.c.bf16 %v1334_v46, %v1332_v44  ;;  %v1513_v44 = vld [vmem:[#allocation10 + $0x348] sm:$0xff]  ;;  %v1515_v46 = vld [vmem:[#allocation10 + $0x358] sm:$0xff] }
 0x240   :  { %v4133_v1 = vpop.eup %3480 }
 0x241   :  { %976 = vst [vmem:[#allocation14] sm:$0xff] %v4133_v1 }
 0x248   :  { %v3483_v48 = vpop.eup %3482 }
 0x249   :  { %1080 = vst [vmem:[#allocation14 + $0x8] sm:$0xff] %v3483_v48  ;;  %1178 = vmatmul.mubr.f32.vlgmr.msra.gmra.mrb[6].mxu0 %v3483_v48  ;;  %v1337_v48 = vld [vmem:[#allocation10 + $0x250] sm:$0xff] }
 0x24a   :  { %2974 = vmatpush1.bf16.msra.mxu0 %v2973_v17  ;;  %1248 = vmatprep.mubr.f32.mxu0 %v3717_v0  ;;  %v1338_v17 = vld [vmem:[#allocation10 + $0x258] sm:$0xff] }
 0x24b   :  { %2976 = vmatprep.subr.bf16.mxu0 %v2975_v23  ;;  %v3041_v23 = vpack.c.bf16 %v1333_v7, %v1331_v4  ;;  %v3043_v40 = vpack.c.bf16 %v1338_v17, %v1336_v13  ;;  %v1512_v4 = vld [vmem:[#allocation10 + $0x340] sm:$0xff]  ;;  %v1514_v7 = vld [vmem:[#allocation10 + $0x350] sm:$0xff]  ;;  %v1517_v13 = vld [vmem:[#allocation10 + $0x368] sm:$0xff] }
 0x24c   :  { %v1519_v17 = vld [vmem:[#allocation10 + $0x378] sm:$0xff] }
 0x24e   :  { %2978 = vmatpush1.bf16.msra.mxu0 %v2977_v56  ;;  %v3045_v56 = vpack.c.bf16 %v1337_v48, %v1335_v5  ;;  %v1516_v5 = vld [vmem:[#allocation10 + $0x360] sm:$0xff]  ;;  %v1518_v48 = vld [vmem:[#allocation10 + $0x370] sm:$0xff] }
 0x24f   :  { %2980 = vmatprep.subr.bf16.mxu0 %v2979_v58  ;;  %v3047_v58 = vpack.c.bf16 %v1342_v52, %v1340_v51  ;;  %v1521_v51 = vld [vmem:[#allocation10 + $0x388] sm:$0xff]  ;;  %v3113_v52 = vpack.c.bf16 %v1518_v48, %v1516_v5  ;;  %v2351_v5 = vld [vmem:[#allocation11 + $0xa0] sm:$0xff] }
 0x250   :  { %v1694_v48 = vld [vmem:[#allocation10 + $0x468] sm:$0xff] }
 0x252   :  { %2982 = vmatpush1.bf16.msra.mxu0 %v2981_v33 }
 0x253   :  { %2984 = vmatprep.subr.bf16.mxu0 %v2983_v34  ;;  %v1343_v34 = vld [vmem:[#allocation10 + $0x280] sm:$0xff] }
 0x254   :  { %v3053_v41 = vpack.c.bf16 %v1345_v36, %v1343_v34  ;;  %v1526_v34 = vld [vmem:[#allocation10 + $0x3b0] sm:$0xff]  ;;  %v1529_v36 = vld [vmem:[#allocation10 + $0x3c8] sm:$0xff] }
 0x256   :  { %2986 = vmatpush1.bf16.msra.mxu0 %v2985_v37  ;;  %v3055_v37 = vpack.c.bf16 %v1350_v35, %v1348_v38  ;;  %v1531_v38 = vld [vmem:[#allocation10 + $0x3d8] sm:$0xff] }
 0x257   :  { %2988 = vmatprep.subr.bf16.mxu0 %v2987_v42  ;;  %v1347_v42 = vld [vmem:[#allocation10 + $0x2a0] sm:$0xff] }
 0x258   :  { %v2598_v63 = vpop.f32.mrb[14].mxu1 }
 0x259   :  { %v2599_v20 = vpop.f32.mrb[15].mxu1 }
 0x25a   :  { %2990 = vmatpush1.bf16.msra.mxu0 %v2989_v53  ;;  %v2600_v3 = vadd.f32 %v2599_v20, %v2598_v63  ;;  %v1356_v63 = vld [vmem:[#allocation10 + $0x2e8] sm:$0xff]  ;;  %v1358_v20 = vld [vmem:[#allocation10 + $0x2f8] sm:$0xff] }
 0x25b   :  { %2992 = vmatprep.subr.bf16.mxu0 %v2991_v55  ;;  %v3057_v55 = vpack.c.bf16 %v1349_v43, %v1347_v42  ;;  %v3123_v43 = vpack.c.bf16 %v1531_v38, %v1529_v36  ;;  %v1698_v36 = vld [vmem:[#allocation10 + $0x488] sm:$0xff]  ;;  %v1700_v38 = vld [vmem:[#allocation10 + $0x498] sm:$0xff] }
 0x25c   :  { %v1322_v16 = vadd.f32 %v2600_v3, %v4129_v19  ;;  %v3061_v3 = vpack.c.bf16 %v1353_v61, %v1351_v60  ;;  %v1532_v60 = vld [vmem:[#allocation10 + $0x3e0] sm:$0xff]  ;;  %v1534_v61 = vld [vmem:[#allocation10 + $0x3f0] sm:$0xff] }
 0x25e   :  { %2994 = vmatpush1.bf16.msra.mxu0 %v2993_v2  ;;  %3484 = vtanh.f32 %v1322_v16  ;;  %v3065_v16 = vpack.c.bf16 %v1357_v9, %v1355_v8  ;;  %v1683_v8 = vld [vmem:[#allocation10 + $0x410] sm:$0xff]  ;;  %v1686_v9 = vld [vmem:[#allocation10 + $0x428] sm:$0xff] }
 0x25f   :  { %2996 = vmatprep.subr.bf16.mxu0 %v2995_v6  ;;  %v3063_v6 = vpack.c.bf16 %v1358_v20, %v1356_v63  ;;  %v1682_v63 = vld [vmem:[#allocation10 + $0x408] sm:$0xff]  ;;  %v1684_v20 = vld [vmem:[#allocation10 + $0x418] sm:$0xff] }
 0x262   :  { %2998 = vmatpush1.bf16.msra.mxu0 %v2997_v18  ;;  %v3099_v18 = vpack.c.bf16 %v1507_v15, %v1505_v11  ;;  %v1688_v11 = vld [vmem:[#allocation10 + $0x438] sm:$0xff] }
 0x263   :  { %3000 = vmatprep.subr.bf16.mxu0 %v2999_v21  ;;  %v1504_v21 = vld [vmem:[#allocation10 + $0x300] sm:$0xff] }
 0x264   :  { %v3101_v25 = vpack.c.bf16 %v1506_v24, %v1504_v21  ;;  %v1687_v21 = vld [vmem:[#allocation10 + $0x430] sm:$0xff] }
 0x266   :  { %3002 = vmatpush1.bf16.msra.mxu0 %v3001_v14  ;;  %v3103_v14 = vpack.c.bf16 %v1511_v50, %v1509_v12  ;;  %v1690_v12 = vld [vmem:[#allocation10 + $0x448] sm:$0xff]  ;;  %v1692_v50 = vld [vmem:[#allocation10 + $0x458] sm:$0xff] }
 0x267   :  { %3036 = vmatprep.subr.bf16.mxu0 %v3035_v22  ;;  %v1508_v22 = vld [vmem:[#allocation10 + $0x320] sm:$0xff] }
 0x268   :  { %v4138_v10 = vpop.eup %3484 }
 0x269   :  { %1249 = vmatmul.mubr.f32.vlgmr.msra.gmra.mrb[6].mxu0 %v4133_v1  ;;  %1326 = vst [vmem:[#allocation14 + $0x10] sm:$0xff] %v4138_v10  ;;  %v1346_v1 = vld [vmem:[#allocation10 + $0x298] sm:$0xff] }
 0x26a   :  { %3038 = vmatpush1.bf16.msra.mxu0 %v3037_v54  ;;  %1423 = vmatprep.mubr.f32.mxu0 %v3717_v0  ;;  %v3051_v33 = vpack.c.bf16 %v1346_v1, %v1344_v30  ;;  %v3105_v54 = vpack.c.bf16 %v1510_v32, %v1508_v22  ;;  %v1527_v30 = vld [vmem:[#allocation10 + $0x3b8] sm:$0xff]  ;;  %v2347_v22 = vld [vmem:[#allocation11 + $0x80] sm:$0xff]  ;;  %v2348_v32 = vld [vmem:[#allocation11 + $0x88] sm:$0xff] }
 0x26b   :  { %3040 = vmatprep.subr.bf16.mxu0 %v3039_v62  ;;  %v3107_v62 = vpack.c.bf16 %v1515_v46, %v1513_v44  ;;  %v2331_v44 = vld [vmem:[#allocation11] sm:$0xff] }
 0x26e   :  { %3042 = vmatpush1.bf16.msra.mxu0 %v3041_v23  ;;  %v3109_v23 = vpack.c.bf16 %v1514_v7, %v1512_v4  ;;  %v2349_v4 = vld [vmem:[#allocation11 + $0x90] sm:$0xff]  ;;  %v2350_v7 = vld [vmem:[#allocation11 + $0x98] sm:$0xff] }
 0x26f   :  { %3044 = vmatprep.subr.bf16.mxu0 %v3043_v40  ;;  %v3111_v40 = vpack.c.bf16 %v1519_v17, %v1517_v13  ;;  %v3171_v13 = vpack.c.bf16 %v1692_v50, %v1690_v12 }
 0x272   :  { %3046 = vmatpush1.bf16.msra.mxu0 %v3045_v56 }
 0x273   :  { %3048 = vmatprep.subr.bf16.mxu0 %v3047_v58  ;;  %v1520_v58 = vld [vmem:[#allocation10 + $0x380] sm:$0xff] }
 0x274   :  { %v3117_v1 = vpack.c.bf16 %v1522_v27, %v1520_v58  ;;  %v1693_v58 = vld [vmem:[#allocation10 + $0x460] sm:$0xff] }
 0x276   :  { %3050 = vmatpush1.bf16.msra.mxu0 %v3049_v31  ;;  %v3119_v31 = vpack.c.bf16 %v1527_v30, %v1525_v29  ;;  %v2335_v29 = vld [vmem:[#allocation11 + $0x20] sm:$0xff]  ;;  %v2336_v30 = vld [vmem:[#allocation11 + $0x28] sm:$0xff] }
 0x277   :  { %3052 = vmatprep.subr.bf16.mxu0 %v3051_v33  ;;  %v1524_v33 = vld [vmem:[#allocation10 + $0x3a0] sm:$0xff] }
 0x278   :  { %v2633_v49 = vpop.f32.mrb[16].mxu1 }
 0x279   :  { %v2634_v53 = vpop.f32.mrb[17].mxu1 }
 0x27a   :  { %3054 = vmatpush1.bf16.msra.mxu0 %v3053_v41  ;;  %v2635_v57 = vadd.f32 %v2634_v53, %v2633_v49  ;;  %v1533_v49 = vld [vmem:[#allocation10 + $0x3e8] sm:$0xff]  ;;  %v1535_v53 = vld [vmem:[#allocation10 + $0x3f8] sm:$0xff] }
 0x27b   :  { %3056 = vmatprep.subr.bf16.mxu0 %v3055_v37  ;;  %v3121_v37 = vpack.c.bf16 %v1526_v34, %v1524_v33  ;;  %v2353_v33 = vld [vmem:[#allocation11 + $0xb0] sm:$0xff]  ;;  %v2354_v34 = vld [vmem:[#allocation11 + $0xb8] sm:$0xff] }
 0x27c   :  { %v1499_v2 = vadd.f32 %v2635_v57, %v4129_v19  ;;  %v3125_v57 = vpack.c.bf16 %v1530_v47, %v1528_v45  ;;  %v2338_v45 = vld [vmem:[#allocation11 + $0x38] sm:$0xff]  ;;  %v3179_v47 = vpack.c.bf16 %v1700_v38, %v1698_v36 }
 0x27e   :  { %3058 = vmatpush1.bf16.msra.mxu0 %v3057_v55  ;;  %3486 = vtanh.f32 %v1499_v2  ;;  %v3129_v2 = vpack.c.bf16 %v1534_v61, %v1532_v60 }
 0x27f   :  { %3060 = vmatprep.subr.bf16.mxu0 %v3059_v59  ;;  %v3127_v59 = vpack.c.bf16 %v1535_v53, %v1533_v49  ;;  %v1699_v49 = vld [vmem:[#allocation10 + $0x490] sm:$0xff]  ;;  %v2355_v53 = vld [vmem:[#allocation11 + $0xc0] sm:$0xff] }
 0x282   :  { %3062 = vmatpush1.bf16.msra.mxu0 %v3061_v3  ;;  %v3163_v3 = vpack.c.bf16 %v1684_v20, %v1682_v63  ;;  %v1701_v63 = vld [vmem:[#allocation10 + $0x4a0] sm:$0xff] }
 0x283   :  { %3064 = vmatprep.subr.bf16.mxu0 %v3063_v6  ;;  %v1681_v6 = vld [vmem:[#allocation10 + $0x400] sm:$0xff] }
 0x284   :  { %v3165_v15 = vpack.c.bf16 %v1683_v8, %v1681_v6  ;;  %v1703_v8 = vld [vmem:[#allocation10 + $0x4b0] sm:$0xff] }
 0x285   :  { %v3185_v50 = vpack.c.bf16 %v1703_v8, %v1701_v63  ;;  %v1872_v63 = vld [vmem:[#allocation10 + $0x570] sm:$0xff] }
 0x286   :  { %3066 = vmatpush1.bf16.msra.mxu0 %v3065_v16  ;;  %v3167_v16 = vpack.c.bf16 %v1688_v11, %v1686_v9  ;;  %v2357_v9 = vld [vmem:[#allocation11 + $0xd0] sm:$0xff]  ;;  %v2358_v11 = vld [vmem:[#allocation11 + $0xd8] sm:$0xff] }
 0x287   :  { %3100 = vmatprep.subr.bf16.mxu0 %v3099_v18  ;;  %v1685_v18 = vld [vmem:[#allocation10 + $0x420] sm:$0xff]  ;;  %v1876_v8 = vld [vmem:[#allocation10 + $0x590] sm:$0xff] }
 0x288   :  { %v4144_v39 = vpop.eup %3486  ;;  %v3169_v46 = vpack.c.bf16 %v1687_v21, %v1685_v18 }
 0x289   :  { %1424 = vmatmul.mubr.f32.vlgmr.msra.gmra.mrb[6].mxu0 %v4138_v10  ;;  %1503 = vst [vmem:[#allocation14 + $0x18] sm:$0xff] %v4144_v39  ;;  %v1523_v10 = vld [vmem:[#allocation10 + $0x398] sm:$0xff] }
 0x28a   :  { %3102 = vmatpush1.bf16.msra.mxu0 %v3101_v25  ;;  %1600 = vmatprep.mubr.f32.mxu0 %v3717_v0  ;;  %v3115_v56 = vpack.c.bf16 %v1523_v10, %v1521_v51  ;;  %v1689_v25 = vld [vmem:[#allocation10 + $0x440] sm:$0xff]  ;;  %v1696_v51 = vld [vmem:[#allocation10 + $0x478] sm:$0xff]  ;;  %v2352_v10 = vld [vmem:[#allocation11 + $0xa8] sm:$0xff] }
 0x28b   :  { %3104 = vmatprep.subr.bf16.mxu0 %v3103_v14  ;;  %v1691_v14 = vld [vmem:[#allocation10 + $0x450] sm:$0xff]  ;;  %v3395_v27 = vpack.c.bf16 %v2352_v10, %v2351_v5  ;;  %v2343_v5 = vld [vmem:[#allocation11 + $0x60] sm:$0xff] }
 0x28c   :  { %v1709_v10 = vld [vmem:[#allocation10 + $0x4e0] sm:$0xff] }
 0x28e   :  { %3106 = vmatpush1.bf16.msra.mxu0 %v3105_v54  ;;  %v3387_v54 = vpack.c.bf16 %v2348_v32, %v2347_v22  ;;  %v3407_v22 = vpack.c.bf16 %v2358_v11, %v2357_v9  ;;  %v2341_v32 = vld [vmem:[#allocation11 + $0x50] sm:$0xff]  ;;  %v1879_v9 = vld [vmem:[#allocation10 + $0x5a8] sm:$0xff]  ;;  %v1881_v11 = vld [vmem:[#allocation10 + $0x5b8] sm:$0xff] }
 0x28f   :  { %3108 = vmatprep.subr.bf16.mxu0 %v3107_v62  ;;  %v2332_v62 = vld [vmem:[#allocation11 + $0x8] sm:$0xff] }
 0x290   :  { %v3389_v17 = vpack.c.bf16 %v2332_v62, %v2331_v44  ;;  %3388 = vmatprep.subr.bf16.mxu1 %v3387_v54  ;;  %v2342_v44 = vld [vmem:[#allocation11 + $0x58] sm:$0xff]  ;;  %v1707_v54 = vld [vmem:[#allocation10 + $0x4d0] sm:$0xff]  ;;  %v2359_v62 = vld [vmem:[#allocation11 + $0xe0] sm:$0xff] }
 0x292   :  { %3110 = vmatpush1.bf16.msra.mxu0 %v3109_v23  ;;  %v3391_v23 = vpack.c.bf16 %v2350_v7, %v2349_v4  ;;  %3390 = vmatpush3.bf16.msra.mxu1 %v3389_v17  ;;  %v2360_v4 = vld [vmem:[#allocation11 + $0xe8] sm:$0xff] }
 0x293   :  { %3112 = vmatprep.subr.bf16.mxu0 %v3111_v40  ;;  %v2334_v40 = vld [vmem:[#allocation11 + $0x18] sm:$0xff]  ;;  %v1710_v7 = vld [vmem:[#allocation10 + $0x4e8] sm:$0xff] }
 0x294   :  { %3392 = vmatprep.subr.bf16.mxu1 %v3391_v23  ;;  %v3409_v23 = vpack.c.bf16 %v2342_v44, %v2341_v32 }
 0x296   :  { %3114 = vmatpush1.bf16.msra.mxu0 %v3113_v52 }
 0x297   :  { %3116 = vmatprep.subr.bf16.mxu0 %v3115_v56  ;;  %v3173_v56 = vpack.c.bf16 %v1691_v14, %v1689_v25  ;;  %v1705_v25 = vld [vmem:[#allocation10 + $0x4c0] sm:$0xff] }
 0x298   :  { %v2668_v35 = vpop.f32.mrb[18].mxu1 }
 0x299   :  { %v2669_v41 = vpop.f32.mrb[19].mxu1 }
 0x29a   :  { %3118 = vmatpush1.bf16.msra.mxu0 %v3117_v1  ;;  %v2670_v42 = vadd.f32 %v2669_v41, %v2668_v35  ;;  %v3175_v1 = vpack.c.bf16 %v1696_v51, %v1694_v48  ;;  %v3397_v35 = vpack.c.bf16 %v2336_v30, %v2335_v29  ;;  %v2344_v48 = vld [vmem:[#allocation11 + $0x68] sm:$0xff] }
 0x29b   :  { %3120 = vmatprep.subr.bf16.mxu0 %v3119_v31  ;;  %v1695_v31 = vld [vmem:[#allocation10 + $0x470] sm:$0xff] }
 0x29c   :  { %v1676_v55 = vadd.f32 %v2670_v42, %v4129_v19  ;;  %v3177_v41 = vpack.c.bf16 %v1695_v31, %v1693_v58  ;;  %v3399_v42 = vpack.c.bf16 %v2354_v34, %v2353_v33  ;;  %v1861_v58 = vld [vmem:[#allocation10 + $0x518] sm:$0xff]  ;;  %v1860_v31 = vld [vmem:[#allocation10 + $0x510] sm:$0xff]  ;;  %v1863_v33 = vld [vmem:[#allocation10 + $0x528] sm:$0xff] }
 0x29d   :  { %v1865_v34 = vld [vmem:[#allocation10 + $0x538] sm:$0xff] }
 0x29e   :  { %3122 = vmatpush1.bf16.msra.mxu0 %v3121_v37  ;;  %3488 = vtanh.f32 %v1676_v55  ;;  %v1697_v37 = vld [vmem:[#allocation10 + $0x480] sm:$0xff]  ;;  %v2356_v55 = vld [vmem:[#allocation11 + $0xc8] sm:$0xff]  ;;  %v3231_v38 = vpack.c.bf16 %v1865_v34, %v1863_v33  ;;  %v2046_v34 = vld [vmem:[#allocation10 + $0x658] sm:$0xff] }
 0x29f   :  { %3124 = vmatprep.subr.bf16.mxu0 %v3123_v43  ;;  %v2337_v43 = vld [vmem:[#allocation11 + $0x30] sm:$0xff]  ;;  %v3181_v61 = vpack.c.bf16 %v1699_v49, %v1697_v37  ;;  %v3403_v20 = vpack.c.bf16 %v2356_v55, %v2355_v53  ;;  %v1866_v49 = vld [vmem:[#allocation10 + $0x540] sm:$0xff]  ;;  %v1871_v55 = vld [vmem:[#allocation10 + $0x568] sm:$0xff] }
 0x2a0   :  { %v3401_v60 = vpack.c.bf16 %v2338_v45, %v2337_v43  ;;  %v1869_v43 = vld [vmem:[#allocation10 + $0x558] sm:$0xff]  ;;  %v1868_v53 = vld [vmem:[#allocation10 + $0x550] sm:$0xff]  ;;  %v2044_v33 = vld [vmem:[#allocation10 + $0x648] sm:$0xff] }
 0x2a2   :  { %3126 = vmatpush1.bf16.msra.mxu0 %v3125_v57  ;;  %v1702_v57 = vld [vmem:[#allocation10 + $0x4a8] sm:$0xff] }
 0x2a3   :  { %3128 = vmatprep.subr.bf16.mxu0 %v3127_v59  ;;  %v1704_v59 = vld [vmem:[#allocation10 + $0x4b8] sm:$0xff] }
 0x2a4   :  { %v3183_v6 = vpack.c.bf16 %v1704_v59, %v1702_v57  ;;  %v1873_v57 = vld [vmem:[#allocation10 + $0x578] sm:$0xff]  ;;  %v3237_v59 = vpack.c.bf16 %v1868_v53, %v1866_v49  ;;  %v2047_v49 = vld [vmem:[#allocation10 + $0x660] sm:$0xff]  ;;  %v2049_v53 = vld [vmem:[#allocation10 + $0x670] sm:$0xff] }
 0x2a6   :  { %3130 = vmatpush1.bf16.msra.mxu0 %v3129_v2  ;;  %v2339_v2 = vld [vmem:[#allocation11 + $0x40] sm:$0xff] }
 0x2a7   :  { %3164 = vmatprep.subr.bf16.mxu0 %v3163_v3  ;;  %v2340_v3 = vld [vmem:[#allocation11 + $0x48] sm:$0xff] }
 0x2a8   :  { %v4150_v24 = vpop.eup %3488  ;;  %v3405_v12 = vpack.c.bf16 %v2340_v3, %v2339_v2 }
 0x2a9   :  { %1601 = vmatmul.mubr.f32.vlgmr.msra.gmra.mrb[6].mxu0 %v4144_v39  ;;  %1680 = vst [vmem:[#allocation14 + $0x20] sm:$0xff] %v4150_v24  ;;  %v2333_v39 = vld [vmem:[#allocation11 + $0x10] sm:$0xff] }
 0x2aa   :  { %3166 = vmatpush1.bf16.msra.mxu0 %v3165_v15  ;;  %1777 = vmatprep.mubr.f32.mxu0 %v3717_v0  ;;  %v3393_v52 = vpack.c.bf16 %v2334_v40, %v2333_v39  ;;  %v1706_v15 = vld [vmem:[#allocation10 + $0x4c8] sm:$0xff]  ;;  %v3189_v39 = vpack.c.bf16 %v1707_v54, %v1705_v25  ;;  %v3411_v40 = vpack.c.bf16 %v2360_v4, %v2359_v62  ;;  %v1884_v54 = vld [vmem:[#allocation10 + $0x5d0] sm:$0xff]  ;;  %v1889_v4 = vld [vmem:[#allocation10 + $0x5f8] sm:$0xff] }
 0x2ab   :  { %3168 = vmatprep.subr.bf16.mxu0 %v3167_v16  ;;  %v1708_v16 = vld [vmem:[#allocation10 + $0x4d8] sm:$0xff]  ;;  %v1887_v62 = vld [vmem:[#allocation10 + $0x5e8] sm:$0xff] }
 0x2ac   :  { %3394 = vmatpush3.bf16.msra.mxu1 %v3393_v52  ;;  %v1711_v52 = vld [vmem:[#allocation10 + $0x4f0] sm:$0xff] }
 0x2ad   :  { %3396 = vmatprep.subr.bf16.mxu1 %v3395_v27  ;;  %v3413_v27 = vpack.c.bf16 %v2344_v48, %v2343_v5  ;;  %v3193_v29 = vpack.c.bf16 %v1711_v52, %v1709_v10  ;;  %v2038_v5 = vld [vmem:[#allocation10 + $0x618] sm:$0xff]  ;;  %v2035_v10 = vld [vmem:[#allocation10 + $0x600] sm:$0xff]  ;;  %v2037_v52 = vld [vmem:[#allocation10 + $0x610] sm:$0xff] }
 0x2ae   :  { %3170 = vmatpush1.bf16.msra.mxu0 %v3169_v46  ;;  %v3187_v46 = vpack.c.bf16 %v1708_v16, %v1706_v15  ;;  %v3247_v16 = vpack.c.bf16 %v1881_v11, %v1879_v9  ;;  %v2060_v9 = vld [vmem:[#allocation10 + $0x6c8] sm:$0xff]  ;;  %v2062_v11 = vld [vmem:[#allocation10 + $0x6d8] sm:$0xff] }
 0x2af   :  { %3172 = vmatprep.subr.bf16.mxu0 %v3171_v13  ;;  %v1712_v13 = vld [vmem:[#allocation10 + $0x4f8] sm:$0xff] }
 0x2b0   :  { %3398 = vmatpush3.bf16.msra.mxu1 %v3397_v35  ;;  %v3191_v51 = vpack.c.bf16 %v1712_v13, %v1710_v7  ;;  %v1862_v35 = vld [vmem:[#allocation10 + $0x520] sm:$0xff] }
 0x2b1   :  { %3400 = vmatprep.subr.bf16.mxu1 %v3399_v42  ;;  %v1867_v42 = vld [vmem:[#allocation10 + $0x548] sm:$0xff] }
 0x2b2   :  { %3174 = vmatpush1.bf16.msra.mxu0 %v3173_v56  ;;  %v1859_v56 = vld [vmem:[#allocation10 + $0x508] sm:$0xff] }
 0x2b3   :  { %3176 = vmatprep.subr.bf16.mxu0 %v3175_v1  ;;  %v3227_v30 = vpack.c.bf16 %v1861_v58, %v1859_v56  ;;  %v1858_v1 = vld [vmem:[#allocation10 + $0x500] sm:$0xff]  ;;  %v2040_v56 = vld [vmem:[#allocation10 + $0x628] sm:$0xff]  ;;  %v2042_v58 = vld [vmem:[#allocation10 + $0x638] sm:$0xff] }
 0x2b4   :  { %3402 = vmatpush3.bf16.msra.mxu1 %v3401_v60  ;;  %v3229_v36 = vpack.c.bf16 %v1860_v31, %v1858_v1  ;;  %v3239_v60 = vpack.c.bf16 %v1873_v57, %v1871_v55  ;;  %v2041_v1 = vld [vmem:[#allocation10 + $0x630] sm:$0xff]  ;;  %v2052_v55 = vld [vmem:[#allocation10 + $0x688] sm:$0xff]  ;;  %v3305_v57 = vpack.c.bf16 %v2049_v53, %v2047_v49  ;;  %v2235_v49 = vld [vmem:[#allocation10 + $0x7b8] sm:$0xff] }
 0x2b5   :  { %3404 = vmatprep.subr.bf16.mxu1 %v3403_v20  ;;  %v1875_v20 = vld [vmem:[#allocation10 + $0x588] sm:$0xff] }
 0x2b6   :  { %3178 = vmatpush1.bf16.msra.mxu0 %v3177_v41  ;;  %v1864_v41 = vld [vmem:[#allocation10 + $0x530] sm:$0xff] }
 0x2b7   :  { %3180 = vmatprep.subr.bf16.mxu0 %v3179_v47  ;;  %v3233_v45 = vpack.c.bf16 %v1864_v41, %v1862_v35  ;;  %v3235_v47 = vpack.c.bf16 %v1869_v43, %v1867_v42  ;;  %v2043_v35 = vld [vmem:[#allocation10 + $0x640] sm:$0xff]  ;;  %v2045_v41 = vld [vmem:[#allocation10 + $0x650] sm:$0xff]  ;;  %v2048_v42 = vld [vmem:[#allocation10 + $0x668] sm:$0xff] }
 0x2b8   :  { %v2703_v18 = vpop.f32.mrb[20].mxu1  ;;  %3406 = vmatpush3.bf16.msra.mxu1 %v3405_v12  ;;  %v1883_v12 = vld [vmem:[#allocation10 + $0x5c8] sm:$0xff]  ;;  %v2050_v43 = vld [vmem:[#allocation10 + $0x678] sm:$0xff] }
 0x2b9   :  { %v2704_v21 = vpop.f32.mrb[21].mxu1  ;;  %3408 = vmatprep.subr.bf16.mxu1 %v3407_v22 }
 0x2ba   :  { %3182 = vmatpush1.bf16.msra.mxu0 %v3181_v61  ;;  %v2705_v14 = vadd.f32 %v2704_v21, %v2703_v18  ;;  %v1870_v61 = vld [vmem:[#allocation10 + $0x560] sm:$0xff]  ;;  %v1880_v21 = vld [vmem:[#allocation10 + $0x5b0] sm:$0xff] }
 0x2bb   :  { %3184 = vmatprep.subr.bf16.mxu0 %v3183_v6  ;;  %v3241_v2 = vpack.c.bf16 %v1872_v63, %v1870_v61  ;;  %v1874_v6 = vld [vmem:[#allocation10 + $0x580] sm:$0xff]  ;;  %v2053_v61 = vld [vmem:[#allocation10 + $0x690] sm:$0xff]  ;;  %v2056_v63 = vld [vmem:[#allocation10 + $0x6a8] sm:$0xff] }
 0x2bc   :  { %v1853_v17 = vadd.f32 %v2705_v14, %v4129_v19  ;;  %3410 = vmatpush3.bf16.msra.mxu1 %v3409_v23  ;;  %v3245_v15 = vpack.c.bf16 %v1876_v8, %v1874_v6  ;;  %v1878_v18 = vld [vmem:[#allocation10 + $0x5a0] sm:$0xff]  ;;  %v2057_v6 = vld [vmem:[#allocation10 + $0x6b0] sm:$0xff] }
 0x2bd   :  { %3412 = vmatprep.subr.bf16.mxu1 %v3411_v40  ;;  %v3249_v22 = vpack.c.bf16 %v1880_v21, %v1878_v18  ;;  %v1886_v23 = vld [vmem:[#allocation10 + $0x5e0] sm:$0xff]  ;;  %v2036_v40 = vld [vmem:[#allocation10 + $0x608] sm:$0xff]  ;;  %v3315_v21 = vpack.c.bf16 %v2062_v11, %v2060_v9  ;;  %v2242_v11 = vld [vmem:[#allocation10 + $0x7f0] sm:$0xff] }
 0x2be   :  { %3186 = vmatpush1.bf16.msra.mxu0 %v3185_v50  ;;  %3490 = vtanh.f32 %v1853_v17  ;;  %v1885_v50 = vld [vmem:[#allocation10 + $0x5d8] sm:$0xff]  ;;  %v3255_v17 = vpack.c.bf16 %v1889_v4, %v1887_v62  ;;  %v2213_v62 = vld [vmem:[#allocation10 + $0x708] sm:$0xff]  ;;  %v2240_v9 = vld [vmem:[#allocation10 + $0x7e0] sm:$0xff] }
 0x2bf   :  { %3188 = vmatprep.subr.bf16.mxu0 %v3187_v46  ;;  %v3251_v44 = vpack.c.bf16 %v1885_v50, %v1883_v12  ;;  %v1882_v46 = vld [vmem:[#allocation10 + $0x5c0] sm:$0xff]  ;;  %v2061_v50 = vld [vmem:[#allocation10 + $0x6d0] sm:$0xff]  ;;  %v2215_v4 = vld [vmem:[#allocation10 + $0x718] sm:$0xff] }
 0x2c0   :  { %3414 = vmatpush3.bf16.msra.mxu1 %v3413_v27  ;;  %v3253_v13 = vpack.c.bf16 %v1884_v54, %v1882_v46  ;;  %v3293_v27 = vpack.c.bf16 %v2037_v52, %v2035_v10  ;;  %v2059_v12 = vld [vmem:[#allocation10 + $0x6c0] sm:$0xff]  ;;  %v2065_v54 = vld [vmem:[#allocation10 + $0x6f0] sm:$0xff]  ;;  %v2221_v52 = vld [vmem:[#allocation10 + $0x748] sm:$0xff] }
 0x2c1   :  { %v2063_v46 = vld [vmem:[#allocation10 + $0x6e0] sm:$0xff] }
 0x2c2   :  { %3190 = vmatpush1.bf16.msra.mxu0 %v3189_v39  ;;  %v1888_v39 = vld [vmem:[#allocation10 + $0x5f0] sm:$0xff] }
 0x2c3   :  { %3192 = vmatprep.subr.bf16.mxu0 %v3191_v51  ;;  %v3257_v48 = vpack.c.bf16 %v1888_v39, %v1886_v23  ;;  %v3291_v51 = vpack.c.bf16 %v2038_v5, %v2036_v40  ;;  %v2214_v23 = vld [vmem:[#allocation10 + $0x710] sm:$0xff]  ;;  %v2217_v39 = vld [vmem:[#allocation10 + $0x728] sm:$0xff]  ;;  %v2219_v40 = vld [vmem:[#allocation10 + $0x738] sm:$0xff] }
 0x2c4   :  { %v3359_v5 = vpack.c.bf16 %v2219_v40, %v2217_v39 }
 0x2c6   :  { %3194 = vmatpush1.bf16.msra.mxu0 %v3193_v29  ;;  %v3295_v29 = vpack.c.bf16 %v2042_v58, %v2040_v56  ;;  %v2223_v56 = vld [vmem:[#allocation10 + $0x758] sm:$0xff] }
 0x2c7   :  { %3228 = vmatprep.subr.bf16.mxu0 %v3227_v30  ;;  %v2039_v30 = vld [vmem:[#allocation10 + $0x620] sm:$0xff] }
 0x2c8   :  { %v4156_v37 = vpop.eup %3490 }
 0x2c9   :  { %1778 = vmatmul.mubr.f32.vlgmr.msra.gmra.mrb[6].mxu0 %v4150_v24  ;;  %1857 = vst [vmem:[#allocation14 + $0x28] sm:$0xff] %v4156_v37  ;;  %v1877_v24 = vld [vmem:[#allocation10 + $0x598] sm:$0xff] }
 0x2ca   :  { %3230 = vmatpush1.bf16.msra.mxu0 %v3229_v36  ;;  %1954 = vmatprep.mubr.f32.mxu0 %v3717_v0  ;;  %v3243_v3 = vpack.c.bf16 %v1877_v24, %v1875_v20  ;;  %v3297_v36 = vpack.c.bf16 %v2041_v1, %v2039_v30  ;;  %v2058_v20 = vld [vmem:[#allocation10 + $0x6b8] sm:$0xff]  ;;  %v2222_v30 = vld [vmem:[#allocation10 + $0x750] sm:$0xff]  ;;  %v2225_v1 = vld [vmem:[#allocation10 + $0x768] sm:$0xff] }
 0x2cb   :  { %3232 = vmatprep.subr.bf16.mxu0 %v3231_v38  ;;  %v3299_v38 = vpack.c.bf16 %v2046_v34, %v2044_v33  ;;  %v2227_v33 = vld [vmem:[#allocation10 + $0x778] sm:$0xff] }
 0x2ce   :  { %3234 = vmatpush1.bf16.msra.mxu0 %v3233_v45  ;;  %v3301_v45 = vpack.c.bf16 %v2045_v41, %v2043_v35  ;;  %v2226_v35 = vld [vmem:[#allocation10 + $0x770] sm:$0xff]  ;;  %v2229_v41 = vld [vmem:[#allocation10 + $0x788] sm:$0xff] }
 0x2cf   :  { %3236 = vmatprep.subr.bf16.mxu0 %v3235_v47  ;;  %v3303_v47 = vpack.c.bf16 %v2050_v43, %v2048_v42  ;;  %v2231_v42 = vld [vmem:[#allocation10 + $0x798] sm:$0xff] }
 0x2d0   :  { %v3371_v43 = vpack.c.bf16 %v2231_v42, %v2229_v41 }
 0x2d2   :  { %3238 = vmatpush1.bf16.msra.mxu0 %v3237_v59 }
 0x2d3   :  { %3240 = vmatprep.subr.bf16.mxu0 %v3239_v60  ;;  %v2051_v60 = vld [vmem:[#allocation10 + $0x680] sm:$0xff] }
 0x2d4   :  { %v3309_v24 = vpack.c.bf16 %v2053_v61, %v2051_v60  ;;  %v2239_v60 = vld [vmem:[#allocation10 + $0x7d8] sm:$0xff] }
 0x2d6   :  { %3242 = vmatpush1.bf16.msra.mxu0 %v3241_v2  ;;  %v3311_v2 = vpack.c.bf16 %v2058_v20, %v2056_v63  ;;  %v2236_v20 = vld [vmem:[#allocation10 + $0x7c0] sm:$0xff] }
 0x2d7   :  { %3244 = vmatprep.subr.bf16.mxu0 %v3243_v3  ;;  %v2055_v3 = vld [vmem:[#allocation10 + $0x6a0] sm:$0xff] }
 0x2d8   :  { %v2738_v25 = vpop.f32.mrb[22].mxu1  ;;  %v3313_v18 = vpack.c.bf16 %v2057_v6, %v2055_v3  ;;  %v2243_v3 = vld [vmem:[#allocation10 + $0x7f8] sm:$0xff] }
 0x2d9   :  { %v2739_v14 = vpop.f32.mrb[23].mxu1 }
 0x2da   :  { %3246 = vmatpush1.bf16.msra.mxu0 %v3245_v15  ;;  %v2740_v32 = vadd.f32 %v2739_v14, %v2738_v25  ;;  %v2064_v14 = vld [vmem:[#allocation10 + $0x6e8] sm:$0xff] }
 0x2db   :  { %3248 = vmatprep.subr.bf16.mxu0 %v3247_v16 }
 0x2dc   :  { %v2030_v7 = vadd.f32 %v2740_v32, %v4129_v19  ;;  %v3317_v32 = vpack.c.bf16 %v2061_v50, %v2059_v12  ;;  %v2345_v12 = vld [vmem:[#allocation11 + $0x70] sm:$0xff]  ;;  %v2346_v50 = vld [vmem:[#allocation11 + $0x78] sm:$0xff] }
 0x2de   :  { %3250 = vmatpush1.bf16.msra.mxu0 %v3249_v22  ;;  %3492 = vtanh.f32 %v2030_v7  ;;  %v2066_v22 = vld [vmem:[#allocation10 + $0x6f8] sm:$0xff]  ;;  %v3321_v7 = vpack.c.bf16 %v2065_v54, %v2063_v46 }
 0x2df   :  { %3252 = vmatprep.subr.bf16.mxu0 %v3251_v44  ;;  %v3319_v44 = vpack.c.bf16 %v2066_v22, %v2064_v14  ;;  %v2317_v14 = vld [vmem:[%s4220_s6] sm:$0x3] }
 0x2e0   :  { %v2326_v22 = vrot.slane %v2317_v14, %v3957_v28 }
 0x2e2   :  { %3254 = vmatpush1.bf16.msra.mxu0 %v3253_v13  ;;  %v3355_v13 = vpack.c.bf16 %v2215_v4, %v2213_v62 }
 0x2e3   :  { %3256 = vmatprep.subr.bf16.mxu0 %v3255_v17  ;;  %v2212_v17 = vld [vmem:[#allocation10 + $0x700] sm:$0xff] }
 0x2e6   :  { %3258 = vmatpush1.bf16.msra.mxu0 %v3257_v48  ;;  %v2216_v48 = vld [vmem:[#allocation10 + $0x720] sm:$0xff] }
 0x2e7   :  { %3292 = vmatprep.subr.bf16.mxu0 %v3291_v51  ;;  %v2218_v51 = vld [vmem:[#allocation10 + $0x730] sm:$0xff] }
 0x2e8   :  { %v4162_v31 = vpop.eup %3492  ;;  %v3361_v58 = vpack.c.bf16 %v2218_v51, %v2216_v48 }
 0x2e9   :  { %1955 = vmatmul.mubr.f32.vlgmr.msra.gmra.mrb[6].mxu0 %v4156_v37  ;;  %2034 = vst [vmem:[#allocation14 + $0x30] sm:$0xff] %v4162_v31  ;;  %v2054_v37 = vld [vmem:[#allocation10 + $0x698] sm:$0xff] }
 0x2ea   :  { %3294 = vmatpush1.bf16.msra.mxu0 %v3293_v27  ;;  %2131 = vmatprep.mubr.f32.mxu0 %v3717_v0  ;;  %v3307_v59 = vpack.c.bf16 %v2054_v37, %v2052_v55  ;;  %v3363_v27 = vpack.c.bf16 %v2223_v56, %v2221_v52  ;;  %v2232_v37 = vld [vmem:[#allocation10 + $0x7a0] sm:$0xff] }
 0x2eb   :  { %3296 = vmatprep.subr.bf16.mxu0 %v3295_v29  ;;  %v2220_v29 = vld [vmem:[#allocation10 + $0x740] sm:$0xff] }
 0x2ec   :  { %v3365_v34 = vpack.c.bf16 %v2222_v30, %v2220_v29 }
 0x2ee   :  { %3298 = vmatpush1.bf16.msra.mxu0 %v3297_v36  ;;  %v3367_v36 = vpack.c.bf16 %v2227_v33, %v2225_v1 }
 0x2ef   :  { %3300 = vmatprep.subr.bf16.mxu0 %v3299_v38  ;;  %v2224_v38 = vld [vmem:[#allocation10 + $0x760] sm:$0xff] }
 0x2f2   :  { %3302 = vmatpush1.bf16.msra.mxu0 %v3301_v45  ;;  %v2228_v45 = vld [vmem:[#allocation10 + $0x780] sm:$0xff] }
 0x2f3   :  { %3304 = vmatprep.subr.bf16.mxu0 %v3303_v47  ;;  %v2233_v47 = vld [vmem:[#allocation10 + $0x7a8] sm:$0xff] }
 0x2f4   :  { %v3375_v55 = vpack.c.bf16 %v2235_v49, %v2233_v47 }
 0x2f6   :  { %3306 = vmatpush1.bf16.msra.mxu0 %v3305_v57  ;;  %v2234_v57 = vld [vmem:[#allocation10 + $0x7b0] sm:$0xff] }
 0x2f7   :  { %3308 = vmatprep.subr.bf16.mxu0 %v3307_v59  ;;  %v2237_v59 = vld [vmem:[#allocation10 + $0x7c8] sm:$0xff]  ;;  %v3377_v61 = vpack.c.bf16 %v2234_v57, %v2232_v37 }
 0x2f8   :  { %v2773_v8 = vpop.f32.mrb[24].mxu1  ;;  %v3379_v63 = vpack.c.bf16 %v2239_v60, %v2237_v59 }
 0x2f9   :  { %v2774_v15 = vpop.f32.mrb[25].mxu1 }
 0x2fa   :  { %3310 = vmatpush1.bf16.msra.mxu0 %v3309_v24  ;;  %v2775_v16 = vadd.f32 %v2774_v15, %v2773_v8  ;;  %v2238_v24 = vld [vmem:[#allocation10 + $0x7d0] sm:$0xff]  ;;  %v3385_v15 = vpack.c.bf16 %v2242_v11, %v2240_v9 }
 0x2fb   :  { %3312 = vmatprep.subr.bf16.mxu0 %v3311_v2  ;;  %v2241_v2 = vld [vmem:[#allocation10 + $0x7e8] sm:$0xff]  ;;  %v3381_v6 = vpack.c.bf16 %v2238_v24, %v2236_v20 }
 0x2fc   :  { %v2207_v25 = vadd.f32 %v2775_v16, %v4129_v19  ;;  %v3357_v19 = vpack.c.bf16 %v2214_v23, %v2212_v17  ;;  %v3383_v8 = vpack.c.bf16 %v2243_v3, %v2241_v2  ;;  %v2361_v16 = vld [vmem:[#allocation11 + $0xf0] sm:$0xff] }
 0x2fe   :  { %3494 = vtanh.f32 %v2207_v25  ;;  %3314 = vmatpush1.bf16.msra.mxu0 %v3313_v18  ;;  %v2362_v18 = vld [vmem:[#allocation11 + $0xf8] sm:$0xff]  ;;  %v3417_v25 = vpack.c.bf16 %v2346_v50, %v2345_v12 }
 0x2ff   :  { %3316 = vmatprep.subr.bf16.mxu0 %v3315_v21  ;;  %v3415_v21 = vpack.c.bf16 %v2362_v18, %v2361_v16 }
 0x301   :  { %3416 = vmatprep.subr.bf16.mxu1 %v3415_v21 }
 0x302   :  { %3318 = vmatpush1.bf16.msra.mxu0 %v3317_v32  ;;  %3418 = vmatpush3.bf16.msra.mxu1 %v3417_v25  ;;  %v2322_v32 = vrot.slane %v2317_v14, %v3954_v26 }
 0x303   :  { %3320 = vmatprep.subr.bf16.mxu0 %v3319_v44 }
 0x306   :  { %3322 = vmatpush1.bf16.msra.mxu0 %v3321_v7 }
 0x307   :  { %3356 = vmatprep.subr.bf16.mxu0 %v3355_v13 }
 0x308   :  { %v3495_v10 = vpop.eup %3494 }
 0x309   :  { %2211 = vst [vmem:[#allocation14 + $0x38] sm:$0xff] %v3495_v10  ;;  %2132 = vmatmul.mubr.f32.vlgmr.msra.gmra.mrb[6].mxu0 %v4162_v31  ;;  %v3369_v31 = vpack.c.bf16 %v2226_v35, %v2224_v38 }
 0x30a   :  { %3358 = vmatpush1.bf16.msra.mxu0 %v3357_v19  ;;  %2308 = vmatprep.mubr.f32.mxu0 %v3717_v0  ;;  %v2230_v0 = vld [vmem:[#allocation10 + $0x790] sm:$0xff] }
 0x30b   :  { %3360 = vmatprep.subr.bf16.mxu0 %v3359_v5  ;;  %v3373_v53 = vpack.c.bf16 %v2230_v0, %v2228_v45 }
 0x30e   :  { %3362 = vmatpush1.bf16.msra.mxu0 %v3361_v58 }
 0x30f   :  { %3364 = vmatprep.subr.bf16.mxu0 %v3363_v27 }
 0x312   :  { %3366 = vmatpush1.bf16.msra.mxu0 %v3365_v34 }
 0x313   :  { %3368 = vmatprep.subr.bf16.mxu0 %v3367_v36 }
 0x316   :  { %3370 = vmatpush1.bf16.msra.mxu0 %v3369_v31 }
 0x317   :  { %3372 = vmatprep.subr.bf16.mxu0 %v3371_v43 }
 0x31a   :  { %3374 = vmatpush1.bf16.msra.mxu0 %v3373_v53 }
 0x31b   :  { %3376 = vmatprep.subr.bf16.mxu0 %v3375_v55 }
 0x31e   :  { %3378 = vmatpush1.bf16.msra.mxu0 %v3377_v61 }
 0x31f   :  { %3380 = vmatprep.subr.bf16.mxu0 %v3379_v63 }
 0x322   :  { %3382 = vmatpush1.bf16.msra.mxu0 %v3381_v6 }
 0x323   :  { %3384 = vmatprep.subr.bf16.mxu0 %v3383_v8 }
 0x326   :  { %3386 = vmatpush1.bf16.msra.mxu0 %v3385_v15 }
 0x329   :  { %2309 = vmatmul.mubr.f32.vlgmr.msra.gmra.mrb[6].mxu0 %v3495_v10 }
 0x3fc   :  { %v2310_v44 = vpop.f32.mrb[6].mxu0 }
 0x3fd   :  { %v2312_v46 = vpop.f32.mrb[7].mxu0  ;;  %v2329_v62 = vadd.f32 %v2322_v32, %v2310_v44 }
 0x3fe   :  { %v2330_v54 = vadd.f32 %v2326_v22, %v2312_v46 }
 0x400   :  { %2434 = vmatprep.mubr.f32.mxu1 %v2330_v54 }
 0x401   :  { %2435 = vmatmul.mubr.f32.vlgmr.msra.gmra.mrb[26].mxu1 %v2329_v62 }
 0x402   :  { %3639 = shalt.err (!%p3636_p10)
}
 0x403   :  { %s3640_s19 = scalar_lea.hbm %s4224_s10, 1024 }
 0x404   :  { %p3641_p11 = scmp.ne.s32.totalorder %s4224_s10, %s3640_s19  ;;  %p3644_p12 = scmp.lt.u32.totalorder %s3640_s19, %s4224_s10 }
 0x406   :  { %p3646_p13 = pnand %p3644_p12, %p3641_p11 }
 0x408   :  { %3649 = shalt.err (!%p3646_p13)
}
 0x409   :  { %2460 = dma.vmem_to_hbm [thread:$0]  %s2458_s17, 1024, %s4224_s10, [#allocation15]  }
 0x40a   :  { %s3719_s23 = smov [#allocation16]  }
 0x40b   :  { %s2467_s24 = sshll.u32 %s3719_s23, 4  ;;  %s2468_s24 = int_to_ptr.vmem [resolvable:$true] %s2467_s24 }
 0x40c   :  { %s3650_s26 = scalar_lea.vmem %s2468_s24, 1792  ;;  %p3655_p1 = scmp.lt.s32.totalorder %s2468_s24, %s2468_s24 }
 0x40d   :  { %p3651_p0 = scmp.ne.s32.totalorder %s2468_s24, %s3650_s26  ;;  %p3656_p2 = scmp.lt.s32.totalorder %s3650_s26, %s3650_s26 }
 0x40f   :  { %p3657_p3 = por %p3656_p2, %p3655_p1 }
 0x411   :  { %p3658_p4 = pnand %p3657_p3, %p3651_p0 }
 0x413   :  { %3661 = shalt.err (!%p3658_p4)
}
 0x414   :  { %s3662_s25 = scalar_lea.hbm %s4225_s11, 1792 }
 0x415   :  { %p3663_p5 = scmp.ne.s32.totalorder %s4225_s11, %s3662_s25  ;;  %p3666_p6 = scmp.lt.u32.totalorder %s3662_s25, %s4225_s11 }
 0x417   :  { %p3668_p7 = pnand %p3666_p6, %p3663_p5 }
 0x419   :  { %3671 = shalt.err (!%p3668_p7)
}
 0x41a   :  { %2470 = dma.vmem_to_hbm [thread:$0]  %s2468_s24, 1792, %s4225_s11, [#allocation15]   ;;  %v2495_v28 = vld [vmem:[%s4222_s8] ss:$0 sm:$0xff] }
 0x41b   :  { %s3720_s4 = smov [#allocation13]  }
 0x41c   :  { %s2447_s1 = sshll.u32 %s3720_s4, 4  ;;  %s2448_s1 = int_to_ptr.vmem [resolvable:$true] %s2447_s1 }
 0x41d   :  { %s3672_s16 = scalar_lea.vmem %s2448_s1, 128  ;;  %p3677_p9 = scmp.lt.s32.totalorder %s2448_s1, %s2448_s1 }
 0x41e   :  { %p3673_p8 = scmp.ne.s32.totalorder %s2448_s1, %s3672_s16  ;;  %p3678_p10 = scmp.lt.s32.totalorder %s3672_s16, %s3672_s16 }
 0x420   :  { %p3679_p11 = por %p3678_p10, %p3677_p9 }
 0x422   :  { %p3680_p12 = pnand %p3679_p11, %p3673_p8 }
 0x4d4   :  { %v2808_v26 = vpop.f32.mrb[26].mxu1 }
 0x4d5   :  { %v2809_v4 = vpop.f32.mrb[27].mxu1 }
 0x4d6   :  { %v2810_v7 = vadd.f32 %v2809_v4, %v2808_v26 }
 0x4d8   :  { %v2437_v13 = vadd.f32 %v2810_v7, %v2495_v28 }
 0x4da   :  { %2440 = vst [vmem:[#allocation13] sm:$0xff] %v2437_v13 }
 0x4db   :  { %3683 = shalt.err (!%p3680_p12)
}
 0x4dc   :  { %s3684_s3 = scalar_lea.hbm %s4223_s9, 128 }
 0x4dd   :  { %p3685_p13 = scmp.ne.s32.totalorder %s4223_s9, %s3684_s3  ;;  %p3688_p0 = scmp.lt.u32.totalorder %s3684_s3, %s4223_s9 }
 0x4df   :  { %p3690_p1 = pnand %p3688_p0, %p3685_p13 }
 0x4e1   :  { %3693 = shalt.err (!%p3690_p1)
}
 0x4e2   :  { %2450 = dma.vmem_to_hbm [thread:$0]  %s2448_s1, 128, %s4223_s9, [#allocation4]  }
 0x4e3   :  { %3702 = dma.done.wait [#allocation4], 128  }
 0x4e4   :  { %3703 = vsyncadd [#allocation4], 4294967168 }
 0x4e5   :  { %3704 = dma.done.wait [#allocation15], 2816  }
 0x4e6   :  { %3705 = vsyncadd [#allocation15], 4294964480 }
 0x4e7   :  { %2480 = vsyncpa [#allocation3], 1 }
 0x4e8   :  { %2481 = vsyncpa [#allocation6], 1 }
 0x4e9   :  { %2482 = vsyncpa [#allocation9], 1 }
 0x4ea   :  { %2483 = vsyncpa [#allocation12], 1 }
 0x4eb   :  { %2484 = vsyncpa [#allocation4], 1 }
 0x4ec   :  { %2485 = vsyncpa [#allocation15], 1 }

</bundles_post_ra>
